<compile_context>
chip_gen: v7x
topology: tpu7x:2x2x1
jax: 0.10.0
libtpu: 0.0.40
codegen_flags: <defaults>
</compile_context>

<pallas_src>
import functools

import jax
import jax.numpy as jnp
from jax.experimental import pallas as pl
from jax.experimental.pallas import tpu as pltpu

_EPS = 1e-5
# Matmul input dtype.  float32 keeps exact parity with the fp32 PyTorch reference;
# set to jnp.bfloat16 on v6e/v7x for the fast MXU path (accumulation stays f32 via
# preferred_element_type either way).
_MM_DTYPE = jnp.float32


def _gelu_erf(x):
    # torch.nn.GELU default = exact erf form.  erf via Abramowitz & Stegun 7.1.26
    # (|err| < 1.5e-7), using only ops Mosaic always lowers.
    a = x * 0.7071067811865476
    ax = jnp.abs(a)
    t = 1.0 / (1.0 + 0.3275911 * ax)
    poly = ((((1.061405429 * t - 1.453152027) * t + 1.421413741) * t
             - 0.284496736) * t + 0.254829592) * t
    erf = 1.0 - poly * jnp.exp(-ax * ax)
    erf = jnp.where(a >= 0, erf, -erf)
    return 0.5 * x * (1.0 + erf)


# --------------------- kernel A: fused multi-head attention ------------------------ #

def _attention_kernel(hlv_ref, llv_ref, x_ref, wq_ref, wk_ref, wv_ref,
                      wo_ref, bo_ref, y_ref, st_ref, seq_ref, *, scale, heads):
    C, L = x_ref.shape[1], x_ref.shape[2]
    S = seq_ref.shape[0]

    # Build the (S, C) token sequence in VMEM: [spatial tokens, hlv, llv].
    seq_ref[0:L, :] = jnp.transpose(x_ref[0])            # (C, L) -> (L, C)
    seq_ref[L:L + 1, :] = hlv_ref[0]
    seq_ref[L + 1:L + 2, :] = llv_ref[0]
    seq = seq_ref[...].astype(_MM_DTYPE)

    acc = jnp.zeros((S, C), jnp.float32)
    for h in range(heads):                                # static unroll, data in VMEM
        q = jnp.dot(seq, wq_ref[h].astype(_MM_DTYPE),
                    preferred_element_type=jnp.float32) * scale   # fold scale into q
        k = jnp.dot(seq, wk_ref[h].astype(_MM_DTYPE),
                    preferred_element_type=jnp.float32)
        v = jnp.dot(seq, wv_ref[h].astype(_MM_DTYPE),
                    preferred_element_type=jnp.float32)
        # q @ k^T without an explicit transpose of k (contract last dims of both).
        s = jax.lax.dot_general(q.astype(_MM_DTYPE), k.astype(_MM_DTYPE),
                                (((1,), (1,)), ((), ())),
                                preferred_element_type=jnp.float32)
        m = jnp.max(s, axis=-1, keepdims=True)
        p = jnp.exp(s - m)
        attn = p * pl.reciprocal(jnp.sum(p, axis=-1, keepdims=True), approx=True)
        o_h = jnp.dot(attn.astype(_MM_DTYPE), v.astype(_MM_DTYPE),
                      preferred_element_type=jnp.float32)          # (S, Dh)
        # Accumulate the output projection per head (no lane-concat of head outputs).
        acc = acc + jnp.dot(o_h.astype(_MM_DTYPE), wo_ref[h].astype(_MM_DTYPE),
                            preferred_element_type=jnp.float32)

    y = acc + bo_ref[...]
    y_ref[0] = y.astype(y_ref.dtype)
    # Per-batch partial sums for norm1's batch statistics.
    st_ref[0, 0:1, :] = jnp.sum(y, axis=0, keepdims=True)
    st_ref[0, 1:2, :] = jnp.sum(y * y, axis=0, keepdims=True)


def _attention_call(hlv, llv, x_cl, wq, wk, wv, wo, bo, *, scale):
    n, C, L = x_cl.shape
    H, _, Dh = wq.shape
    S = L + 2
    return pl.pallas_call(
        functools.partial(_attention_kernel, scale=scale, heads=H),
        grid=(n,),
        in_specs=[
            pl.BlockSpec((1, 1, C), lambda b: (b, 0, 0)),      # hlv token
            pl.BlockSpec((1, 1, C), lambda b: (b, 0, 0)),      # llv token
            pl.BlockSpec((1, C, L), lambda b: (b, 0, 0)),      # x, channel-major view
            pl.BlockSpec((H, C, Dh), lambda b: (0, 0, 0)),     # wq (VMEM-resident)
            pl.BlockSpec((H, C, Dh), lambda b: (0, 0, 0)),     # wk
            pl.BlockSpec((H, C, Dh), lambda b: (0, 0, 0)),     # wv
            pl.BlockSpec((H, Dh, C), lambda b: (0, 0, 0)),     # wo
            pl.BlockSpec((1, C), lambda b: (0, 0)),            # b_out
        ],
        out_specs=[
            pl.BlockSpec((1, S, C), lambda b: (b, 0, 0)),      # attention output
            pl.BlockSpec((1, 2, C), lambda b: (b, 0, 0)),      # [sum; sum of squares]
        ],
        out_shape=[
            jax.ShapeDtypeStruct((n, S, C), jnp.float32),
            jax.ShapeDtypeStruct((n, 2, C), jnp.float32),
        ],
        scratch_shapes=[pltpu.VMEM((S, C), jnp.float32)],
        compiler_params=pltpu.CompilerParams(dimension_semantics=("parallel",)),
    )(hlv, llv, x_cl, wq, wk, wv, wo, bo)


# ----------------------- kernel B: norm1 + FeedForward ----------------------------- #

def _ffn_kernel(y_ref, st_ref, g_ref, b_ref, w1_ref, b1_ref, w2_ref, b2_ref,
                o_ref, st2_ref, *, inv_count):
    # Finalize norm1 (BatchNorm1d training mode: biased variance over batch*tokens).
    st = jnp.sum(st_ref[...], axis=0)                    # (2, C)
    mean = st[0:1, :] * inv_count
    var = jnp.maximum(st[1:2, :] * inv_count - mean * mean, 0.0)
    bn_scale = g_ref[...] * jax.lax.rsqrt(var + _EPS)
    bn_shift = b_ref[...] - mean * bn_scale

    z = (y_ref[0] * bn_scale + bn_shift).astype(_MM_DTYPE)         # norm1 applied
    h = jnp.dot(z, w1_ref[...].astype(_MM_DTYPE),
                preferred_element_type=jnp.float32) + b1_ref[...]
    h = _gelu_erf(h)
    y2 = jnp.dot(h.astype(_MM_DTYPE), w2_ref[...].astype(_MM_DTYPE),
                 preferred_element_type=jnp.float32) + b2_ref[...]

    o_ref[0] = y2.astype(o_ref.dtype)
    # Per-batch partial sums for norm2's batch statistics.
    st2_ref[0, 0:1, :] = jnp.sum(y2, axis=0, keepdims=True)
    st2_ref[0, 1:2, :] = jnp.sum(y2 * y2, axis=0, keepdims=True)


def _ffn_call(y1, st1, gamma1, beta1, w1, b1, w2, b2):
    n, S, C = y1.shape
    M = w1.shape[1]
    inv_count = 1.0 / float(n * S)
    return pl.pallas_call(
        functools.partial(_ffn_kernel, inv_count=inv_count),
        grid=(n,),
        in_specs=[
            pl.BlockSpec((1, S, C), lambda b: (b, 0, 0)),      # attention output
            pl.BlockSpec((n, 2, C), lambda b: (0, 0, 0)),      # norm1 partial stats
            pl.BlockSpec((1, C), lambda b: (0, 0)),            # gamma1
            pl.BlockSpec((1, C), lambda b: (0, 0)),            # beta1
            pl.BlockSpec((C, M), lambda b: (0, 0)),            # w1 (VMEM-resident)
            pl.BlockSpec((1, M), lambda b: (0, 0)),            # b1
            pl.BlockSpec((M, C), lambda b: (0, 0)),            # w2
            pl.BlockSpec((1, C), lambda b: (0, 0)),            # b2
        ],
        out_specs=[
            pl.BlockSpec((1, S, C), lambda b: (b, 0, 0)),
            pl.BlockSpec((1, 2, C), lambda b: (b, 0, 0)),
        ],
        out_shape=[
            jax.ShapeDtypeStruct((n, S, C), jnp.float32),
            jax.ShapeDtypeStruct((n, 2, C), jnp.float32),
        ],
        compiler_params=pltpu.CompilerParams(dimension_semantics=("parallel",)),
    )(y1, st1, gamma1, beta1, w1, b1, w2, b2)


# ------------------- kernel C: norm2 + final output layouts ------------------------ #

def _norm2_out_kernel(y_ref, st_ref, g_ref, b_ref, x_ref, hlv_ref, llv_ref,
                      *, inv_count, L):
    st = jnp.sum(st_ref[...], axis=0)                    # (2, C)
    mean = st[0:1, :] * inv_count
    var = jnp.maximum(st[1:2, :] * inv_count - mean * mean, 0.0)
    bn_scale = g_ref[...] * jax.lax.rsqrt(var + _EPS)
    bn_shift = b_ref[...] - mean * bn_scale

    z = y_ref[0] * bn_scale + bn_shift                   # (S, C)
    # Spatial tokens back to channel-major (C, L) so the wrapper's final reshape to
    # (n, c, h, w, d) is a free view (no XLA transpose copy).
    x_ref[0] = jnp.transpose(z[0:L, :]).astype(x_ref.dtype)
    hlv_ref[0] = z[L:L + 1, :].astype(hlv_ref.dtype)
    llv_ref[0] = z[L + 1:L + 2, :].astype(llv_ref.dtype)


def _norm2_out_call(y2, st2, gamma2, beta2, *, L):
    n, S, C = y2.shape
    inv_count = 1.0 / float(n * S)
    return pl.pallas_call(
        functools.partial(_norm2_out_kernel, inv_count=inv_count, L=L),
        grid=(n,),
        in_specs=[
            pl.BlockSpec((1, S, C), lambda b: (b, 0, 0)),      # FFN output
            pl.BlockSpec((n, 2, C), lambda b: (0, 0, 0)),      # norm2 partial stats
            pl.BlockSpec((1, C), lambda b: (0, 0)),            # gamma2
            pl.BlockSpec((1, C), lambda b: (0, 0)),            # beta2
        ],
        out_specs=[
            pl.BlockSpec((1, C, L), lambda b: (b, 0, 0)),      # spatial part (channel-major)
            pl.BlockSpec((1, 1, C), lambda b: (b, 0, 0)),      # hlv token out
            pl.BlockSpec((1, 1, C), lambda b: (b, 0, 0)),      # llv token out
        ],
        out_shape=[
            jax.ShapeDtypeStruct((n, C, L), jnp.float32),
            jax.ShapeDtypeStruct((n, 1, C), jnp.float32),
            jax.ShapeDtypeStruct((n, 1, C), jnp.float32),
        ],
        compiler_params=pltpu.CompilerParams(dimension_semantics=("parallel",)),
    )(y2, st2, gamma2, beta2)


# --------------------------------- module wrapper ----------------------------------- #

def init_params(key, dim, heads, dim_head, mlp_dim):
    inner = heads * dim_head
    ks = jax.random.split(key, 7)

    def u(k, shape, fan_in):
        bound = 1.0 / float(fan_in) ** 0.5
        return jax.random.uniform(k, shape, jnp.float32, -bound, bound)

    # Attention weights, pre-laid-out per head for the fused kernel.
    w_qkv = u(ks[0], (dim, 3 * inner), dim)                 # == torch to_qkv.weight.T

    def heads_of(wpart):                                    # (dim, inner) -> (H, dim, Dh)
        return wpart.reshape(dim, heads, dim_head).transpose(1, 0, 2)

    w_out = u(ks[1], (inner, dim), inner)                   # == torch to_out[0].weight.T
    return {
        "wq": heads_of(w_qkv[:, 0 * inner:1 * inner]),
        "wk": heads_of(w_qkv[:, 1 * inner:2 * inner]),
        "wv": heads_of(w_qkv[:, 2 * inner:3 * inner]),
        "wo": w_out.reshape(heads, dim_head, dim),
        "b_out": u(ks[2], (1, dim), inner),
        # FeedForward
        "w1": u(ks[3], (dim, mlp_dim), dim),
        "b1": u(ks[4], (1, mlp_dim), dim),
        "w2": u(ks[5], (mlp_dim, dim), mlp_dim),
        "b2": u(ks[6], (1, dim), mlp_dim),
        # norm1: default BatchNorm1d affine (weight=1, bias=0)
        "gamma1": jnp.ones((1, dim), jnp.float32),
        "beta1": jnp.zeros((1, dim), jnp.float32),
        # norm2: constant_(weight, 0), constant_(bias, 0) as in the module
        "gamma2": jnp.zeros((1, dim), jnp.float32),
        "beta2": jnp.zeros((1, dim), jnp.float32),
    }


def deep_attention_token(x5, hlv, llv, params, *, heads, dim_head):
    n, c, h, w, d = x5.shape
    L = h * w * d
    scale = float(dim_head) ** -0.5

    # Natural channel-major view of the spatial tokens — no host-side permute.
    x_cl = x5.reshape(n, c, L)

    # A) fused QKV + multi-head attention + output projection (+ norm1 partial stats)
    y1, st1 = _attention_call(hlv, llv, x_cl,
                              params["wq"], params["wk"], params["wv"],
                              params["wo"], params["b_out"], scale=scale)
    # B) norm1 (batch stats finalized in-kernel) + Linear/GELU/Linear (+ norm2 stats)
    y2, st2 = _ffn_call(y1, st1, params["gamma1"], params["beta1"],
                        params["w1"], params["b1"], params["w2"], params["b2"])
    # C) norm2 + final output layouts
    x_out_cl, hlv_out, llv_out = _norm2_out_call(y2, st2, params["gamma2"],
                                                 params["beta2"], L=L)
    return x_out_cl.reshape(n, c, h, w, d), hlv_out, llv_out


# --------------------------------------- main ---------------------------------------- #

if __name__ == "__main__":
    key = jax.random.PRNGKey(0)
    kx, kh, kl, kp = jax.random.split(key, 4)

    n, c, h, w, d = 2, 32, 4, 4, 4            # dim = c = 32, L = 64, S = 66
    heads, dim_head, mlp_dim = 4, 16, 64

    x = jax.random.normal(kx, (n, c, h, w, d), jnp.float32)
    hlv_token = jax.random.normal(kh, (n, 1, c), jnp.float32)
    llv_token = jax.random.normal(kl, (n, 1, c), jnp.float32)
    params = init_params(kp, c, heads, dim_head, mlp_dim)

    fwd = jax.jit(functools.partial(deep_attention_token,
                                    heads=heads, dim_head=dim_head))
    x_out, hlv_out, llv_out = jax.block_until_ready(fwd(x, hlv_token, llv_token, params))

    assert x_out.shape == (n, c, h, w, d), x_out.shape
    assert hlv_out.shape == (n, 1, c), hlv_out.shape
    assert llv_out.shape == (n, 1, c), llv_out.shape
    assert bool(jnp.all(jnp.isfinite(x_out)))
    # norm2 is zero-initialized (weight=0, bias=0) in the reference module, so the
    # whole forward output (spatial part and both tokens) is exactly zero.
    assert bool(jnp.allclose(x_out, 0.0, atol=1e-5))
    assert bool(jnp.allclose(hlv_out, 0.0, atol=1e-5))
    assert bool(jnp.allclose(llv_out, 0.0, atol=1e-5))
    print("KERNEL_OK")
</pallas_src>

<mosaic_0001>
module attributes {stable_mosaic.version = 11 : i64} {
  func.func @_attention_kernel(%arg0: i32, %arg1: memref<1x1x32xf32, #tpu.memory_space<vmem>>, %arg2: memref<1x1x32xf32, #tpu.memory_space<vmem>>, %arg3: memref<1x32x64xf32, #tpu.memory_space<vmem>>, %arg4: memref<4x32x16xf32, #tpu.memory_space<vmem>>, %arg5: memref<4x32x16xf32, #tpu.memory_space<vmem>>, %arg6: memref<4x32x16xf32, #tpu.memory_space<vmem>>, %arg7: memref<4x16x32xf32, #tpu.memory_space<vmem>>, %arg8: memref<1x32xf32, #tpu.memory_space<vmem>>, %arg9: memref<1x66x32xf32, #tpu.memory_space<vmem>>, %arg10: memref<1x2x32xf32, #tpu.memory_space<vmem>>, %arg11: memref<66x32xf32, #tpu.memory_space<vmem>>) attributes {dimension_semantics = [#tpu.dimension_semantics<parallel>], iteration_bounds = array<i64: 2>, scalar_prefetch = 0 : i64, scratch_operands = 1 : i64, tpu.core_type = #tpu.core_type<tc>, window_params = [{transform_indices = @transform_0, window_bounds = array<i64: 1, 1, 32>}, {transform_indices = @transform_1, window_bounds = array<i64: 1, 1, 32>}, {transform_indices = @transform_2, window_bounds = array<i64: 1, 32, 64>}, {pipeline_mode = #tpu.pipeline_mode<synchronous>, transform_indices = @transform_3, window_bounds = array<i64: 4, 32, 16>}, {pipeline_mode = #tpu.pipeline_mode<synchronous>, transform_indices = @transform_4, window_bounds = array<i64: 4, 32, 16>}, {pipeline_mode = #tpu.pipeline_mode<synchronous>, transform_indices = @transform_5, window_bounds = array<i64: 4, 32, 16>}, {pipeline_mode = #tpu.pipeline_mode<synchronous>, transform_indices = @transform_6, window_bounds = array<i64: 4, 16, 32>}, {pipeline_mode = #tpu.pipeline_mode<synchronous>, transform_indices = @transform_7, window_bounds = array<i64: 1, 32>}, {transform_indices = @transform_8, window_bounds = array<i64: 1, 66, 32>}, {transform_indices = @transform_9, window_bounds = array<i64: 1, 2, 32>}]} {
    %c0 = arith.constant 0 : index
    %c0_0 = arith.constant 0 : index
    %c0_1 = arith.constant 0 : index
    %0 = vector.load %arg3[%c0, %c0_0, %c0_1] : memref<1x32x64xf32, #tpu.memory_space<vmem>>, vector<1x32x64xf32>
    %1 = vector.shape_cast %0 : vector<1x32x64xf32> to vector<32x64xf32>
    %2 = tpu.transpose %1, [1, 0] : vector<32x64xf32> -> vector<64x32xf32>
    %c0_2 = arith.constant 0 : index
    %c0_3 = arith.constant 0 : index
    %3 = vector.load %arg11[%c0_2, %c0_3] : memref<66x32xf32, #tpu.memory_space<vmem>>, vector<64x32xf32>
    tpu.vector_store %arg11[%c0_2, %c0_3], %2 {strides = array<i32>} : memref<66x32xf32, #tpu.memory_space<vmem>>, vector<64x32xf32>,
    %c0_4 = arith.constant 0 : index
    %c0_5 = arith.constant 0 : index
    %c0_6 = arith.constant 0 : index
    %4 = vector.load %arg1[%c0_4, %c0_5, %c0_6] : memref<1x1x32xf32, #tpu.memory_space<vmem>>, vector<1x1x32xf32>
    %5 = vector.shape_cast %4 : vector<1x1x32xf32> to vector<1x32xf32>
    %c64 = arith.constant 64 : index
    %c0_7 = arith.constant 0 : index
    %6 = vector.load %arg11[%c64, %c0_7] : memref<66x32xf32, #tpu.memory_space<vmem>>, vector<1x32xf32>
    tpu.vector_store %arg11[%c64, %c0_7], %5 {strides = array<i32>} : memref<66x32xf32, #tpu.memory_space<vmem>>, vector<1x32xf32>,
    %c0_8 = arith.constant 0 : index
    %c0_9 = arith.constant 0 : index
    %c0_10 = arith.constant 0 : index
    %7 = vector.load %arg2[%c0_8, %c0_9, %c0_10] : memref<1x1x32xf32, #tpu.memory_space<vmem>>, vector<1x1x32xf32>
    %8 = vector.shape_cast %7 : vector<1x1x32xf32> to vector<1x32xf32>
    %c65 = arith.constant 65 : index
    %c0_11 = arith.constant 0 : index
    %9 = vector.load %arg11[%c65, %c0_11] : memref<66x32xf32, #tpu.memory_space<vmem>>, vector<1x32xf32>
    tpu.vector_store %arg11[%c65, %c0_11], %8 {strides = array<i32>} : memref<66x32xf32, #tpu.memory_space<vmem>>, vector<1x32xf32>,
    %c0_12 = arith.constant 0 : index
    %c0_13 = arith.constant 0 : index
    %10 = vector.load %arg11[%c0_12, %c0_13] : memref<66x32xf32, #tpu.memory_space<vmem>>, vector<66x32xf32>
    %cst = arith.constant 0.000000e+00 : f32
    %11 = vector.broadcast %cst : f32 to vector<66x32xf32>
    %c0_14 = arith.constant 0 : index
    %c0_15 = arith.constant 0 : index
    %c0_16 = arith.constant 0 : index
    %12 = vector.load %arg4[%c0_14, %c0_15, %c0_16] : memref<4x32x16xf32, #tpu.memory_space<vmem>>, vector<1x32x16xf32>
    %13 = vector.shape_cast %12 : vector<1x32x16xf32> to vector<32x16xf32>
    %cst_17 = arith.constant dense<0.000000e+00> : vector<66x16xf32>
    %14 = tpu.matmul %10, %13, %cst_17 {dimension_numbers = #tpu.dot_dimension_numbers<[1], [0], [0], [1], [0, 0, 1, 1], [], []>} : vector<66x32xf32>, vector<32x16xf32>, vector<66x16xf32> -> vector<66x16xf32>
    %cst_18 = arith.constant 2.500000e-01 : f32
    %15 = vector.broadcast %cst_18 : f32 to vector<66x16xf32>
    %16 = arith.mulf %14, %15 : vector<66x16xf32>
    %c0_19 = arith.constant 0 : index
    %c0_20 = arith.constant 0 : index
    %c0_21 = arith.constant 0 : index
    %17 = vector.load %arg5[%c0_19, %c0_20, %c0_21] : memref<4x32x16xf32, #tpu.memory_space<vmem>>, vector<1x32x16xf32>
    %18 = vector.shape_cast %17 : vector<1x32x16xf32> to vector<32x16xf32>
    %cst_22 = arith.constant dense<0.000000e+00> : vector<66x16xf32>
    %19 = tpu.matmul %10, %18, %cst_22 {dimension_numbers = #tpu.dot_dimension_numbers<[1], [0], [0], [1], [0, 0, 1, 1], [], []>} : vector<66x32xf32>, vector<32x16xf32>, vector<66x16xf32> -> vector<66x16xf32>
    %c0_23 = arith.constant 0 : index
    %c0_24 = arith.constant 0 : index
    %c0_25 = arith.constant 0 : index
    %20 = vector.load %arg6[%c0_23, %c0_24, %c0_25] : memref<4x32x16xf32, #tpu.memory_space<vmem>>, vector<1x32x16xf32>
    %21 = vector.shape_cast %20 : vector<1x32x16xf32> to vector<32x16xf32>
    %cst_26 = arith.constant dense<0.000000e+00> : vector<66x16xf32>
    %22 = tpu.matmul %10, %21, %cst_26 {dimension_numbers = #tpu.dot_dimension_numbers<[1], [0], [0], [1], [0, 0, 1, 1], [], []>} : vector<66x32xf32>, vector<32x16xf32>, vector<66x16xf32> -> vector<66x16xf32>
    %cst_27 = arith.constant dense<0.000000e+00> : vector<66x66xf32>
    %23 = tpu.matmul %16, %19, %cst_27 {dimension_numbers = #tpu.dot_dimension_numbers<[1], [1], [0], [0], [0, 0, 1, 0], [], []>} : vector<66x16xf32>, vector<66x16xf32>, vector<66x66xf32> -> vector<66x66xf32>
    %cst_28 = arith.constant dense<0xFF800000> : vector<66xf32>
    %24 = vector.multi_reduction <maximumf>, %23, %cst_28 [1] : vector<66x66xf32> to vector<66xf32>
    %25 = vector.shape_cast %24 : vector<66xf32> to vector<66x1xf32>
    %26 = vector.broadcast %25 : vector<66x1xf32> to vector<66x66xf32>
    %27 = arith.subf %23, %26 : vector<66x66xf32>
    %28 = math.exp %27 : vector<66x66xf32>
    %cst_29 = arith.constant dense<0.000000e+00> : vector<66xf32>
    %29 = vector.multi_reduction <add>, %28, %cst_29 [1] : vector<66x66xf32> to vector<66xf32>
    %30 = vector.shape_cast %29 : vector<66xf32> to vector<66x1xf32>
    %31 = tpu.reciprocal %30 {approx = true} : vector<66x1xf32> -> vector<66x1xf32>
    %32 = vector.broadcast %31 : vector<66x1xf32> to vector<66x66xf32>
    %33 = arith.mulf %28, %32 : vector<66x66xf32>
    %cst_30 = arith.constant dense<0.000000e+00> : vector<66x16xf32>
    %34 = tpu.matmul %33, %22, %cst_30 {dimension_numbers = #tpu.dot_dimension_numbers<[1], [0], [0], [1], [0, 0, 1, 1], [], []>} : vector<66x66xf32>, vector<66x16xf32>, vector<66x16xf32> -> vector<66x16xf32>
    %c0_31 = arith.constant 0 : index
    %c0_32 = arith.constant 0 : index
    %c0_33 = arith.constant 0 : index
    %35 = vector.load %arg7[%c0_31, %c0_32, %c0_33] : memref<4x16x32xf32, #tpu.memory_space<vmem>>, vector<1x16x32xf32>
    %36 = vector.shape_cast %35 : vector<1x16x32xf32> to vector<16x32xf32>
    %cst_34 = arith.constant dense<0.000000e+00> : vector<66x32xf32>
    %37 = tpu.matmul %34, %36, %cst_34 {dimension_numbers = #tpu.dot_dimension_numbers<[1], [0], [0], [1], [0, 0, 1, 1], [], []>} : vector<66x16xf32>, vector<16x32xf32>, vector<66x32xf32> -> vector<66x32xf32>
    %38 = arith.addf %11, %37 : vector<66x32xf32>
    %c1 = arith.constant 1 : index
    %c0_35 = arith.constant 0 : index
    %c0_36 = arith.constant 0 : index
    %39 = vector.load %arg4[%c1, %c0_35, %c0_36] : memref<4x32x16xf32, #tpu.memory_space<vmem>>, vector<1x32x16xf32>
    %40 = vector.shape_cast %39 : vector<1x32x16xf32> to vector<32x16xf32>
    %cst_37 = arith.constant dense<0.000000e+00> : vector<66x16xf32>
    %41 = tpu.matmul %10, %40, %cst_37 {dimension_numbers = #tpu.dot_dimension_numbers<[1], [0], [0], [1], [0, 0, 1, 1], [], []>} : vector<66x32xf32>, vector<32x16xf32>, vector<66x16xf32> -> vector<66x16xf32>
    %cst_38 = arith.constant 2.500000e-01 : f32
    %42 = vector.broadcast %cst_38 : f32 to vector<66x16xf32>
    %43 = arith.mulf %41, %42 : vector<66x16xf32>
    %c1_39 = arith.constant 1 : index
    %c0_40 = arith.constant 0 : index
    %c0_41 = arith.constant 0 : index
    %44 = vector.load %arg5[%c1_39, %c0_40, %c0_41] : memref<4x32x16xf32, #tpu.memory_space<vmem>>, vector<1x32x16xf32>
    %45 = vector.shape_cast %44 : vector<1x32x16xf32> to vector<32x16xf32>
    %cst_42 = arith.constant dense<0.000000e+00> : vector<66x16xf32>
    %46 = tpu.matmul %10, %45, %cst_42 {dimension_numbers = #tpu.dot_dimension_numbers<[1], [0], [0], [1], [0, 0, 1, 1], [], []>} : vector<66x32xf32>, vector<32x16xf32>, vector<66x16xf32> -> vector<66x16xf32>
    %c1_43 = arith.constant 1 : index
    %c0_44 = arith.constant 0 : index
    %c0_45 = arith.constant 0 : index
    %47 = vector.load %arg6[%c1_43, %c0_44, %c0_45] : memref<4x32x16xf32, #tpu.memory_space<vmem>>, vector<1x32x16xf32>
    %48 = vector.shape_cast %47 : vector<1x32x16xf32> to vector<32x16xf32>
    %cst_46 = arith.constant dense<0.000000e+00> : vector<66x16xf32>
    %49 = tpu.matmul %10, %48, %cst_46 {dimension_numbers = #tpu.dot_dimension_numbers<[1], [0], [0], [1], [0, 0, 1, 1], [], []>} : vector<66x32xf32>, vector<32x16xf32>, vector<66x16xf32> -> vector<66x16xf32>
    %cst_47 = arith.constant dense<0.000000e+00> : vector<66x66xf32>
    %50 = tpu.matmul %43, %46, %cst_47 {dimension_numbers = #tpu.dot_dimension_numbers<[1], [1], [0], [0], [0, 0, 1, 0], [], []>} : vector<66x16xf32>, vector<66x16xf32>, vector<66x66xf32> -> vector<66x66xf32>
    %cst_48 = arith.constant dense<0xFF800000> : vector<66xf32>
    %51 = vector.multi_reduction <maximumf>, %50, %cst_48 [1] : vector<66x66xf32> to vector<66xf32>
    %52 = vector.shape_cast %51 : vector<66xf32> to vector<66x1xf32>
    %53 = vector.broadcast %52 : vector<66x1xf32> to vector<66x66xf32>
    %54 = arith.subf %50, %53 : vector<66x66xf32>
    %55 = math.exp %54 : vector<66x66xf32>
    %cst_49 = arith.constant dense<0.000000e+00> : vector<66xf32>
    %56 = vector.multi_reduction <add>, %55, %cst_49 [1] : vector<66x66xf32> to vector<66xf32>
    %57 = vector.shape_cast %56 : vector<66xf32> to vector<66x1xf32>
    %58 = tpu.reciprocal %57 {approx = true} : vector<66x1xf32> -> vector<66x1xf32>
    %59 = vector.broadcast %58 : vector<66x1xf32> to vector<66x66xf32>
    %60 = arith.mulf %55, %59 : vector<66x66xf32>
    %cst_50 = arith.constant dense<0.000000e+00> : vector<66x16xf32>
    %61 = tpu.matmul %60, %49, %cst_50 {dimension_numbers = #tpu.dot_dimension_numbers<[1], [0], [0], [1], [0, 0, 1, 1], [], []>} : vector<66x66xf32>, vector<66x16xf32>, vector<66x16xf32> -> vector<66x16xf32>
    %c1_51 = arith.constant 1 : index
    %c0_52 = arith.constant 0 : index
    %c0_53 = arith.constant 0 : index
    %62 = vector.load %arg7[%c1_51, %c0_52, %c0_53] : memref<4x16x32xf32, #tpu.memory_space<vmem>>, vector<1x16x32xf32>
    %63 = vector.shape_cast %62 : vector<1x16x32xf32> to vector<16x32xf32>
    %cst_54 = arith.constant dense<0.000000e+00> : vector<66x32xf32>
    %64 = tpu.matmul %61, %63, %cst_54 {dimension_numbers = #tpu.dot_dimension_numbers<[1], [0], [0], [1], [0, 0, 1, 1], [], []>} : vector<66x16xf32>, vector<16x32xf32>, vector<66x32xf32> -> vector<66x32xf32>
    %65 = arith.addf %38, %64 : vector<66x32xf32>
    %c2 = arith.constant 2 : index
    %c0_55 = arith.constant 0 : index
    %c0_56 = arith.constant 0 : index
    %66 = vector.load %arg4[%c2, %c0_55, %c0_56] : memref<4x32x16xf32, #tpu.memory_space<vmem>>, vector<1x32x16xf32>
    %67 = vector.shape_cast %66 : vector<1x32x16xf32> to vector<32x16xf32>
    %cst_57 = arith.constant dense<0.000000e+00> : vector<66x16xf32>
    %68 = tpu.matmul %10, %67, %cst_57 {dimension_numbers = #tpu.dot_dimension_numbers<[1], [0], [0], [1], [0, 0, 1, 1], [], []>} : vector<66x32xf32>, vector<32x16xf32>, vector<66x16xf32> -> vector<66x16xf32>
    %cst_58 = arith.constant 2.500000e-01 : f32
    %69 = vector.broadcast %cst_58 : f32 to vector<66x16xf32>
    %70 = arith.mulf %68, %69 : vector<66x16xf32>
    %c2_59 = arith.constant 2 : index
    %c0_60 = arith.constant 0 : index
    %c0_61 = arith.constant 0 : index
    %71 = vector.load %arg5[%c2_59, %c0_60, %c0_61] : memref<4x32x16xf32, #tpu.memory_space<vmem>>, vector<1x32x16xf32>
    %72 = vector.shape_cast %71 : vector<1x32x16xf32> to vector<32x16xf32>
    %cst_62 = arith.constant dense<0.000000e+00> : vector<66x16xf32>
    %73 = tpu.matmul %10, %72, %cst_62 {dimension_numbers = #tpu.dot_dimension_numbers<[1], [0], [0], [1], [0, 0, 1, 1], [], []>} : vector<66x32xf32>, vector<32x16xf32>, vector<66x16xf32> -> vector<66x16xf32>
    %c2_63 = arith.constant 2 : index
    %c0_64 = arith.constant 0 : index
    %c0_65 = arith.constant 0 : index
    %74 = vector.load %arg6[%c2_63, %c0_64, %c0_65] : memref<4x32x16xf32, #tpu.memory_space<vmem>>, vector<1x32x16xf32>
    %75 = vector.shape_cast %74 : vector<1x32x16xf32> to vector<32x16xf32>
    %cst_66 = arith.constant dense<0.000000e+00> : vector<66x16xf32>
    %76 = tpu.matmul %10, %75, %cst_66 {dimension_numbers = #tpu.dot_dimension_numbers<[1], [0], [0], [1], [0, 0, 1, 1], [], []>} : vector<66x32xf32>, vector<32x16xf32>, vector<66x16xf32> -> vector<66x16xf32>
    %cst_67 = arith.constant dense<0.000000e+00> : vector<66x66xf32>
    %77 = tpu.matmul %70, %73, %cst_67 {dimension_numbers = #tpu.dot_dimension_numbers<[1], [1], [0], [0], [0, 0, 1, 0], [], []>} : vector<66x16xf32>, vector<66x16xf32>, vector<66x66xf32> -> vector<66x66xf32>
    %cst_68 = arith.constant dense<0xFF800000> : vector<66xf32>
    %78 = vector.multi_reduction <maximumf>, %77, %cst_68 [1] : vector<66x66xf32> to vector<66xf32>
    %79 = vector.shape_cast %78 : vector<66xf32> to vector<66x1xf32>
    %80 = vector.broadcast %79 : vector<66x1xf32> to vector<66x66xf32>
    %81 = arith.subf %77, %80 : vector<66x66xf32>
    %82 = math.exp %81 : vector<66x66xf32>
    %cst_69 = arith.constant dense<0.000000e+00> : vector<66xf32>
    %83 = vector.multi_reduction <add>, %82, %cst_69 [1] : vector<66x66xf32> to vector<66xf32>
    %84 = vector.shape_cast %83 : vector<66xf32> to vector<66x1xf32>
    %85 = tpu.reciprocal %84 {approx = true} : vector<66x1xf32> -> vector<66x1xf32>
    %86 = vector.broadcast %85 : vector<66x1xf32> to vector<66x66xf32>
    %87 = arith.mulf %82, %86 : vector<66x66xf32>
    %cst_70 = arith.constant dense<0.000000e+00> : vector<66x16xf32>
    %88 = tpu.matmul %87, %76, %cst_70 {dimension_numbers = #tpu.dot_dimension_numbers<[1], [0], [0], [1], [0, 0, 1, 1], [], []>} : vector<66x66xf32>, vector<66x16xf32>, vector<66x16xf32> -> vector<66x16xf32>
    %c2_71 = arith.constant 2 : index
    %c0_72 = arith.constant 0 : index
    %c0_73 = arith.constant 0 : index
    %89 = vector.load %arg7[%c2_71, %c0_72, %c0_73] : memref<4x16x32xf32, #tpu.memory_space<vmem>>, vector<1x16x32xf32>
    %90 = vector.shape_cast %89 : vector<1x16x32xf32> to vector<16x32xf32>
    %cst_74 = arith.constant dense<0.000000e+00> : vector<66x32xf32>
    %91 = tpu.matmul %88, %90, %cst_74 {dimension_numbers = #tpu.dot_dimension_numbers<[1], [0], [0], [1], [0, 0, 1, 1], [], []>} : vector<66x16xf32>, vector<16x32xf32>, vector<66x32xf32> -> vector<66x32xf32>
    %92 = arith.addf %65, %91 : vector<66x32xf32>
    %c3 = arith.constant 3 : index
    %c0_75 = arith.constant 0 : index
    %c0_76 = arith.constant 0 : index
    %93 = vector.load %arg4[%c3, %c0_75, %c0_76] : memref<4x32x16xf32, #tpu.memory_space<vmem>>, vector<1x32x16xf32>
    %94 = vector.shape_cast %93 : vector<1x32x16xf32> to vector<32x16xf32>
    %cst_77 = arith.constant dense<0.000000e+00> : vector<66x16xf32>
    %95 = tpu.matmul %10, %94, %cst_77 {dimension_numbers = #tpu.dot_dimension_numbers<[1], [0], [0], [1], [0, 0, 1, 1], [], []>} : vector<66x32xf32>, vector<32x16xf32>, vector<66x16xf32> -> vector<66x16xf32>
    %cst_78 = arith.constant 2.500000e-01 : f32
    %96 = vector.broadcast %cst_78 : f32 to vector<66x16xf32>
    %97 = arith.mulf %95, %96 : vector<66x16xf32>
    %c3_79 = arith.constant 3 : index
    %c0_80 = arith.constant 0 : index
    %c0_81 = arith.constant 0 : index
    %98 = vector.load %arg5[%c3_79, %c0_80, %c0_81] : memref<4x32x16xf32, #tpu.memory_space<vmem>>, vector<1x32x16xf32>
    %99 = vector.shape_cast %98 : vector<1x32x16xf32> to vector<32x16xf32>
    %cst_82 = arith.constant dense<0.000000e+00> : vector<66x16xf32>
    %100 = tpu.matmul %10, %99, %cst_82 {dimension_numbers = #tpu.dot_dimension_numbers<[1], [0], [0], [1], [0, 0, 1, 1], [], []>} : vector<66x32xf32>, vector<32x16xf32>, vector<66x16xf32> -> vector<66x16xf32>
    %c3_83 = arith.constant 3 : index
    %c0_84 = arith.constant 0 : index
    %c0_85 = arith.constant 0 : index
    %101 = vector.load %arg6[%c3_83, %c0_84, %c0_85] : memref<4x32x16xf32, #tpu.memory_space<vmem>>, vector<1x32x16xf32>
    %102 = vector.shape_cast %101 : vector<1x32x16xf32> to vector<32x16xf32>
    %cst_86 = arith.constant dense<0.000000e+00> : vector<66x16xf32>
    %103 = tpu.matmul %10, %102, %cst_86 {dimension_numbers = #tpu.dot_dimension_numbers<[1], [0], [0], [1], [0, 0, 1, 1], [], []>} : vector<66x32xf32>, vector<32x16xf32>, vector<66x16xf32> -> vector<66x16xf32>
    %cst_87 = arith.constant dense<0.000000e+00> : vector<66x66xf32>
    %104 = tpu.matmul %97, %100, %cst_87 {dimension_numbers = #tpu.dot_dimension_numbers<[1], [1], [0], [0], [0, 0, 1, 0], [], []>} : vector<66x16xf32>, vector<66x16xf32>, vector<66x66xf32> -> vector<66x66xf32>
    %cst_88 = arith.constant dense<0xFF800000> : vector<66xf32>
    %105 = vector.multi_reduction <maximumf>, %104, %cst_88 [1] : vector<66x66xf32> to vector<66xf32>
    %106 = vector.shape_cast %105 : vector<66xf32> to vector<66x1xf32>
    %107 = vector.broadcast %106 : vector<66x1xf32> to vector<66x66xf32>
    %108 = arith.subf %104, %107 : vector<66x66xf32>
    %109 = math.exp %108 : vector<66x66xf32>
    %cst_89 = arith.constant dense<0.000000e+00> : vector<66xf32>
    %110 = vector.multi_reduction <add>, %109, %cst_89 [1] : vector<66x66xf32> to vector<66xf32>
    %111 = vector.shape_cast %110 : vector<66xf32> to vector<66x1xf32>
    %112 = tpu.reciprocal %111 {approx = true} : vector<66x1xf32> -> vector<66x1xf32>
    %113 = vector.broadcast %112 : vector<66x1xf32> to vector<66x66xf32>
    %114 = arith.mulf %109, %113 : vector<66x66xf32>
    %cst_90 = arith.constant dense<0.000000e+00> : vector<66x16xf32>
    %115 = tpu.matmul %114, %103, %cst_90 {dimension_numbers = #tpu.dot_dimension_numbers<[1], [0], [0], [1], [0, 0, 1, 1], [], []>} : vector<66x66xf32>, vector<66x16xf32>, vector<66x16xf32> -> vector<66x16xf32>
    %c3_91 = arith.constant 3 : index
    %c0_92 = arith.constant 0 : index
    %c0_93 = arith.constant 0 : index
    %116 = vector.load %arg7[%c3_91, %c0_92, %c0_93] : memref<4x16x32xf32, #tpu.memory_space<vmem>>, vector<1x16x32xf32>
    %117 = vector.shape_cast %116 : vector<1x16x32xf32> to vector<16x32xf32>
    %cst_94 = arith.constant dense<0.000000e+00> : vector<66x32xf32>
    %118 = tpu.matmul %115, %117, %cst_94 {dimension_numbers = #tpu.dot_dimension_numbers<[1], [0], [0], [1], [0, 0, 1, 1], [], []>} : vector<66x16xf32>, vector<16x32xf32>, vector<66x32xf32> -> vector<66x32xf32>
    %119 = arith.addf %92, %118 : vector<66x32xf32>
    %c0_95 = arith.constant 0 : index
    %c0_96 = arith.constant 0 : index
    %120 = vector.load %arg8[%c0_95, %c0_96] : memref<1x32xf32, #tpu.memory_space<vmem>>, vector<1x32xf32>
    %121 = vector.broadcast %120 : vector<1x32xf32> to vector<66x32xf32>
    %122 = arith.addf %119, %121 : vector<66x32xf32>
    %c0_97 = arith.constant 0 : index
    %c0_98 = arith.constant 0 : index
    %c0_99 = arith.constant 0 : index
    %123 = vector.load %arg9[%c0_97, %c0_98, %c0_99] : memref<1x66x32xf32, #tpu.memory_space<vmem>>, vector<1x66x32xf32>
    %124 = vector.shape_cast %123 : vector<1x66x32xf32> to vector<66x32xf32>
    %125 = vector.shape_cast %122 : vector<66x32xf32> to vector<1x66x32xf32>
    tpu.vector_store %arg9[%c0_97, %c0_98, %c0_99], %125 {strides = array<i32>} : memref<1x66x32xf32, #tpu.memory_space<vmem>>, vector<1x66x32xf32>,
    %cst_100 = arith.constant dense<0.000000e+00> : vector<32xf32>
    %126 = vector.multi_reduction <add>, %122, %cst_100 [0] : vector<66x32xf32> to vector<32xf32>
    %127 = vector.shape_cast %126 : vector<32xf32> to vector<1x32xf32>
    %c0_101 = arith.constant 0 : index
    %c0_102 = arith.constant 0 : index
    %c0_103 = arith.constant 0 : index
    %128 = vector.load %arg10[%c0_101, %c0_102, %c0_103] : memref<1x2x32xf32, #tpu.memory_space<vmem>>, vector<1x1x32xf32>
    %129 = vector.shape_cast %128 : vector<1x1x32xf32> to vector<1x32xf32>
    %130 = vector.shape_cast %127 : vector<1x32xf32> to vector<1x1x32xf32>
    tpu.vector_store %arg10[%c0_101, %c0_102, %c0_103], %130 {strides = array<i32>} : memref<1x2x32xf32, #tpu.memory_space<vmem>>, vector<1x1x32xf32>,
    %131 = arith.mulf %122, %122 : vector<66x32xf32>
    %cst_104 = arith.constant dense<0.000000e+00> : vector<32xf32>
    %132 = vector.multi_reduction <add>, %131, %cst_104 [0] : vector<66x32xf32> to vector<32xf32>
    %133 = vector.shape_cast %132 : vector<32xf32> to vector<1x32xf32>
    %c0_105 = arith.constant 0 : index
    %c1_106 = arith.constant 1 : index
    %c0_107 = arith.constant 0 : index
    %134 = vector.load %arg10[%c0_105, %c1_106, %c0_107] : memref<1x2x32xf32, #tpu.memory_space<vmem>>, vector<1x1x32xf32>
    %135 = vector.shape_cast %134 : vector<1x1x32xf32> to vector<1x32xf32>
    %136 = vector.shape_cast %133 : vector<1x32xf32> to vector<1x1x32xf32>
    tpu.vector_store %arg10[%c0_105, %c1_106, %c0_107], %136 {strides = array<i32>} : memref<1x2x32xf32, #tpu.memory_space<vmem>>, vector<1x1x32xf32>,
    return
  }
  func.func @transform_0(%arg0: i32) -> (i32, i32, i32) {
    %c0_i32 = arith.constant 0 : i32
    %c0_i32_0 = arith.constant 0 : i32
    %c0_i32_1 = arith.constant 0 : i32
    return %arg0, %c0_i32, %c0_i32_0 : i32, i32, i32
  }
  func.func @transform_1(%arg0: i32) -> (i32, i32, i32) {
    %c0_i32 = arith.constant 0 : i32
    %c0_i32_0 = arith.constant 0 : i32
    %c0_i32_1 = arith.constant 0 : i32
    return %arg0, %c0_i32, %c0_i32_0 : i32, i32, i32
  }
  func.func @transform_2(%arg0: i32) -> (i32, i32, i32) {
    %c0_i32 = arith.constant 0 : i32
    %c0_i32_0 = arith.constant 0 : i32
    %c0_i32_1 = arith.constant 0 : i32
    return %arg0, %c0_i32, %c0_i32_0 : i32, i32, i32
  }
  func.func @transform_3(%arg0: i32) -> (i32, i32, i32) {
    %c0_i32 = arith.constant 0 : i32
    %c0_i32_0 = arith.constant 0 : i32
    %c0_i32_1 = arith.constant 0 : i32
    %c0_i32_2 = arith.constant 0 : i32
    return %c0_i32, %c0_i32_0, %c0_i32_1 : i32, i32, i32
  }
  func.func @transform_4(%arg0: i32) -> (i32, i32, i32) {
    %c0_i32 = arith.constant 0 : i32
    %c0_i32_0 = arith.constant 0 : i32
    %c0_i32_1 = arith.constant 0 : i32
    %c0_i32_2 = arith.constant 0 : i32
    return %c0_i32, %c0_i32_0, %c0_i32_1 : i32, i32, i32
  }
  func.func @transform_5(%arg0: i32) -> (i32, i32, i32) {
    %c0_i32 = arith.constant 0 : i32
    %c0_i32_0 = arith.constant 0 : i32
    %c0_i32_1 = arith.constant 0 : i32
    %c0_i32_2 = arith.constant 0 : i32
    return %c0_i32, %c0_i32_0, %c0_i32_1 : i32, i32, i32
  }
  func.func @transform_6(%arg0: i32) -> (i32, i32, i32) {
    %c0_i32 = arith.constant 0 : i32
    %c0_i32_0 = arith.constant 0 : i32
    %c0_i32_1 = arith.constant 0 : i32
    %c0_i32_2 = arith.constant 0 : i32
    return %c0_i32, %c0_i32_0, %c0_i32_1 : i32, i32, i32
  }
  func.func @transform_7(%arg0: i32) -> (i32, i32) {
    %c0_i32 = arith.constant 0 : i32
    %c0_i32_0 = arith.constant 0 : i32
    %c0_i32_1 = arith.constant 0 : i32
    return %c0_i32, %c0_i32_0 : i32, i32
  }
  func.func @transform_8(%arg0: i32) -> (i32, i32, i32) {
    %c0_i32 = arith.constant 0 : i32
    %c0_i32_0 = arith.constant 0 : i32
    %c0_i32_1 = arith.constant 0 : i32
    return %arg0, %c0_i32, %c0_i32_0 : i32, i32, i32
  }
  func.func @transform_9(%arg0: i32) -> (i32, i32, i32) {
    %c0_i32 = arith.constant 0 : i32
    %c0_i32_0 = arith.constant 0 : i32
    %c0_i32_1 = arith.constant 0 : i32
    return %arg0, %c0_i32, %c0_i32_0 : i32, i32, i32
  }
}

module attributes {stable_mosaic.version = 11 : i64} {
  func.func @_ffn_kernel(%arg0: i32, %arg1: memref<1x66x32xf32, #tpu.memory_space<vmem>>, %arg2: memref<2x2x32xf32, #tpu.memory_space<vmem>>, %arg3: memref<1x32xf32, #tpu.memory_space<vmem>>, %arg4: memref<1x32xf32, #tpu.memory_space<vmem>>, %arg5: memref<32x64xf32, #tpu.memory_space<vmem>>, %arg6: memref<1x64xf32, #tpu.memory_space<vmem>>, %arg7: memref<64x32xf32, #tpu.memory_space<vmem>>, %arg8: memref<1x32xf32, #tpu.memory_space<vmem>>, %arg9: memref<1x66x32xf32, #tpu.memory_space<vmem>>, %arg10: memref<1x2x32xf32, #tpu.memory_space<vmem>>) attributes {dimension_semantics = [#tpu.dimension_semantics<parallel>], iteration_bounds = array<i64: 2>, scalar_prefetch = 0 : i64, scratch_operands = 0 : i64, tpu.core_type = #tpu.core_type<tc>, window_params = [{transform_indices = @transform_0, window_bounds = array<i64: 1, 66, 32>}, {pipeline_mode = #tpu.pipeline_mode<synchronous>, transform_indices = @transform_1, window_bounds = array<i64: 2, 2, 32>}, {pipeline_mode = #tpu.pipeline_mode<synchronous>, transform_indices = @transform_2, window_bounds = array<i64: 1, 32>}, {pipeline_mode = #tpu.pipeline_mode<synchronous>, transform_indices = @transform_3, window_bounds = array<i64: 1, 32>}, {pipeline_mode = #tpu.pipeline_mode<synchronous>, transform_indices = @transform_4, window_bounds = array<i64: 32, 64>}, {pipeline_mode = #tpu.pipeline_mode<synchronous>, transform_indices = @transform_5, window_bounds = array<i64: 1, 64>}, {pipeline_mode = #tpu.pipeline_mode<synchronous>, transform_indices = @transform_6, window_bounds = array<i64: 64, 32>}, {pipeline_mode = #tpu.pipeline_mode<synchronous>, transform_indices = @transform_7, window_bounds = array<i64: 1, 32>}, {transform_indices = @transform_8, window_bounds = array<i64: 1, 66, 32>}, {transform_indices = @transform_9, window_bounds = array<i64: 1, 2, 32>}]} {
    %c0 = arith.constant 0 : index
    %c0_0 = arith.constant 0 : index
    %c0_1 = arith.constant 0 : index
    %0 = vector.load %arg2[%c0, %c0_0, %c0_1] : memref<2x2x32xf32, #tpu.memory_space<vmem>>, vector<2x2x32xf32>
    %cst = arith.constant dense<0.000000e+00> : vector<2x32xf32>
    %1 = vector.multi_reduction <add>, %0, %cst [0] : vector<2x2x32xf32> to vector<2x32xf32>
    %2 = vector.extract_strided_slice %1 {offsets = [0, 0], sizes = [1, 32], strides = [1, 1]} : vector<2x32xf32> to vector<1x32xf32>
    %cst_2 = arith.constant 0.0075757578 : f32
    %3 = vector.broadcast %cst_2 : f32 to vector<1x32xf32>
    %4 = arith.mulf %2, %3 : vector<1x32xf32>
    %5 = vector.extract_strided_slice %1 {offsets = [1, 0], sizes = [1, 32], strides = [1, 1]} : vector<2x32xf32> to vector<1x32xf32>
    %cst_3 = arith.constant 0.0075757578 : f32
    %6 = vector.broadcast %cst_3 : f32 to vector<1x32xf32>
    %7 = arith.mulf %5, %6 : vector<1x32xf32>
    %8 = arith.mulf %4, %4 : vector<1x32xf32>
    %9 = arith.subf %7, %8 : vector<1x32xf32>
    %cst_4 = arith.constant 0.000000e+00 : f32
    %10 = vector.broadcast %cst_4 : f32 to vector<1x32xf32>
    %11 = arith.maximumf %9, %10 : vector<1x32xf32>
    %c0_5 = arith.constant 0 : index
    %c0_6 = arith.constant 0 : index
    %12 = vector.load %arg3[%c0_5, %c0_6] : memref<1x32xf32, #tpu.memory_space<vmem>>, vector<1x32xf32>
    %cst_7 = arith.constant 9.99999974E-6 : f32
    %13 = vector.broadcast %cst_7 : f32 to vector<1x32xf32>
    %14 = arith.addf %11, %13 : vector<1x32xf32>
    %15 = math.rsqrt %14 : vector<1x32xf32>
    %16 = arith.mulf %12, %15 : vector<1x32xf32>
    %c0_8 = arith.constant 0 : index
    %c0_9 = arith.constant 0 : index
    %17 = vector.load %arg4[%c0_8, %c0_9] : memref<1x32xf32, #tpu.memory_space<vmem>>, vector<1x32xf32>
    %18 = arith.mulf %4, %16 : vector<1x32xf32>
    %19 = arith.subf %17, %18 : vector<1x32xf32>
    %c0_10 = arith.constant 0 : index
    %c0_11 = arith.constant 0 : index
    %c0_12 = arith.constant 0 : index
    %20 = vector.load %arg1[%c0_10, %c0_11, %c0_12] : memref<1x66x32xf32, #tpu.memory_space<vmem>>, vector<1x66x32xf32>
    %21 = vector.shape_cast %20 : vector<1x66x32xf32> to vector<66x32xf32>
    %22 = vector.broadcast %16 : vector<1x32xf32> to vector<66x32xf32>
    %23 = arith.mulf %21, %22 : vector<66x32xf32>
    %24 = vector.broadcast %19 : vector<1x32xf32> to vector<66x32xf32>
    %25 = arith.addf %23, %24 : vector<66x32xf32>
    %c0_13 = arith.constant 0 : index
    %c0_14 = arith.constant 0 : index
    %26 = vector.load %arg5[%c0_13, %c0_14] : memref<32x64xf32, #tpu.memory_space<vmem>>, vector<32x64xf32>
    %cst_15 = arith.constant dense<0.000000e+00> : vector<66x64xf32>
    %27 = tpu.matmul %25, %26, %cst_15 {dimension_numbers = #tpu.dot_dimension_numbers<[1], [0], [0], [1], [0, 0, 1, 1], [], []>} : vector<66x32xf32>, vector<32x64xf32>, vector<66x64xf32> -> vector<66x64xf32>
    %c0_16 = arith.constant 0 : index
    %c0_17 = arith.constant 0 : index
    %28 = vector.load %arg6[%c0_16, %c0_17] : memref<1x64xf32, #tpu.memory_space<vmem>>, vector<1x64xf32>
    %29 = vector.broadcast %28 : vector<1x64xf32> to vector<66x64xf32>
    %30 = arith.addf %27, %29 : vector<66x64xf32>
    %cst_18 = arith.constant 0.707106769 : f32
    %31 = vector.broadcast %cst_18 : f32 to vector<66x64xf32>
    %32 = arith.mulf %30, %31 : vector<66x64xf32>
    %33 = math.absf %32 : vector<66x64xf32>
    %cst_19 = arith.constant 0.327591091 : f32
    %34 = vector.broadcast %cst_19 : f32 to vector<66x64xf32>
    %35 = arith.mulf %34, %33 : vector<66x64xf32>
    %cst_20 = arith.constant 1.000000e+00 : f32
    %36 = vector.broadcast %cst_20 : f32 to vector<66x64xf32>
    %37 = arith.addf %36, %35 : vector<66x64xf32>
    %cst_21 = arith.constant 1.000000e+00 : f32
    %38 = vector.broadcast %cst_21 : f32 to vector<66x64xf32>
    %39 = arith.divf %38, %37 : vector<66x64xf32>
    %cst_22 = arith.constant 1.06140542 : f32
    %40 = vector.broadcast %cst_22 : f32 to vector<66x64xf32>
    %41 = arith.mulf %40, %39 : vector<66x64xf32>
    %cst_23 = arith.constant 1.45315206 : f32
    %42 = vector.broadcast %cst_23 : f32 to vector<66x64xf32>
    %43 = arith.subf %41, %42 : vector<66x64xf32>
    %44 = arith.mulf %43, %39 : vector<66x64xf32>
    %cst_24 = arith.constant 1.42141378 : f32
    %45 = vector.broadcast %cst_24 : f32 to vector<66x64xf32>
    %46 = arith.addf %44, %45 : vector<66x64xf32>
    %47 = arith.mulf %46, %39 : vector<66x64xf32>
    %cst_25 = arith.constant 0.284496725 : f32
    %48 = vector.broadcast %cst_25 : f32 to vector<66x64xf32>
    %49 = arith.subf %47, %48 : vector<66x64xf32>
    %50 = arith.mulf %49, %39 : vector<66x64xf32>
    %cst_26 = arith.constant 0.254829586 : f32
    %51 = vector.broadcast %cst_26 : f32 to vector<66x64xf32>
    %52 = arith.addf %50, %51 : vector<66x64xf32>
    %53 = arith.mulf %52, %39 : vector<66x64xf32>
    %cst_27 = arith.constant 0.000000e+00 : f32
    %54 = vector.broadcast %cst_27 : f32 to vector<66x64xf32>
    %55 = arith.subf %54, %33 : vector<66x64xf32>
    %56 = arith.mulf %55, %33 : vector<66x64xf32>
    %57 = math.exp %56 : vector<66x64xf32>
    %58 = arith.mulf %53, %57 : vector<66x64xf32>
    %cst_28 = arith.constant 1.000000e+00 : f32
    %59 = vector.broadcast %cst_28 : f32 to vector<66x64xf32>
    %60 = arith.subf %59, %58 : vector<66x64xf32>
    %cst_29 = arith.constant 0.000000e+00 : f32
    %61 = vector.broadcast %cst_29 : f32 to vector<66x64xf32>
    %62 = arith.cmpf oge, %32, %61 : vector<66x64xf32>
    %cst_30 = arith.constant 0.000000e+00 : f32
    %63 = vector.broadcast %cst_30 : f32 to vector<66x64xf32>
    %64 = arith.subf %63, %60 : vector<66x64xf32>
    %65 = arith.select %62, %60, %64 : vector<66x64xi1>, vector<66x64xf32>
    %cst_31 = arith.constant 5.000000e-01 : f32
    %66 = vector.broadcast %cst_31 : f32 to vector<66x64xf32>
    %67 = arith.mulf %66, %30 : vector<66x64xf32>
    %cst_32 = arith.constant 1.000000e+00 : f32
    %68 = vector.broadcast %cst_32 : f32 to vector<66x64xf32>
    %69 = arith.addf %68, %65 : vector<66x64xf32>
    %70 = arith.mulf %67, %69 : vector<66x64xf32>
    %c0_33 = arith.constant 0 : index
    %c0_34 = arith.constant 0 : index
    %71 = vector.load %arg7[%c0_33, %c0_34] : memref<64x32xf32, #tpu.memory_space<vmem>>, vector<64x32xf32>
    %cst_35 = arith.constant dense<0.000000e+00> : vector<66x32xf32>
    %72 = tpu.matmul %70, %71, %cst_35 {dimension_numbers = #tpu.dot_dimension_numbers<[1], [0], [0], [1], [0, 0, 1, 1], [], []>} : vector<66x64xf32>, vector<64x32xf32>, vector<66x32xf32> -> vector<66x32xf32>
    %c0_36 = arith.constant 0 : index
    %c0_37 = arith.constant 0 : index
    %73 = vector.load %arg8[%c0_36, %c0_37] : memref<1x32xf32, #tpu.memory_space<vmem>>, vector<1x32xf32>
    %74 = vector.broadcast %73 : vector<1x32xf32> to vector<66x32xf32>
    %75 = arith.addf %72, %74 : vector<66x32xf32>
    %c0_38 = arith.constant 0 : index
    %c0_39 = arith.constant 0 : index
    %c0_40 = arith.constant 0 : index
    %76 = vector.load %arg9[%c0_38, %c0_39, %c0_40] : memref<1x66x32xf32, #tpu.memory_space<vmem>>, vector<1x66x32xf32>
    %77 = vector.shape_cast %76 : vector<1x66x32xf32> to vector<66x32xf32>
    %78 = vector.shape_cast %75 : vector<66x32xf32> to vector<1x66x32xf32>
    tpu.vector_store %arg9[%c0_38, %c0_39, %c0_40], %78 {strides = array<i32>} : memref<1x66x32xf32, #tpu.memory_space<vmem>>, vector<1x66x32xf32>,
    %cst_41 = arith.constant dense<0.000000e+00> : vector<32xf32>
    %79 = vector.multi_reduction <add>, %75, %cst_41 [0] : vector<66x32xf32> to vector<32xf32>
    %80 = vector.shape_cast %79 : vector<32xf32> to vector<1x32xf32>
    %c0_42 = arith.constant 0 : index
    %c0_43 = arith.constant 0 : index
    %c0_44 = arith.constant 0 : index
    %81 = vector.load %arg10[%c0_42, %c0_43, %c0_44] : memref<1x2x32xf32, #tpu.memory_space<vmem>>, vector<1x1x32xf32>
    %82 = vector.shape_cast %81 : vector<1x1x32xf32> to vector<1x32xf32>
    %83 = vector.shape_cast %80 : vector<1x32xf32> to vector<1x1x32xf32>
    tpu.vector_store %arg10[%c0_42, %c0_43, %c0_44], %83 {strides = array<i32>} : memref<1x2x32xf32, #tpu.memory_space<vmem>>, vector<1x1x32xf32>,
    %84 = arith.mulf %75, %75 : vector<66x32xf32>
    %cst_45 = arith.constant dense<0.000000e+00> : vector<32xf32>
    %85 = vector.multi_reduction <add>, %84, %cst_45 [0] : vector<66x32xf32> to vector<32xf32>
    %86 = vector.shape_cast %85 : vector<32xf32> to vector<1x32xf32>
    %c0_46 = arith.constant 0 : index
    %c1 = arith.constant 1 : index
    %c0_47 = arith.constant 0 : index
    %87 = vector.load %arg10[%c0_46, %c1, %c0_47] : memref<1x2x32xf32, #tpu.memory_space<vmem>>, vector<1x1x32xf32>
    %88 = vector.shape_cast %87 : vector<1x1x32xf32> to vector<1x32xf32>
    %89 = vector.shape_cast %86 : vector<1x32xf32> to vector<1x1x32xf32>
    tpu.vector_store %arg10[%c0_46, %c1, %c0_47], %89 {strides = array<i32>} : memref<1x2x32xf32, #tpu.memory_space<vmem>>, vector<1x1x32xf32>,
    return
  }
  func.func @transform_0(%arg0: i32) -> (i32, i32, i32) {
    %c0_i32 = arith.constant 0 : i32
    %c0_i32_0 = arith.constant 0 : i32
    %c0_i32_1 = arith.constant 0 : i32
    return %arg0, %c0_i32, %c0_i32_0 : i32, i32, i32
  }
  func.func @transform_1(%arg0: i32) -> (i32, i32, i32) {
    %c0_i32 = arith.constant 0 : i32
    %c0_i32_0 = arith.constant 0 : i32
    %c0_i32_1 = arith.constant 0 : i32
    %c0_i32_2 = arith.constant 0 : i32
    return %c0_i32, %c0_i32_0, %c0_i32_1 : i32, i32, i32
  }
  func.func @transform_2(%arg0: i32) -> (i32, i32) {
    %c0_i32 = arith.constant 0 : i32
    %c0_i32_0 = arith.constant 0 : i32
    %c0_i32_1 = arith.constant 0 : i32
    return %c0_i32, %c0_i32_0 : i32, i32
  }
  func.func @transform_3(%arg0: i32) -> (i32, i32) {
    %c0_i32 = arith.constant 0 : i32
    %c0_i32_0 = arith.constant 0 : i32
    %c0_i32_1 = arith.constant 0 : i32
    return %c0_i32, %c0_i32_0 : i32, i32
  }
  func.func @transform_4(%arg0: i32) -> (i32, i32) {
    %c0_i32 = arith.constant 0 : i32
    %c0_i32_0 = arith.constant 0 : i32
    %c0_i32_1 = arith.constant 0 : i32
    return %c0_i32, %c0_i32_0 : i32, i32
  }
  func.func @transform_5(%arg0: i32) -> (i32, i32) {
    %c0_i32 = arith.constant 0 : i32
    %c0_i32_0 = arith.constant 0 : i32
    %c0_i32_1 = arith.constant 0 : i32
    return %c0_i32, %c0_i32_0 : i32, i32
  }
  func.func @transform_6(%arg0: i32) -> (i32, i32) {
    %c0_i32 = arith.constant 0 : i32
    %c0_i32_0 = arith.constant 0 : i32
    %c0_i32_1 = arith.constant 0 : i32
    return %c0_i32, %c0_i32_0 : i32, i32
  }
  func.func @transform_7(%arg0: i32) -> (i32, i32) {
    %c0_i32 = arith.constant 0 : i32
    %c0_i32_0 = arith.constant 0 : i32
    %c0_i32_1 = arith.constant 0 : i32
    return %c0_i32, %c0_i32_0 : i32, i32
  }
  func.func @transform_8(%arg0: i32) -> (i32, i32, i32) {
    %c0_i32 = arith.constant 0 : i32
    %c0_i32_0 = arith.constant 0 : i32
    %c0_i32_1 = arith.constant 0 : i32
    return %arg0, %c0_i32, %c0_i32_0 : i32, i32, i32
  }
  func.func @transform_9(%arg0: i32) -> (i32, i32, i32) {
    %c0_i32 = arith.constant 0 : i32
    %c0_i32_0 = arith.constant 0 : i32
    %c0_i32_1 = arith.constant 0 : i32
    return %arg0, %c0_i32, %c0_i32_0 : i32, i32, i32
  }
}

module attributes {stable_mosaic.version = 11 : i64} {
  func.func @_norm2_out_kernel(%arg0: i32, %arg1: memref<1x66x32xf32, #tpu.memory_space<vmem>>, %arg2: memref<2x2x32xf32, #tpu.memory_space<vmem>>, %arg3: memref<1x32xf32, #tpu.memory_space<vmem>>, %arg4: memref<1x32xf32, #tpu.memory_space<vmem>>, %arg5: memref<1x32x64xf32, #tpu.memory_space<vmem>>, %arg6: memref<1x1x32xf32, #tpu.memory_space<vmem>>, %arg7: memref<1x1x32xf32, #tpu.memory_space<vmem>>) attributes {dimension_semantics = [#tpu.dimension_semantics<parallel>], iteration_bounds = array<i64: 2>, scalar_prefetch = 0 : i64, scratch_operands = 0 : i64, tpu.core_type = #tpu.core_type<tc>, window_params = [{transform_indices = @transform_0, window_bounds = array<i64: 1, 66, 32>}, {pipeline_mode = #tpu.pipeline_mode<synchronous>, transform_indices = @transform_1, window_bounds = array<i64: 2, 2, 32>}, {pipeline_mode = #tpu.pipeline_mode<synchronous>, transform_indices = @transform_2, window_bounds = array<i64: 1, 32>}, {pipeline_mode = #tpu.pipeline_mode<synchronous>, transform_indices = @transform_3, window_bounds = array<i64: 1, 32>}, {transform_indices = @transform_4, window_bounds = array<i64: 1, 32, 64>}, {transform_indices = @transform_5, window_bounds = array<i64: 1, 1, 32>}, {transform_indices = @transform_6, window_bounds = array<i64: 1, 1, 32>}]} {
    %c0 = arith.constant 0 : index
    %c0_0 = arith.constant 0 : index
    %c0_1 = arith.constant 0 : index
    %0 = vector.load %arg2[%c0, %c0_0, %c0_1] : memref<2x2x32xf32, #tpu.memory_space<vmem>>, vector<2x2x32xf32>
    %cst = arith.constant dense<0.000000e+00> : vector<2x32xf32>
    %1 = vector.multi_reduction <add>, %0, %cst [0] : vector<2x2x32xf32> to vector<2x32xf32>
    %2 = vector.extract_strided_slice %1 {offsets = [0, 0], sizes = [1, 32], strides = [1, 1]} : vector<2x32xf32> to vector<1x32xf32>
    %cst_2 = arith.constant 0.0075757578 : f32
    %3 = vector.broadcast %cst_2 : f32 to vector<1x32xf32>
    %4 = arith.mulf %2, %3 : vector<1x32xf32>
    %5 = vector.extract_strided_slice %1 {offsets = [1, 0], sizes = [1, 32], strides = [1, 1]} : vector<2x32xf32> to vector<1x32xf32>
    %cst_3 = arith.constant 0.0075757578 : f32
    %6 = vector.broadcast %cst_3 : f32 to vector<1x32xf32>
    %7 = arith.mulf %5, %6 : vector<1x32xf32>
    %8 = arith.mulf %4, %4 : vector<1x32xf32>
    %9 = arith.subf %7, %8 : vector<1x32xf32>
    %cst_4 = arith.constant 0.000000e+00 : f32
    %10 = vector.broadcast %cst_4 : f32 to vector<1x32xf32>
    %11 = arith.maximumf %9, %10 : vector<1x32xf32>
    %c0_5 = arith.constant 0 : index
    %c0_6 = arith.constant 0 : index
    %12 = vector.load %arg3[%c0_5, %c0_6] : memref<1x32xf32, #tpu.memory_space<vmem>>, vector<1x32xf32>
    %cst_7 = arith.constant 9.99999974E-6 : f32
    %13 = vector.broadcast %cst_7 : f32 to vector<1x32xf32>
    %14 = arith.addf %11, %13 : vector<1x32xf32>
    %15 = math.rsqrt %14 : vector<1x32xf32>
    %16 = arith.mulf %12, %15 : vector<1x32xf32>
    %c0_8 = arith.constant 0 : index
    %c0_9 = arith.constant 0 : index
    %17 = vector.load %arg4[%c0_8, %c0_9] : memref<1x32xf32, #tpu.memory_space<vmem>>, vector<1x32xf32>
    %18 = arith.mulf %4, %16 : vector<1x32xf32>
    %19 = arith.subf %17, %18 : vector<1x32xf32>
    %c0_10 = arith.constant 0 : index
    %c0_11 = arith.constant 0 : index
    %c0_12 = arith.constant 0 : index
    %20 = vector.load %arg1[%c0_10, %c0_11, %c0_12] : memref<1x66x32xf32, #tpu.memory_space<vmem>>, vector<1x66x32xf32>
    %21 = vector.shape_cast %20 : vector<1x66x32xf32> to vector<66x32xf32>
    %22 = vector.broadcast %16 : vector<1x32xf32> to vector<66x32xf32>
    %23 = arith.mulf %21, %22 : vector<66x32xf32>
    %24 = vector.broadcast %19 : vector<1x32xf32> to vector<66x32xf32>
    %25 = arith.addf %23, %24 : vector<66x32xf32>
    %26 = vector.extract_strided_slice %25 {offsets = [0, 0], sizes = [64, 32], strides = [1, 1]} : vector<66x32xf32> to vector<64x32xf32>
    %27 = tpu.transpose %26, [1, 0] : vector<64x32xf32> -> vector<32x64xf32>
    %c0_13 = arith.constant 0 : index
    %c0_14 = arith.constant 0 : index
    %c0_15 = arith.constant 0 : index
    %28 = vector.load %arg5[%c0_13, %c0_14, %c0_15] : memref<1x32x64xf32, #tpu.memory_space<vmem>>, vector<1x32x64xf32>
    %29 = vector.shape_cast %28 : vector<1x32x64xf32> to vector<32x64xf32>
    %30 = vector.shape_cast %27 : vector<32x64xf32> to vector<1x32x64xf32>
    tpu.vector_store %arg5[%c0_13, %c0_14, %c0_15], %30 {strides = array<i32>} : memref<1x32x64xf32, #tpu.memory_space<vmem>>, vector<1x32x64xf32>,
    %31 = vector.extract_strided_slice %25 {offsets = [64, 0], sizes = [1, 32], strides = [1, 1]} : vector<66x32xf32> to vector<1x32xf32>
    %c0_16 = arith.constant 0 : index
    %c0_17 = arith.constant 0 : index
    %c0_18 = arith.constant 0 : index
    %32 = vector.load %arg6[%c0_16, %c0_17, %c0_18] : memref<1x1x32xf32, #tpu.memory_space<vmem>>, vector<1x1x32xf32>
    %33 = vector.shape_cast %32 : vector<1x1x32xf32> to vector<1x32xf32>
    %34 = vector.shape_cast %31 : vector<1x32xf32> to vector<1x1x32xf32>
    tpu.vector_store %arg6[%c0_16, %c0_17, %c0_18], %34 {strides = array<i32>} : memref<1x1x32xf32, #tpu.memory_space<vmem>>, vector<1x1x32xf32>,
    %35 = vector.extract_strided_slice %25 {offsets = [65, 0], sizes = [1, 32], strides = [1, 1]} : vector<66x32xf32> to vector<1x32xf32>
    %c0_19 = arith.constant 0 : index
    %c0_20 = arith.constant 0 : index
    %c0_21 = arith.constant 0 : index
    %36 = vector.load %arg7[%c0_19, %c0_20, %c0_21] : memref<1x1x32xf32, #tpu.memory_space<vmem>>, vector<1x1x32xf32>
    %37 = vector.shape_cast %36 : vector<1x1x32xf32> to vector<1x32xf32>
    %38 = vector.shape_cast %35 : vector<1x32xf32> to vector<1x1x32xf32>
    tpu.vector_store %arg7[%c0_19, %c0_20, %c0_21], %38 {strides = array<i32>} : memref<1x1x32xf32, #tpu.memory_space<vmem>>, vector<1x1x32xf32>,
    return
  }
  func.func @transform_0(%arg0: i32) -> (i32, i32, i32) {
    %c0_i32 = arith.constant 0 : i32
    %c0_i32_0 = arith.constant 0 : i32
    %c0_i32_1 = arith.constant 0 : i32
    return %arg0, %c0_i32, %c0_i32_0 : i32, i32, i32
  }
  func.func @transform_1(%arg0: i32) -> (i32, i32, i32) {
    %c0_i32 = arith.constant 0 : i32
    %c0_i32_0 = arith.constant 0 : i32
    %c0_i32_1 = arith.constant 0 : i32
    %c0_i32_2 = arith.constant 0 : i32
    return %c0_i32, %c0_i32_0, %c0_i32_1 : i32, i32, i32
  }
  func.func @transform_2(%arg0: i32) -> (i32, i32) {
    %c0_i32 = arith.constant 0 : i32
    %c0_i32_0 = arith.constant 0 : i32
    %c0_i32_1 = arith.constant 0 : i32
    return %c0_i32, %c0_i32_0 : i32, i32
  }
  func.func @transform_3(%arg0: i32) -> (i32, i32) {
    %c0_i32 = arith.constant 0 : i32
    %c0_i32_0 = arith.constant 0 : i32
    %c0_i32_1 = arith.constant 0 : i32
    return %c0_i32, %c0_i32_0 : i32, i32
  }
  func.func @transform_4(%arg0: i32) -> (i32, i32, i32) {
    %c0_i32 = arith.constant 0 : i32
    %c0_i32_0 = arith.constant 0 : i32
    %c0_i32_1 = arith.constant 0 : i32
    return %arg0, %c0_i32, %c0_i32_0 : i32, i32, i32
  }
  func.func @transform_5(%arg0: i32) -> (i32, i32, i32) {
    %c0_i32 = arith.constant 0 : i32
    %c0_i32_0 = arith.constant 0 : i32
    %c0_i32_1 = arith.constant 0 : i32
    return %arg0, %c0_i32, %c0_i32_0 : i32, i32, i32
  }
  func.func @transform_6(%arg0: i32) -> (i32, i32, i32) {
    %c0_i32 = arith.constant 0 : i32
    %c0_i32_0 = arith.constant 0 : i32
    %c0_i32_1 = arith.constant 0 : i32
    return %arg0, %c0_i32, %c0_i32_0 : i32, i32, i32
  }
}

</mosaic_0001>

<bundles_post_ra>
// kernel: deep_attention_token.5
= control target key start
LH: loop header
LB: loop body
LE: loop exit
PB: predicated region body
PF: predicated region fallthrough
CT: control target
= control target key end

     0   :  { %12 = vsyncpa [#allocation3], 0  ;;  %s917_s0 = inlined_call_operand.vmem [shape: f32[2,66,32], index: 0, kind: input, shape index: {}]   ;;  %s918_s1 = inlined_call_operand.vmem [shape: f32[2,2,32], index: 1, kind: input, shape index: {}]   ;;  %s919_s2 = inlined_call_operand.vmem [shape: f32[1,32], index: 2, kind: input, shape index: {}]   ;;  %s920_s3 = inlined_call_operand.vmem [shape: f32[1,32], index: 3, kind: input, shape index: {}]   ;;  %s921_s4 = inlined_call_operand.vmem [shape: f32[2,32,64], index: 4, kind: output, shape index: {0}]   ;;  %s922_s5 = inlined_call_operand.hbm [shape: f32[2,1,32], index: 5, kind: output, shape index: {1}]   ;;  %s923_s6 = inlined_call_operand.hbm [shape: f32[2,1,32], index: 6, kind: output, shape index: {2}]  }
   0x1   :  { %14 = vsyncpa [#allocation3 + $0x1], 0 }
   0x2   :  { %15 = vsyncpa [#allocation5], 0 }
   0x3   :  { %17 = vsyncpa [#allocation5 + $0x1], 0  ;;  %s729_s21 = smov 0   ;;  %s731_s22 = smov 0  }
   0x4   :  { %s733_s23 = smov 0   ;;  %s735_s24 = smov 0  }
   0x5 LB: > { %s750_s25 = sadd.s32 4294967295, %s689_s24   ;;  %s534_s26 = sadd.s32 4294967294, %s689_s24   ;;  %s689_s24 = sphi %s735_s24, %s931_s24   ;;  %s685_s23 = sphi %s733_s23, %s930_s23   ;;  %s681_s22 = sphi %s731_s22, %s929_s22   ;;  %s677_s21 = sphi %s729_s21, %s928_s21  }
   0x6   : > { %s754_s27 = sadd.s32 1, %s689_s24   ;;  %s145_s28 = sadd.s32 1, %s685_s23 }
   0x7   : > { %s142_s29 = ssub.s32 %s689_s24, %s754_s27  ;;  %p155_p0 = scmp.ne.s32.totalorder %s685_s23, %s681_s22 }
   0x8   : > { %p143_p1 = scmp.eq.s32.totalorder %s142_s29, 0  ;;  %p156_p2 = scmp.eq.s32.totalorder %s750_s25, 1 }
   0x9   : > { %p161_p3 = scmp.ne.s32.totalorder %s681_s22, %s677_s21  ;;  %p162_p4 = scmp.eq.s32.totalorder %s534_s26, 1 }
   0xa   : > { %s765_s30 = scalar_select %p143_p1, %s685_s23, %s145_s28  }
   0xb   : > { %p767_p5 = por %p156_p2, %p155_p0  ;;  %p771_p6 = por %p162_p4, %p161_p3 }
   0xc   : > { %p537_p7 = scmp.ge.s32.totalorder %s689_s24, 1  ;;  %p223_p8 = scmp.lt.s32.totalorder %s689_s24, 3 }
   0xe   : > { %p224_p9 = pnand %p537_p7, %p223_p8 }
   0xf   : > { %v271_v0 = vld [vmem:[%s918_s1] sm:$0x3] (!%p224_p9)  ;;  %v272_v1 = vld [vmem:[%s918_s1 + $0x2] sm:$0x3] (!%p224_p9)  ;;  %vm273_vm0 = vcmask (!%p224_p9), 254976   ;;  %v291_v13 = vlaneseq (!%p224_p9)  ;;  %p261_p10 = scmp.lt.s32.totalorder (!%p224_p9), %s750_s25, 1 }
  0x10   : > { %227 = sbr.rel (%p224_p9) target bundleno = 229 (0xe5), region = 36  ;;  %v274_v2 = vsel (!%p224_p9), %vm273_vm0, %v271_v0, 0.0  ;;  %v275_v3 = vsel (!%p224_p9), %vm273_vm0, %v272_v1, 0.0  ;;  %v691_v11 = vmov (!%p224_p9), 1966171168   ;;  %s821_s28 = sand.u32 (!%p224_p9), 1, %s681_s22  }
  0x11   : > { %v276_v4 = vadd.f32 (!%p224_p9), %v275_v3, %v274_v2  ;;  %v289_v12 = vunpack.c.l.s4 (!%p224_p9), %v691_v11  ;;  %v292_v15 = vshrl.u32 (!%p224_p9), %v291_v13, 7  ;;  %v284_v20 = vld [vmem:[%s919_s2] sm:$0x1] (!%p224_p9)  ;;  %vm384_vm1 = vcmask (!%p224_p9), 253952   ;;  %s541_s29 = sshll.u32 (!%p224_p9), %s750_s25, 4  ;;  %s254_s9 = scalar_lea.vmem (!%p224_p9), [#allocation2], %s821_s28 }
  0x12   : > { %v305_v24 = vld [vmem:[%s920_s3] sm:$0x1] (!%p224_p9)  ;;  %s413_s10 = sshll.u32 (!%p224_p9), %s254_s9, 4  ;;  %vm386_vm2 = vcmask (!%p224_p9), 254977   ;;  %s924_s15 = scalar_lea.vmem (!%p224_p9), [#allocation4], %s821_s28  ;;  %s414_s10 = int_to_ptr.vmem [resolvable:$true] %s413_s10 }
  0x13   : > { %v277_v5 = vmul.f32 (!%p224_p9), 0.007575758, %v276_v4  ;;  %v290_v14 = vunpack.c.0.s8 (!%p224_p9), %v289_v12  ;;  %v320_v22 = vsub.s32 (!%p224_p9), 0, %v292_v15  ;;  %s394_s16 = scalar_lea.sflag (!%p224_p9), [#allocation3], %s821_s28  ;;  %s595_s17 = scalar_lea.vmem (!%p224_p9), %s414_s10, 16 }
  0x14   : > { %p596_p11 = scmp.ne.s32.totalorder (!%p224_p9), %s414_s10, %s595_s17  ;;  %s692_s18 = smov (!%p224_p9), [#allocation2]  }
  0x15   : > { %v278_v6 = vmul.f32 (!%p224_p9), %v277_v5, %v277_v5  ;;  %v293_v16 = vsub.s32 (!%p224_p9), %v290_v14, %v292_v15  ;;  %s599_s20 = sshll.u32 (!%p224_p9), %s692_s18, 4  ;;  %s600_s20 = int_to_ptr.vmem [resolvable:$false] %s599_s20 }
  0x16   : > { %p597_p12 = pnand (!%p224_p9), %p596_p11, %p767_p5  ;;  %s601_s26 = scalar_lea.vmem (!%p224_p9), %s600_s20, 32 }
  0x17   : > { %v280_v7 = vrot.slane %v278_v6, 7  ;;  %s785_s13 = scalar_select %p261_p10, %s750_s25, 1 }
  0x18   : > { %p598_p13 = pneg %p597_p12  ;;  %p602_p0 = scmp.lt.s32.totalorder %s414_s10, %s600_s20 }
  0x19   : > { %v282_v8 = vsub.f32 %v277_v5, %v280_v7  ;;  %s546_s14 = smul.u32 72, %s785_s13  ;;  %p603_p1 = scmp.lt.s32.totalorder %s601_s26, %s595_s17 }
  0x1b   : > { %v283_v9 = vmax.f32 %v282_v8, 0.0  ;;  %s794_s19 = scalar_lea.vmem %s917_s0, %s546_s14  ;;  %s833_s14 = scalar_lea.hbm %s922_s5, %s541_s29 }
  0x1c   : > { %v308_v25 = vld [vmem:[%s794_s19] sm:$0xff]  ;;  %v309_v28 = vld [vmem:[%s794_s19 + $0x8] sm:$0xff]  ;;  %v310_v33 = vld [vmem:[%s794_s19 + $0x10] sm:$0xff]  ;;  %p604_p2 = por %p603_p1, %p602_p0 }
  0x1d   : > { %v285_v10 = vadd.f32 1e-05, %v283_v9  ;;  %v311_v37 = vld [vmem:[%s794_s19 + $0x18] sm:$0xff]  ;;  %v312_v40 = vld [vmem:[%s794_s19 + $0x20] sm:$0xff]  ;;  %v313_v45 = vld [vmem:[%s794_s19 + $0x28] sm:$0xff] }
  0x1e   : > { %v316_v41 = vld [vmem:[%s794_s19 + $0x40] sm:$0x3]  ;;  %v314_v49 = vld [vmem:[%s794_s19 + $0x30] sm:$0xff]  ;;  %p605_p3 = pnand %p604_p2, %p598_p13 }
  0x1f   : > { %593 = vrsqrt.f32 %v285_v10 }
  0x29   : > { %v594_v17 = vpop.eup %593 }
  0x2a   : > { %v294_v18 = vrot.slane %v594_v17, %v293_v16 }
  0x2c   : > { %v295_v19 = vcombine.high %v294_v18, %v294_v18 }
  0x2e   : > { %v302_v21 = vrot.slane %v295_v19, %v293_v16 }
  0x30   : > { %v304_v23 = vmul.f32 %v302_v21, %v284_v20 }
  0x32   : > { %v306_v26 = vmul.f32 %v304_v23, %v277_v5  ;;  %v800_v27 = vrot.slane %v304_v23, %v320_v22 }
  0x34   : > { %v307_v29 = vsub.f32 %v305_v24, %v306_v26  ;;  %v323_v30 = vmul.f32 %v800_v27, %v308_v25  ;;  %v324_v32 = vmul.f32 %v800_v27, %v309_v28  ;;  %v325_v36 = vmul.f32 %v800_v27, %v310_v33 }
  0x35   : > { %v326_v39 = vmul.f32 %v800_v27, %v311_v37  ;;  %v327_v43 = vmul.f32 %v800_v27, %v312_v40  ;;  %v331_v44 = vmul.f32 %v800_v27, %v316_v41  ;;  %v328_v48 = vmul.f32 %v800_v27, %v313_v45 }
  0x36   : > { %v804_v31 = vrot.slane %v307_v29, %v320_v22 }
  0x38   : > { %v338_v34 = vadd.f32 %v804_v31, %v323_v30  ;;  %v339_v35 = vadd.f32 %v804_v31, %v324_v32  ;;  %v340_v38 = vadd.f32 %v804_v31, %v325_v36  ;;  %v341_v42 = vadd.f32 %v804_v31, %v326_v39 }
  0x39   : > { %v346_v46 = vadd.f32 %v804_v31, %v331_v44  ;;  %v342_v47 = vadd.f32 %v804_v31, %v327_v43 }
  0x3a   : > { %347 = vxpose.xlu0.b32.start [1/8] (short) (narrow) %v338_v34, 32 }
  0x3b   : > { %385 = vst.msk [vmem:[%s254_s9] sm:$0x1] %vm384_vm1, %v346_v46 }
  0x3c   : > { %387 = vst.msk [vmem:[%s924_s15 - $0x1] sm:$0x2] %vm386_vm2, %v346_v46 }
  0x3e   : > { %348 = vxpose.xlu0.b32.cont [2/8] (short) (narrow) %v339_v35, 32 }
  0x42   : > { %349 = vxpose.xlu0.b32.cont [3/8] (short) (narrow) %v340_v38, 32 }
  0x46   : > { %350 = vxpose.xlu0.b32.cont [4/8] (short) (narrow) %v341_v42, 32 }
  0x47   : > { %608 = shalt.err (!%p605_p3)
}
  0x48   : > { %s609_s9 = scalar_lea.hbm %s833_s14, 16  ;;  %s613_s18 = scalar_lea.hbm %s922_s5, 32 }
  0x49   : > { %p610_p4 = scmp.ne.s32.totalorder %s833_s14, %s609_s9  ;;  %p614_p9 = scmp.lt.u32.totalorder %s833_s14, %s922_s5 }
  0x4a   : > { %p615_p10 = scmp.lt.u32.totalorder %s613_s18, %s609_s9  ;;  %p617_p12 = scmp.lt.u32.totalorder %s609_s9, %s833_s14 }
  0x4b   : > { %p611_p7 = pnand %p610_p4, %p767_p5 }
  0x4c   : > { %p616_p11 = por %p615_p10, %p614_p9 }
  0x4d   : > { %p612_p8 = pneg %p611_p7 }
  0x4e   : > { %p618_p13 = por %p617_p12, %p616_p11 }
  0x50   : > { %p619_p0 = pnand %p618_p13, %p612_p8 }
  0x52   : > { %622 = shalt.err (!%p619_p0)
}
  0x53   : > { %547 = dma.vmem_to_hbm [thread:$0]  (%p767_p5), %s414_s10, 16, %s833_s14, %s394_s16   ;;  %351 = vxpose.xlu0.b32.cont [5/8] (short) (narrow) %v342_v47, 32  ;;  %v343_v50 = vadd.f32 %v804_v31, %v328_v48  ;;  %v329_v51 = vmul.f32 %v800_v27, %v314_v49  ;;  %v315_v52 = vld [vmem:[%s794_s19 + $0x38] sm:$0xff] }
  0x54   : > { %s862_s15 = scalar_lea.hbm %s923_s6, %s541_s29  ;;  %s927_s11 = scalar_lea.vmem [#allocation4], %s821_s28 }
  0x55   : > { %s426_s9 = sshll.u32 %s927_s11, 4  ;;  %s398_s10 = scalar_lea.sflag [#allocation5], %s821_s28  ;;  %s868_s9 = int_to_ptr.vmem [resolvable:$true] %s426_s9 }
  0x56   : > { %s623_s25 = scalar_lea.vmem %s868_s9, 16  ;;  %s693_s29 = smov [#allocation4]  }
  0x57   : > { %p624_p1 = scmp.ne.s32.totalorder %s868_s9, %s623_s25  ;;  %s627_s14 = sshll.u32 %s693_s29, 4  ;;  %s628_s14 = int_to_ptr.vmem [resolvable:$false] %s627_s14 }
  0x58   : > { %s629_s16 = scalar_lea.vmem %s628_s14, 32  ;;  %p630_p4 = scmp.lt.s32.totalorder %s868_s9, %s628_s14 }
  0x59   : > { %p625_p2 = pnand %p624_p1, %p767_p5  ;;  %p631_p7 = scmp.lt.s32.totalorder %s629_s16, %s623_s25 }
  0x5b   : > { %p626_p3 = pneg %p625_p2  ;;  %p632_p8 = por %p631_p7, %p630_p4 }
  0x5d   : > { %p633_p9 = pnand %p632_p8, %p626_p3 }
  0x5f   : > { %636 = shalt.err (!%p633_p9)
}
  0x60   : > { %s637_s19 = scalar_lea.hbm %s862_s15, 16  ;;  %s641_s18 = scalar_lea.hbm %s923_s6, 32 }
  0x61   : > { %p638_p10 = scmp.ne.s32.totalorder %s862_s15, %s637_s19  ;;  %p642_p13 = scmp.lt.u32.totalorder %s862_s15, %s923_s6 }
  0x62   : > { %p643_p0 = scmp.lt.u32.totalorder %s641_s18, %s637_s19  ;;  %p645_p2 = scmp.lt.u32.totalorder %s637_s19, %s862_s15 }
  0x63   : > { %p639_p11 = pnand %p638_p10, %p767_p5 }
  0x64   : > { %p644_p1 = por %p643_p0, %p642_p13 }
  0x65   : > { %p640_p12 = pneg %p639_p11 }
  0x66   : > { %p646_p3 = por %p645_p2, %p644_p1 }
  0x68   : > { %p647_p4 = pnand %p646_p3, %p640_p12 }
  0x6a   : > { %650 = shalt.err (!%p647_p4)
}
  0x6b   : > { %548 = dma.vmem_to_hbm [thread:$0]  (%p767_p5), %s868_s9, 16, %s862_s15, %s398_s10   ;;  %352 = vxpose.xlu0.b32.cont [6/8] (short) (narrow) %v343_v50, 32  ;;  %v344_v53 = vadd.f32 %v804_v31, %v329_v51  ;;  %v330_v54 = vmul.f32 %v800_v27, %v315_v52  ;;  %vm379_vm3 = vcmask 523264  }
  0x6c   : > { %s545_s26 = sshll.u32 %s785_s13, 5 }
  0x6d   : > { %v345_v55 = vadd.f32 %v804_v31, %v330_v54  ;;  %s270_s29 = scalar_lea.vmem %s921_s4, %s545_s26 }
  0x6f   : > { %353 = vxpose.xlu0.b32.cont [7/8] (short) (narrow) %v344_v53, 32 }
  0x73   : > { %354 = vxpose.xlu0.b32.end [8/8] (short) (narrow) %v345_v55, 32 }
  0xd7   : > { %v363_v56 = vpop.trf.xlu0 }
  0xd8   : > { %380 = vst.msk [vmem:[%s270_s29] sm:$0xff] %vm379_vm3, %v363_v56 }
  0xdb   : > { %v364_v57 = vpop.trf.xlu0 }
  0xdc   : > { %381 = vst.msk [vmem:[%s270_s29 + $0x8] sm:$0xff] %vm379_vm3, %v364_v57 }
  0xdf   : > { %v365_v58 = vpop.trf.xlu0 }
  0xe0   : > { %382 = vst.msk [vmem:[%s270_s29 + $0x10] sm:$0xff] %vm379_vm3, %v365_v58 }
  0xe3   : > { %v366_v59 = vpop.trf.xlu0 }
  0xe4   : > { %383 = vst.msk [vmem:[%s270_s29 + $0x18] sm:$0xff] %vm379_vm3, %v366_v59 }
  0xe5 PF: > { %p558_p5 = scmp.ge.s32.totalorder %s689_s24, 2  ;;  %s446_s7 = sand.u32 1, %s677_s21  }
  0xe6   : > { %s447_s13 = scalar_lea.sflag [#allocation3], %s446_s7 }
  0xe7   : > { %p552_p7 = pnand %p558_p5, %p771_p6 }
  0xe9   : > { %668 = dma.done.wait (!%p552_p7), %s447_s13, 16  }
  0xea   : > { %670 = vsyncadd (!%p552_p7), %s447_s13, 4294967280  ;;  %s455_s15 = scalar_lea.sflag [#allocation5], %s446_s7 }
  0xeb   : > { %672 = dma.done.wait (!%p552_p7), %s455_s15, 16  }
  0xec   : > { %674 = vsyncadd (!%p552_p7), %s455_s15, 4294967280  ;;  %p20_p8 = scmp.ge.s32.totalorder %s754_s27, 4   ;;  %s928_s21 = smov %s681_s22 }
  0xed   : > { %s929_s22 = smov %s685_s23  ;;  %s930_s23 = smov %s765_s30 }
  0xee   : > { %s931_s24 = smov %s754_s27  ;;  %22 = sbr.rel (!%p20_p8) target bundleno = 5 (0x5), region = 100 }
  0xf5   :  { %459 = vsyncpa [#allocation3], 1 }
  0xf6   :  { %461 = vsyncpa [#allocation3 + $0x1], 1 }
  0xf7   :  { %462 = vsyncpa [#allocation5], 1 }
  0xf8   :  { %464 = vsyncpa [#allocation5 + $0x1], 1 }

// kernel: deep_attention_token.4
= control target key start
LH: loop header
LB: loop body
LE: loop exit
PB: predicated region body
PF: predicated region fallthrough
CT: control target
= control target key end

     0   :  { %s1413_s30 = smov 0   ;;  %s1785_s0 = inlined_call_operand.vmem [shape: f32[2,66,32], index: 0, kind: input, shape index: {}]   ;;  %s1786_s1 = inlined_call_operand.vmem [shape: f32[2,2,32], index: 1, kind: input, shape index: {}]   ;;  %s1787_s2 = inlined_call_operand.vmem [shape: f32[1,32], index: 2, kind: input, shape index: {}]   ;;  %s1788_s3 = inlined_call_operand.vmem [shape: f32[1,32], index: 3, kind: input, shape index: {}]   ;;  %s1789_s4 = inlined_call_operand.vmem [shape: f32[32,64], index: 4, kind: input, shape index: {}]   ;;  %s1790_s5 = inlined_call_operand.vmem [shape: f32[1,64], index: 5, kind: input, shape index: {}]   ;;  %s1791_s6 = inlined_call_operand.vmem [shape: f32[64,32], index: 6, kind: input, shape index: {}]   ;;  %s1792_s7 = inlined_call_operand.vmem [shape: f32[1,32], index: 7, kind: input, shape index: {}]   ;;  %s1793_s8 = inlined_call_operand.vmem [shape: f32[2,66,32], index: 8, kind: output, shape index: {0}]   ;;  %s1794_s9 = inlined_call_operand.vmem [shape: f32[2,2,32], index: 9, kind: output, shape index: {1}]  }
   0x1 LB: > { %s1118_s10 = sadd.s32 4294967295, %s1357_s30   ;;  %p1122_p0 = scmp.ge.s32.totalorder %s1357_s30, 1  ;;  %s1357_s30 = sphi %s1413_s30, %s20_s30  }
   0x2   : > { %p290_p1 = scmp.lt.s32.totalorder %s1357_s30, 3 }
   0x4   : > { %p291_p2 = pnand %p1122_p0, %p290_p1 }
   0x5   : > { %v420_v0 = vld [vmem:[%s1789_s4] sm:$0xff] (!%p291_p2)  ;;  %v421_v1 = vld [vmem:[%s1789_s4 + $0x8] sm:$0xff] (!%p291_p2)  ;;  %v422_v2 = vld [vmem:[%s1789_s4 + $0x10] sm:$0xff] (!%p291_p2)  ;;  %v1359_v3 = vmov (!%p291_p2), 0.0|0.0   ;;  %vm1360_vm0 = vmmov (!%p291_p2), 0   ;;  %v1361_v6 = vmov (!%p291_p2), 0.0   ;;  %v364_v21 = vlaneseq (!%p291_p2) }
   0x6   : > { %294 = sbr.rel (%p291_p2) target bundleno = 585 (0x249), region = 52  ;;  %1274 = vmatprep.subr.bf16.mxu0 (!%p291_p2), %v1359_v3  ;;  %v1275_v4 = vpack.c.bf16 (!%p291_p2), %v421_v1, %v420_v0  ;;  %v423_v5 = vld [vmem:[%s1789_s4 + $0x18] sm:$0xff] (!%p291_p2)  ;;  %1204 = vmatprep.mubr.msk.f32.mxu0 (!%p291_p2), %vm1360_vm0, %v1361_v6  ;;  %v344_v7 = vld [vmem:[%s1786_s1] sm:$0x3] (!%p291_p2)  ;;  %v345_v8 = vld [vmem:[%s1786_s1 + $0x2] sm:$0x3] (!%p291_p2) }
   0x7   : > { %vm346_vm1 = vcmask (!%p291_p2), 254976   ;;  %1292 = vmatprep.subr.bf16.mxu1 (!%p291_p2), %v1359_v3  ;;  %1250 = vmatprep.mubr.msk.f32.mxu1 (!%p291_p2), %vm1360_vm0, %v1361_v6  ;;  %v1278_v9 = vpack.c.bf16 (!%p291_p2), %v423_v5, %v422_v2  ;;  %v1362_v19 = vmov (!%p291_p2), 1966171168   ;;  %p330_p3 = scmp.lt.s32.totalorder (!%p291_p2), %s1118_s10, 1  ;;  %v365_v23 = vshrl.u32 (!%p291_p2), %v364_v21, 7  ;;  %v812_v0 = vld [vmem:[%s1791_s6] sm:$0xff] (!%p291_p2) }
   0x8   : > { %1276 = vmatpush3.bf16.msra.mxu0 (!%p291_p2), %v1275_v4  ;;  %v347_v10 = vsel (!%p291_p2), %vm346_vm1, %v344_v7, 0.0  ;;  %v348_v11 = vsel (!%p291_p2), %vm346_vm1, %v345_v8, 0.0  ;;  %v362_v20 = vunpack.c.l.s4 (!%p291_p2), %v1362_v19  ;;  %v357_v28 = vld [vmem:[%s1787_s2] sm:$0x1] (!%p291_p2)  ;;  %vm431_vm2 = vcmask (!%p291_p2), 261120   ;;  %v813_v1 = vld [vmem:[%s1791_s6 + $0x8] sm:$0xff] (!%p291_p2) }
   0x9   : > { %1277 = vmatprep.subr.bf16.mxu0 (!%p291_p2), %v1359_v3  ;;  %v349_v12 = vadd.f32 (!%p291_p2), %v348_v11, %v347_v10  ;;  %v393_v30 = vsub.s32 (!%p291_p2), 0, %v365_v23  ;;  %v378_v32 = vld [vmem:[%s1788_s3] sm:$0x1] (!%p291_p2)  ;;  %v1281_v2 = vpack.c.bf16 (!%p291_p2), %v813_v1, %v812_v0  ;;  %v814_v4 = vld [vmem:[%s1791_s6 + $0x10] sm:$0xff] (!%p291_p2)  ;;  %v815_v5 = vld [vmem:[%s1791_s6 + $0x18] sm:$0xff] (!%p291_p2)  ;;  %vm827_vm4 = vcmask (!%p291_p2), 523264  }
   0xa   : > { %v363_v22 = vunpack.c.0.s8 (!%p291_p2), %v362_v20  ;;  %v1284_v7 = vpack.c.bf16 (!%p291_p2), %v815_v5, %v814_v4  ;;  %v816_v8 = vld [vmem:[%s1791_s6 + $0x20] sm:$0xff] (!%p291_p2)  ;;  %v818_v11 = vld [vmem:[%s1791_s6 + $0x30] sm:$0xff] (!%p291_p2)  ;;  %vm997_vm13 = vcmask (!%p291_p2), 253952  }
   0xb   : > { %v350_v13 = vmul.f32 (!%p291_p2), 0.007575758, %v349_v12  ;;  %1296 = vmatpush3.bf16.msra.mxu1 (!%p291_p2), %v1281_v2  ;;  %v819_v12 = vld [vmem:[%s1791_s6 + $0x38] sm:$0xff] (!%p291_p2) }
   0xc   : > { %1279 = vmatpush3.bf16.msra.mxu0 (!%p291_p2), %v1278_v9  ;;  %v366_v24 = vsub.s32 (!%p291_p2), %v363_v22, %v365_v23  ;;  %1293 = vmatprep.subr.bf16.mxu1 (!%p291_p2), %v1359_v3  ;;  %v817_v9 = vld [vmem:[%s1791_s6 + $0x28] sm:$0xff] (!%p291_p2) }
   0xd   : > { %v351_v14 = vmul.f32 %v350_v13, %v350_v13  ;;  %1280 = vmatprep.subr.bf16.mxu0 %v1359_v3  ;;  %s1796_s10 = smov (!%p330_p3, %s1118_s10), 1  ;;  %v1287_v10 = vpack.c.bf16 %v817_v9, %v816_v8 }
   0xe   : > { %s1300_s23 = smul.u32 72, %s1796_s10 }
   0xf   : > { %v353_v15 = vrot.slane %v351_v14, 7  ;;  %1297 = vmatpush3.bf16.msra.mxu1 %v1284_v7  ;;  %v1538_v14 = vld [vmem:[%s1790_s5] ss:$0 sm:$0xff] }
  0x10   : > { %s1464_s28 = scalar_lea.vmem %s1785_s0, %s1300_s23  ;;  %1294 = vmatprep.subr.bf16.mxu1 %v1359_v3  ;;  %s1731_s16 = scalar_lea.vmem %s1793_s8, %s1300_s23 }
  0x11   : > { %v355_v16 = vsub.f32 %v350_v13, %v353_v15  ;;  %v381_v33 = vld [vmem:[%s1464_s28] sm:$0xff]  ;;  %v382_v36 = vld [vmem:[%s1464_s28 + $0x8] sm:$0xff]  ;;  %v383_v41 = vld [vmem:[%s1464_s28 + $0x10] sm:$0xff]  ;;  %s1125_s23 = sshll.u32 %s1796_s10, 1 }
  0x12   : > { %v384_v45 = vld [vmem:[%s1464_s28 + $0x18] sm:$0xff]  ;;  %v385_v48 = vld [vmem:[%s1464_s28 + $0x20] sm:$0xff]  ;;  %v386_v51 = vld [vmem:[%s1464_s28 + $0x28] sm:$0xff]  ;;  %s343_s19 = scalar_lea.vmem %s1794_s9, %s1125_s23 }
  0x13   : > { %v356_v17 = vmax.f32 %v355_v16, 0.0  ;;  %v387_v54 = vld [vmem:[%s1464_s28 + $0x30] sm:$0xff]  ;;  %v388_v57 = vld [vmem:[%s1464_s28 + $0x38] sm:$0xff]  ;;  %v389_v60 = vld [vmem:[%s1464_s28 + $0x40] sm:$0x3]  ;;  %1298 = vmatpush3.bf16.msra.mxu1 %v1287_v10 }
  0x14   : > { %1295 = vmatprep.subr.bf16.mxu1 %v1359_v3 }
  0x15   : > { %v358_v18 = vadd.f32 1e-05, %v356_v17 }
  0x17   : > { %1313 = vrsqrt.f32 %v358_v18 }
  0x21   : > { %v1314_v25 = vpop.eup %1313 }
  0x22   : > { %v367_v26 = vrot.slane %v1314_v25, %v366_v24 }
  0x24   : > { %v368_v27 = vcombine.high %v367_v26, %v367_v26 }
  0x26   : > { %v375_v29 = vrot.slane %v368_v27, %v366_v24 }
  0x28   : > { %v377_v31 = vmul.f32 %v375_v29, %v357_v28 }
  0x2a   : > { %v379_v34 = vmul.f32 %v377_v31, %v350_v13  ;;  %v394_v35 = vrot.slane %v377_v31, %v393_v30  ;;  %v1290_v13 = vpack.c.bf16 %v819_v12, %v818_v11 }
  0x2c   : > { %v380_v37 = vsub.f32 %v378_v32, %v379_v34  ;;  %v396_v38 = vmul.f32 %v394_v35, %v381_v33  ;;  %v397_v40 = vmul.f32 %v394_v35, %v382_v36  ;;  %v398_v44 = vmul.f32 %v394_v35, %v383_v41  ;;  %1299 = vmatpush3.bf16.msra.mxu1 %v1290_v13 }
  0x2d   : > { %v399_v47 = vmul.f32 %v394_v35, %v384_v45  ;;  %v400_v50 = vmul.f32 %v394_v35, %v385_v48  ;;  %v401_v53 = vmul.f32 %v394_v35, %v386_v51  ;;  %v402_v56 = vmul.f32 %v394_v35, %v387_v54 }
  0x2e   : > { %v409_v39 = vrot.slane %v380_v37, %v393_v30  ;;  %v403_v59 = vmul.f32 %v394_v35, %v388_v57  ;;  %v404_v62 = vmul.f32 %v394_v35, %v389_v60 }
  0x30   : > { %v411_v42 = vadd.f32 %v409_v39, %v396_v38  ;;  %v412_v43 = vadd.f32 %v409_v39, %v397_v40  ;;  %v413_v46 = vadd.f32 %v409_v39, %v398_v44  ;;  %v414_v49 = vadd.f32 %v409_v39, %v399_v47 }
  0x31   : > { %v415_v52 = vadd.f32 %v409_v39, %v400_v50  ;;  %v416_v55 = vadd.f32 %v409_v39, %v401_v53  ;;  %v417_v58 = vadd.f32 %v409_v39, %v402_v56  ;;  %v418_v61 = vadd.f32 %v409_v39, %v403_v59 }
  0x32   : > { %1205 = vmatmul.mubr.msk.f32.vlgmr.msra.gmra.mrb[0].mxu0 %vm431_vm2, %v411_v42  ;;  %v419_v63 = vadd.f32 %v409_v39, %v404_v62 }
  0x33   : > { %1207 = vmatprep.mubr.msk.f32.mxu0 %vm1360_vm0, %v1361_v6  ;;  %1282 = vmatpush3.bf16.msra.mxu0 %v1281_v2 }
  0x34   : > { %1283 = vmatprep.subr.bf16.mxu0 %v1359_v3 }
  0x36   : > { %1208 = vmatmul.mubr.msk.f32.gmra.mrb[2].mxu0 %vm431_vm2, %v412_v43 }
  0x37   : > { %1210 = vmatprep.mubr.msk.f32.mxu0 %vm1360_vm0, %v1361_v6  ;;  %1285 = vmatpush3.bf16.msra.mxu0 %v1284_v7 }
  0x38   : > { %1286 = vmatprep.subr.bf16.mxu0 %v1359_v3 }
  0x3a   : > { %1211 = vmatmul.mubr.msk.f32.gmra.mrb[4].mxu0 %vm431_vm2, %v413_v46 }
  0x3b   : > { %1213 = vmatprep.mubr.msk.f32.mxu0 %vm1360_vm0, %v1361_v6  ;;  %1288 = vmatpush3.bf16.msra.mxu0 %v1287_v10 }
  0x3c   : > { %1289 = vmatprep.subr.bf16.mxu0 %v1359_v3 }
  0x3e   : > { %1214 = vmatmul.mubr.msk.f32.gmra.mrb[6].mxu0 %vm431_vm2, %v414_v49 }
  0x3f   : > { %1216 = vmatprep.mubr.msk.f32.mxu0 %vm1360_vm0, %v1361_v6  ;;  %1291 = vmatpush3.bf16.msra.mxu0 %v1290_v13 }
  0x42   : > { %1217 = vmatmul.mubr.msk.f32.gmra.mrb[8].mxu0 %vm431_vm2, %v415_v52 }
  0x43   : > { %1219 = vmatprep.mubr.msk.f32.mxu0 %vm1360_vm0, %v1361_v6 }
  0x46   : > { %1220 = vmatmul.mubr.msk.f32.gmra.mrb[10].mxu0 %vm431_vm2, %v416_v55 }
  0x47   : > { %1222 = vmatprep.mubr.msk.f32.mxu0 %vm1360_vm0, %v1361_v6 }
  0x4a   : > { %1223 = vmatmul.mubr.msk.f32.gmra.mrb[12].mxu0 %vm431_vm2, %v417_v58 }
  0x4b   : > { %1225 = vmatprep.mubr.msk.f32.mxu0 %vm1360_vm0, %v1361_v6 }
  0x4e   : > { %1226 = vmatmul.mubr.msk.f32.gmra.mrb[14].mxu0 %vm431_vm2, %v418_v61 }
  0x4f   : > { %1228 = vmatprep.mubr.msk.f32.mxu0 %vm1360_vm0, %v1361_v6 }
  0x52   : > { %1229 = vmatmul.mubr.msk.f32.gmra.mrb[16].mxu0 %vm431_vm2, %v419_v63 }
  0x53   : > { %1247 = vmatprep.mubr.msk.f32.mxu0 %vm1360_vm0, %v1361_v6 }
 0x105   : > { %v525_v15 = vpop.f32.mrb[0].mxu0 }
 0x106   : > { %v526_v16 = vadd.f32 %v1538_v14, %v525_v15  ;;  %v1206_v17 = vpop.f32.mrb[1].mxu0 }
 0x108   : > { %v1541_v18 = vmul.f32 0.70710677, %v526_v16  ;;  %v1587_v10 = vmul.f32 0.5, %v526_v16 }
 0x109   : > { %v530_v19 = vpop.f32.mrb[2].mxu0 }
 0x10a   : > { %v578_v20 = vand.u32 2147483647, %v1541_v18  ;;  %v1545_v21 = vadd.f32 %v1538_v14, %v530_v19  ;;  %v1209_v3 = vpop.f32.mrb[3].mxu0  ;;  %vm758_vm3 = vcmp.ge.f32.partialorder %v1541_v18, 0.0 }
 0x10c   : > { %v587_v22 = vmul.f32 0.3275911, %v578_v20  ;;  %v1548_v23 = vmul.f32 0.70710677, %v1545_v21  ;;  %v704_v35 = vsub.f32 0.0, %v578_v20 }
 0x10d   : > { %v535_v24 = vpop.f32.mrb[4].mxu0 }
 0x10e   : > { %v596_v25 = vadd.f32 1.0, %v587_v22  ;;  %v579_v26 = vand.u32 2147483647, %v1548_v23  ;;  %v1212_v27 = vpop.f32.mrb[5].mxu0  ;;  %v1552_v28 = vadd.f32 %v1538_v14, %v535_v24  ;;  %v713_v44 = vmul.f32 %v704_v35, %v578_v20 }
 0x10f   : > { %vm759_vm5 = vcmp.ge.f32.partialorder %v1548_v23, 0.0 }
 0x110   : > { %1315 = vrcp.f32 %v596_v25  ;;  %v588_v29 = vmul.f32 0.3275911, %v579_v26  ;;  %v1555_v30 = vmul.f32 0.70710677, %v1552_v28  ;;  %v705_v40 = vsub.f32 0.0, %v579_v26 }
 0x111   : > { %v540_v31 = vpop.f32.mrb[6].mxu0  ;;  %v722_v57 = vmul.f32 1.442695, %v713_v44 }
 0x112   : > { %v597_v32 = vadd.f32 1.0, %v588_v29  ;;  %v1558_v33 = vadd.f32 %v1538_v14, %v540_v31  ;;  %v1215_v34 = vpop.f32.mrb[7].mxu0  ;;  %v580_v36 = vand.u32 2147483647, %v1555_v30  ;;  %v714_v51 = vmul.f32 %v705_v40, %v579_v26 }
 0x113   : > { %vm760_vm6 = vcmp.ge.f32.partialorder %v1555_v30, 0.0 }
 0x114   : > { %1317 = vrcp.f32 %v597_v32  ;;  %v1562_v37 = vmul.f32 0.70710677, %v1558_v33  ;;  %v589_v38 = vmul.f32 0.3275911, %v580_v36  ;;  %v706_v46 = vsub.f32 0.0, %v580_v36 }
 0x115   : > { %v545_v39 = vpop.f32.mrb[8].mxu0  ;;  %v724_v2 = vmul.f32 1.442695, %v714_v51  ;;  %v788_v30 = vmul.f32 0.5, %v1558_v33 }
 0x116   : > { %v581_v41 = vand.u32 2147483647, %v1562_v37  ;;  %v1566_v42 = vadd.f32 %v1538_v14, %v545_v39  ;;  %v1218_v43 = vpop.f32.mrb[9].mxu0  ;;  %v598_v45 = vadd.f32 1.0, %v589_v38  ;;  %v715_v59 = vmul.f32 %v706_v46, %v580_v36 }
 0x117   : > { %vm761_vm7 = vcmp.ge.f32.partialorder %v1562_v37, 0.0 }
 0x118   : > { %v590_v47 = vmul.f32 0.3275911, %v581_v41  ;;  %v1569_v48 = vmul.f32 0.70710677, %v1566_v42  ;;  %1319 = vrcp.f32 %v598_v45  ;;  %v707_v53 = vsub.f32 0.0, %v581_v41 }
 0x119   : > { %v550_v49 = vpop.f32.mrb[10].mxu0  ;;  %v726_v13 = vmul.f32 1.442695, %v715_v59 }
 0x11a   : > { %v1571_v50 = vpop.eup %1315  ;;  %v599_v52 = vadd.f32 1.0, %v590_v47  ;;  %v582_v54 = vand.u32 2147483647, %v1569_v48  ;;  %v1221_v55 = vpop.f32.mrb[11].mxu0  ;;  %v1576_v58 = vadd.f32 %v1538_v14, %v550_v49  ;;  %v716_v4 = vmul.f32 %v707_v53, %v581_v41 }
 0x11b   : > { %v623_v56 = vmul.f32 1.0614054, %v1571_v50  ;;  %vm762_vm8 = vcmp.ge.f32.partialorder %v1569_v48, 0.0 }
 0x11c   : > { %1321 = vrcp.f32 %v599_v52  ;;  %v591_v60 = vmul.f32 0.3275911, %v582_v54  ;;  %v708_v61 = vsub.f32 0.0, %v582_v54  ;;  %v1579_v63 = vmul.f32 0.70710677, %v1576_v58 }
 0x11d   : > { %v1136_v62 = vadd.f32 -1.4531521, %v623_v56  ;;  %v555_v0 = vpop.f32.mrb[12].mxu0  ;;  %v728_v22 = vmul.f32 1.442695, %v716_v4  ;;  %v1615_v56 = vmul.f32 0.5, %v1545_v21 }
 0x11e   : > { %v1581_v1 = vpop.eup %1317  ;;  %v600_v5 = vadd.f32 1.0, %v591_v60  ;;  %v1584_v7 = vadd.f32 %v1538_v14, %v555_v0  ;;  %v1224_v8 = vpop.f32.mrb[13].mxu0  ;;  %v583_v12 = vand.u32 2147483647, %v1579_v63  ;;  %v717_v15 = vmul.f32 %v708_v61, %v582_v54 }
 0x11f   : > { %v641_v9 = vmul.f32 %v1571_v50, %v1136_v62  ;;  %v624_v11 = vmul.f32 1.0614054, %v1581_v1  ;;  %vm763_vm9 = vcmp.ge.f32.partialorder %v1579_v63, 0.0 }
 0x120   : > { %1323 = vrcp.f32 %v600_v5  ;;  %v1592_v17 = vmul.f32 0.70710677, %v1584_v7  ;;  %v592_v3 = vmul.f32 0.3275911, %v583_v12  ;;  %v709_v24 = vsub.f32 0.0, %v583_v12 }
 0x121   : > { %v650_v19 = vadd.f32 1.4214138, %v641_v9  ;;  %1325 = vpow2.f32 %v722_v57  ;;  %v1137_v20 = vadd.f32 -1.4531521, %v624_v11  ;;  %v560_v25 = vpop.f32.mrb[14].mxu0 }
 0x122   : > { %1327 = vpow2.f32 %v724_v2  ;;  %v584_v16 = vand.u32 2147483647, %v1592_v17  ;;  %v1595_v26 = vpop.eup %1319  ;;  %v601_v31 = vadd.f32 1.0, %v592_v3  ;;  %v1600_v32 = vadd.f32 %v1538_v14, %v560_v25  ;;  %v1227_v34 = vpop.f32.mrb[15].mxu0 }
 0x123   : > { %v659_v27 = vmul.f32 %v1571_v50, %v650_v19  ;;  %v642_v29 = vmul.f32 %v1581_v1, %v1137_v20  ;;  %v625_v35 = vmul.f32 1.0614054, %v1595_v26  ;;  %v730_v36 = vmul.f32 1.442695, %v717_v15 }
 0x124   : > { %v718_v38 = vmul.f32 %v709_v24, %v583_v12  ;;  %v593_v39 = vmul.f32 0.3275911, %v584_v16  ;;  %1329 = vrcp.f32 %v601_v31  ;;  %v1604_v43 = vmul.f32 0.70710677, %v1600_v32 }
 0x125   : > { %v1145_v40 = vadd.f32 -0.28449672, %v659_v27  ;;  %v651_v41 = vadd.f32 1.4214138, %v642_v29  ;;  %v1138_v45 = vadd.f32 -1.4531521, %v625_v35  ;;  %1331 = vpow2.f32 %v726_v13 }
 0x126   : > { %v1606_v44 = vpop.eup %1321  ;;  %v602_v46 = vadd.f32 1.0, %v593_v39  ;;  %v710_v47 = vsub.f32 0.0, %v584_v16  ;;  %v565_v49 = vpop.f32.mrb[16].mxu0  ;;  %v1612_v54 = vand.u32 2147483647, %v1604_v43  ;;  %1333 = vpow2.f32 %v728_v22 }
 0x127   : > { %v677_v51 = vmul.f32 %v1571_v50, %v1145_v40  ;;  %v660_v52 = vmul.f32 %v1581_v1, %v651_v41  ;;  %v626_v53 = vmul.f32 1.0614054, %v1606_v44  ;;  %v1230_v55 = vpop.f32.mrb[17].mxu0  ;;  %v643_v57 = vmul.f32 %v1595_v26, %v1138_v45 }
 0x128   : > { %v732_v59 = vmul.f32 1.442695, %v718_v38  ;;  %1335 = vrcp.f32 %v602_v46  ;;  %v719_v4 = vmul.f32 %v710_v47, %v584_v16  ;;  %v594_v5 = vmul.f32 0.3275911, %v1612_v54 }
 0x129   : > { %v686_v60 = vadd.f32 0.2548296, %v677_v51  ;;  %v1146_v61 = vadd.f32 -0.28449672, %v660_v52  ;;  %v1139_v62 = vadd.f32 -1.4531521, %v626_v53  ;;  %1337 = vpow2.f32 %v730_v36 }
 0x12a   : > { %v1618_v0 = vpop.eup %1323  ;;  %v652_v2 = vadd.f32 1.4214138, %v643_v57  ;;  %v1628_v19 = vmul.f32 0.5, %v1552_v28  ;;  %1339 = vpow2.f32 %v732_v59  ;;  %v603_v20 = vadd.f32 1.0, %v594_v5 }
 0x12b   : > { %v1326_v8 = vpop.eup %1325  ;;  %v695_v21 = vmul.f32 %v1571_v50, %v686_v60  ;;  %v678_v9 = vmul.f32 %v1581_v1, %v1146_v61  ;;  %v644_v11 = vmul.f32 %v1606_v44, %v1139_v62  ;;  %v627_v12 = vmul.f32 1.0614054, %v1618_v0 }
 0x12c   : > { %v1328_v13 = vpop.eup %1327  ;;  %v661_v15 = vmul.f32 %v1595_v26, %v652_v2  ;;  %v734_v25 = vmul.f32 1.442695, %v719_v4  ;;  %1341 = vrcp.f32 %v603_v20  ;;  %v1632_v27 = vadd.f32 %v1538_v14, %v565_v49 }
 0x12d   : > { %v740_v3 = vmul.f32 %v1326_v8, %v695_v21  ;;  %v687_v22 = vadd.f32 0.2548296, %v678_v9  ;;  %v653_v24 = vadd.f32 1.4214138, %v644_v11  ;;  %v1140_v16 = vadd.f32 -1.4531521, %v627_v12 }
 0x12e   : > { %v1147_v50 = vadd.f32 -0.28449672, %v661_v15  ;;  %v1634_v29 = vpop.eup %1329  ;;  %v711_v40 = vsub.f32 0.0, %v1612_v54  ;;  %v1643_v41 = vmul.f32 0.70710677, %v1632_v27  ;;  %1343 = vpow2.f32 %v734_v25 }
 0x12f   : > { %v749_v31 = vsub.f32 1.0, %v740_v3  ;;  %v696_v28 = vmul.f32 %v1581_v1, %v687_v22  ;;  %v662_v34 = vmul.f32 %v1606_v44, %v653_v24  ;;  %v645_v35 = vmul.f32 %v1618_v0, %v1140_v16  ;;  %v1332_v36 = vpop.eup %1331 }
 0x130   : > { %v679_v38 = vmul.f32 %v1595_v26, %v1147_v50  ;;  %v628_v39 = vmul.f32 1.0614054, %v1634_v29  ;;  %v1334_v49 = vpop.eup %1333  ;;  %v1646_v52 = vand.u32 2147483647, %v1643_v41  ;;  %v720_v18 = vmul.f32 %v711_v40, %v1612_v54 }
 0x131   : > { %v767_v14 = vsub.f32 0.0, %v749_v31  ;;  %v741_v45 = vmul.f32 %v1328_v13, %v696_v28  ;;  %v1148_v46 = vadd.f32 -0.28449672, %v662_v34  ;;  %v654_v47 = vadd.f32 1.4214138, %v645_v35 }
 0x132   : > { %v688_v1 = vadd.f32 0.2548296, %v679_v38  ;;  %v1141_v51 = vadd.f32 -1.4531521, %v628_v39  ;;  %v1648_v53 = vpop.eup %1335  ;;  %v595_v24 = vmul.f32 0.3275911, %v1646_v52 }
 0x133   : > { %v776_v55 = vsel %vm758_vm3, %v749_v31, %v767_v14  ;;  %v750_v57 = vsub.f32 1.0, %v741_v45  ;;  %v680_v59 = vmul.f32 %v1606_v44, %v1148_v46  ;;  %v663_v60 = vmul.f32 %v1618_v0, %v654_v47  ;;  %v1338_v61 = vpop.eup %1337 }
 0x134   : > { %v794_v62 = vadd.f32 1.0, %v776_v55  ;;  %v697_v2 = vmul.f32 %v1595_v26, %v688_v1  ;;  %v646_v4 = vmul.f32 %v1634_v29, %v1141_v51  ;;  %v629_v5 = vmul.f32 1.0614054, %v1648_v53  ;;  %v1340_v11 = vpop.eup %1339 }
 0x135   : > { %v768_v8 = vsub.f32 0.0, %v750_v57  ;;  %v689_v21 = vadd.f32 0.2548296, %v680_v59  ;;  %v1149_v9 = vadd.f32 -0.28449672, %v663_v60  ;;  %v604_v34 = vadd.f32 1.0, %v595_v24 }
 0x136   : > { %v803_v12 = vmul.f32 %v794_v62, %v1587_v10  ;;  %v742_v13 = vmul.f32 %v1332_v36, %v697_v2  ;;  %v655_v15 = vadd.f32 1.4214138, %v646_v4  ;;  %v1142_v20 = vadd.f32 -1.4531521, %v629_v5  ;;  %v1665_v16 = vpop.eup %1341 }
 0x137   : > { %v777_v3 = vsel %vm759_vm5, %v750_v57, %v768_v8  ;;  %v698_v26 = vmul.f32 %v1606_v44, %v689_v21  ;;  %v681_v22 = vmul.f32 %v1618_v0, %v1149_v9  ;;  %v630_v23 = vmul.f32 1.0614054, %v1665_v16 }
 0x138   : > { %v795_v50 = vadd.f32 1.0, %v777_v3  ;;  %v751_v25 = vsub.f32 1.0, %v742_v13  ;;  %v664_v54 = vmul.f32 %v1634_v29, %v655_v15  ;;  %v647_v10 = vmul.f32 %v1648_v53, %v1142_v20  ;;  %1248 = vmatmul.mubr.msk.f32.vlgmr.msra.gmra.mrb[18].mxu0 %vm827_vm4, %v803_v12  ;;  %v1344_v45 = vpop.eup %1343 }
 0x139   : > { %v743_v31 = vmul.f32 %v1334_v49, %v698_v26  ;;  %v690_v28 = vadd.f32 0.2548296, %v681_v22  ;;  %v1143_v14 = vadd.f32 -1.4531521, %v630_v23  ;;  %1345 = vrcp.f32 %v604_v34 }
 0x13a   : > { %v804_v44 = vmul.f32 %v795_v50, %v1615_v56  ;;  %v769_v35 = vsub.f32 0.0, %v751_v25  ;;  %v1150_v36 = vadd.f32 -0.28449672, %v664_v54  ;;  %v656_v38 = vadd.f32 1.4214138, %v647_v10 }
 0x13b   : > { %v752_v39 = vsub.f32 1.0, %v743_v31  ;;  %v699_v40 = vmul.f32 %v1618_v0, %v690_v28  ;;  %v736_v1 = vmul.f32 1.442695, %v720_v18  ;;  %v648_v57 = vmul.f32 %v1665_v16, %v1143_v14 }
 0x13c   : > { %v778_v46 = vsel %vm760_vm6, %v751_v25, %v769_v35  ;;  %v682_v47 = vmul.f32 %v1634_v29, %v1150_v36  ;;  %v665_v49 = vmul.f32 %v1648_v53, %v656_v38  ;;  %1251 = vmatmul.mubr.msk.f32.vlgmr.msra.gmra.mrb[0].mxu1 %vm827_vm4, %v804_v44  ;;  %v712_v37 = vsub.f32 0.0, %v1646_v52 }
 0x13d   : > { %v796_v56 = vadd.f32 1.0, %v778_v46  ;;  %v770_v51 = vsub.f32 0.0, %v752_v39  ;;  %v744_v55 = vmul.f32 %v1338_v61, %v699_v40  ;;  %1253 = vmatprep.mubr.msk.f32.mxu1 %vm1360_vm0, %v1361_v6  ;;  %v657_v4 = vadd.f32 1.4214138, %v648_v57 }
 0x13e   : > { %v691_v0 = vadd.f32 0.2548296, %v682_v47  ;;  %v1151_v59 = vadd.f32 -0.28449672, %v665_v49  ;;  %1347 = vpow2.f32 %v736_v1  ;;  %v789_v13 = vmul.f32 0.5, %v1566_v42 }
 0x13f   : > { %v805_v60 = vmul.f32 %v796_v56, %v1628_v19  ;;  %v779_v62 = vsel %vm761_vm7, %v752_v39, %v770_v51  ;;  %v753_v2 = vsub.f32 1.0, %v744_v55  ;;  %v666_v9 = vmul.f32 %v1665_v16, %v657_v4 }
 0x140   : > { %v797_v5 = vadd.f32 1.0, %v779_v62  ;;  %v700_v8 = vmul.f32 %v1634_v29, %v691_v0  ;;  %v683_v61 = vmul.f32 %v1648_v53, %v1151_v59  ;;  %v721_v24 = vmul.f32 %v712_v37, %v1646_v52 }
 0x141   : > { %v771_v21 = vsub.f32 0.0, %v753_v2  ;;  %1254 = vmatmul.mubr.msk.f32.gmra.mrb[2].mxu1 %vm827_vm4, %v805_v60  ;;  %v1152_v29 = vadd.f32 -0.28449672, %v666_v9  ;;  %v790_v31 = vmul.f32 0.5, %v1576_v58  ;;  %vm764_vm10 = vcmp.ge.f32.partialorder %v1592_v17, 0.0 }
 0x142   : > { %v806_v33 = vmul.f32 %v797_v5, %v788_v30  ;;  %v745_v19 = vmul.f32 %v1340_v11, %v700_v8  ;;  %v692_v18 = vadd.f32 0.2548296, %v683_v61  ;;  %1256 = vmatprep.mubr.msk.f32.mxu1 %vm1360_vm0, %v1361_v6  ;;  %v738_v23 = vmul.f32 1.442695, %v721_v24 }
 0x143   : > { %v780_v12 = vsel %vm762_vm8, %v753_v2, %v771_v21  ;;  %v1346_v26 = vpop.eup %1345  ;;  %v684_v22 = vmul.f32 %v1665_v16, %v1152_v29  ;;  %v791_v58 = vmul.f32 0.5, %v1584_v7  ;;  %vm765_vm11 = vcmp.ge.f32.partialorder %v1604_v43, 0.0  ;;  %v1724_v2 = vld [vmem:[%s1792_s7] ss:$0 sm:$0xff] }
 0x144   : > { %v798_v15 = vadd.f32 1.0, %v780_v12  ;;  %v754_v20 = vsub.f32 1.0, %v745_v19  ;;  %v701_v3 = vmul.f32 %v1648_v53, %v692_v18  ;;  %v631_v25 = vmul.f32 1.0614054, %v1346_v26 }
 0x145   : > { %1257 = vmatmul.mubr.msk.f32.gmra.mrb[4].mxu1 %vm827_vm4, %v806_v33  ;;  %v693_v42 = vadd.f32 0.2548296, %v684_v22  ;;  %1349 = vpow2.f32 %v738_v23  ;;  %v792_v49 = vmul.f32 0.5, %v1600_v32  ;;  %vm766_vm12 = vcmp.ge.f32.partialorder %v1643_v41, 0.0 }
 0x146   : > { %v807_v48 = vmul.f32 %v798_v15, %v789_v13  ;;  %v772_v11 = vsub.f32 0.0, %v754_v20  ;;  %v746_v50 = vmul.f32 %v1344_v45, %v701_v3  ;;  %1259 = vmatprep.mubr.msk.f32.mxu1 %vm1360_vm0, %v1361_v6  ;;  %v1144_v53 = vadd.f32 -1.4531521, %v631_v25 }
 0x147   : > { %v702_v52 = vmul.f32 %v1665_v16, %v693_v42  ;;  %v793_v59 = vmul.f32 0.5, %v1632_v27 }
 0x148   : > { %v781_v54 = vsel %vm763_vm9, %v754_v20, %v772_v11  ;;  %v755_v10 = vsub.f32 1.0, %v746_v50  ;;  %v1348_v34 = vpop.eup %1347  ;;  %v649_v35 = vmul.f32 %v1346_v26, %v1144_v53 }
 0x149   : > { %v799_v28 = vadd.f32 1.0, %v781_v54  ;;  %1260 = vmatmul.mubr.msk.f32.gmra.mrb[6].mxu1 %vm827_vm4, %v807_v48  ;;  %v747_v63 = vmul.f32 %v1348_v34, %v702_v52 }
 0x14a   : > { %v773_v44 = vsub.f32 0.0, %v755_v10  ;;  %1262 = vmatprep.mubr.msk.f32.mxu1 %vm1360_vm0, %v1361_v6  ;;  %v658_v39 = vadd.f32 1.4214138, %v649_v35 }
 0x14b   : > { %v808_v36 = vmul.f32 %v799_v28, %v790_v31  ;;  %v756_v14 = vsub.f32 1.0, %v747_v63 }
 0x14c   : > { %v782_v38 = vsel %vm764_vm10, %v755_v10, %v773_v44  ;;  %v667_v16 = vmul.f32 %v1346_v26, %v658_v39 }
 0x14d   : > { %v800_v40 = vadd.f32 1.0, %v782_v38  ;;  %1263 = vmatmul.mubr.msk.f32.gmra.mrb[8].mxu1 %vm827_vm4, %v808_v36  ;;  %v774_v46 = vsub.f32 0.0, %v756_v14 }
 0x14e   : > { %1265 = vmatprep.mubr.msk.f32.mxu1 %vm1360_vm0, %v1361_v6  ;;  %v1153_v47 = vadd.f32 -0.28449672, %v667_v16 }
 0x14f   : > { %v809_v45 = vmul.f32 %v800_v40, %v791_v58  ;;  %v783_v17 = vsel %vm765_vm11, %v756_v14, %v774_v46  ;;  %v1350_v57 = vpop.eup %1349 }
 0x150   : > { %v801_v7 = vadd.f32 1.0, %v783_v17  ;;  %v685_v1 = vmul.f32 %v1346_v26, %v1153_v47 }
 0x151   : > { %1266 = vmatmul.mubr.msk.f32.gmra.mrb[10].mxu1 %vm827_vm4, %v809_v45 }
 0x152   : > { %1268 = vmatprep.mubr.msk.f32.mxu1 %vm1360_vm0, %v1361_v6  ;;  %v810_v56 = vmul.f32 %v801_v7, %v792_v49  ;;  %v694_v51 = vadd.f32 0.2548296, %v685_v1 }
 0x154   : > { %v703_v55 = vmul.f32 %v1346_v26, %v694_v51 }
 0x155   : > { %1269 = vmatmul.mubr.msk.f32.gmra.mrb[12].mxu1 %vm827_vm4, %v810_v56 }
 0x156   : > { %1271 = vmatprep.mubr.msk.f32.mxu1 %vm1360_vm0, %v1361_v6  ;;  %v748_v43 = vmul.f32 %v1350_v57, %v703_v55 }
 0x158   : > { %v757_v30 = vsub.f32 1.0, %v748_v43 }
 0x15a   : > { %v775_v0 = vsub.f32 0.0, %v757_v30 }
 0x15c   : > { %v784_v32 = vsel %vm766_vm12, %v757_v30, %v775_v0 }
 0x15d   : > { %v802_v60 = vadd.f32 1.0, %v784_v32 }
 0x15f   : > { %v811_v62 = vmul.f32 %v802_v60, %v793_v59 }
 0x161   : > { %1272 = vmatmul.mubr.msk.f32.gmra.mrb[14].mxu1 %vm827_vm4, %v811_v62 }
 0x20b   : > { %v921_v6 = vpop.f32.mrb[18].mxu0 }
 0x20c   : > { %v922_v27 = vadd.f32 %v1724_v2, %v921_v6  ;;  %v1249_v41 = vpop.f32.mrb[19].mxu0 }
 0x20e   : > { %965 = vst.msk [vmem:[%s1731_s16] sm:$0xff] %vm431_vm2, %v922_v27  ;;  %v999_v5 = vmul.f32 %v922_v27, %v922_v27  ;;  %v974_v21 = vsel %vm431_vm2, %v922_v27, 0.0 }
 0x20f   : > { %v926_v4 = vpop.f32.mrb[0].mxu1 }
 0x210   : > { %v927_v8 = vadd.f32 %v1724_v2, %v926_v4  ;;  %v1252_v61 = vpop.f32.mrb[1].mxu1  ;;  %v1008_v19 = vsel %vm431_vm2, %v999_v5, 0.0 }
 0x212   : > { %966 = vst.msk [vmem:[%s1731_s16 + $0x8] sm:$0xff] %vm431_vm2, %v927_v8  ;;  %v975_v9 = vsel %vm431_vm2, %v927_v8, 0.0  ;;  %v1000_v37 = vmul.f32 %v927_v8, %v927_v8 }
 0x213   : > { %v976_v33 = vadd.f32 %v975_v9, %v974_v21 }
 0x214   : > { %v1009_v18 = vsel %vm431_vm2, %v1000_v37, 0.0  ;;  %v931_v12 = vpop.f32.mrb[2].mxu1 }
 0x215   : > { %v1010_v29 = vadd.f32 %v1009_v18, %v1008_v19  ;;  %v932_v13 = vadd.f32 %v1724_v2, %v931_v12  ;;  %v1255_v15 = vpop.f32.mrb[3].mxu1 }
 0x217   : > { %967 = vst.msk [vmem:[%s1731_s16 + $0x10] sm:$0xff] %vm431_vm2, %v932_v13  ;;  %v977_v20 = vsel %vm431_vm2, %v932_v13, 0.0  ;;  %v1001_v3 = vmul.f32 %v932_v13, %v932_v13 }
 0x218   : > { %v978_v26 = vadd.f32 %v977_v20, %v976_v33  ;;  %v936_v22 = vpop.f32.mrb[4].mxu1 }
 0x219   : > { %v1011_v24 = vsel %vm431_vm2, %v1001_v3, 0.0  ;;  %v937_v48 = vadd.f32 %v1724_v2, %v936_v22  ;;  %v1258_v11 = vpop.f32.mrb[5].mxu1 }
 0x21a   : > { %v1012_v50 = vadd.f32 %v1011_v24, %v1010_v29 }
 0x21b   : > { %968 = vst.msk [vmem:[%s1731_s16 + $0x18] sm:$0xff] %vm431_vm2, %v937_v48  ;;  %v979_v25 = vsel %vm431_vm2, %v937_v48, 0.0  ;;  %v1002_v42 = vmul.f32 %v937_v48, %v937_v48 }
 0x21c   : > { %v980_v54 = vadd.f32 %v979_v25, %v978_v26  ;;  %v941_v10 = vpop.f32.mrb[6].mxu1 }
 0x21d   : > { %v1013_v53 = vsel %vm431_vm2, %v1002_v42, 0.0  ;;  %v942_v31 = vadd.f32 %v1724_v2, %v941_v10  ;;  %v1261_v28 = vpop.f32.mrb[7].mxu1 }
 0x21e   : > { %v1014_v52 = vadd.f32 %v1013_v53, %v1012_v50 }
 0x21f   : > { %969 = vst.msk [vmem:[%s1731_s16 + $0x20] sm:$0xff] %vm431_vm2, %v942_v31  ;;  %v981_v23 = vsel %vm431_vm2, %v942_v31, 0.0  ;;  %v1003_v34 = vmul.f32 %v942_v31, %v942_v31 }
 0x220   : > { %v982_v44 = vadd.f32 %v981_v23, %v980_v54  ;;  %v946_v35 = vpop.f32.mrb[8].mxu1 }
 0x221   : > { %v1015_v36 = vsel %vm431_vm2, %v1003_v34, 0.0  ;;  %v947_v63 = vadd.f32 %v1724_v2, %v946_v35  ;;  %v1264_v38 = vpop.f32.mrb[9].mxu1 }
 0x222   : > { %v1016_v39 = vadd.f32 %v1015_v36, %v1014_v52 }
 0x223   : > { %970 = vst.msk [vmem:[%s1731_s16 + $0x28] sm:$0xff] %vm431_vm2, %v947_v63  ;;  %v983_v58 = vsel %vm431_vm2, %v947_v63, 0.0  ;;  %v1004_v40 = vmul.f32 %v947_v63, %v947_v63 }
 0x224   : > { %v984_v14 = vadd.f32 %v983_v58, %v982_v44  ;;  %v951_v16 = vpop.f32.mrb[10].mxu1 }
 0x225   : > { %v1017_v45 = vsel %vm431_vm2, %v1004_v40, 0.0  ;;  %v952_v46 = vadd.f32 %v1724_v2, %v951_v16  ;;  %v1267_v47 = vpop.f32.mrb[11].mxu1 }
 0x226   : > { %v1018_v17 = vadd.f32 %v1017_v45, %v1016_v39 }
 0x227   : > { %971 = vst.msk [vmem:[%s1731_s16 + $0x30] sm:$0xff] %vm431_vm2, %v952_v46  ;;  %v985_v49 = vsel %vm431_vm2, %v952_v46, 0.0  ;;  %v1005_v7 = vmul.f32 %v952_v46, %v952_v46 }
 0x228   : > { %v986_v1 = vadd.f32 %v985_v49, %v984_v14  ;;  %v956_v51 = vpop.f32.mrb[12].mxu1 }
 0x229   : > { %v1019_v56 = vsel %vm431_vm2, %v1005_v7, 0.0  ;;  %v957_v57 = vadd.f32 %v1724_v2, %v956_v51  ;;  %v1270_v43 = vpop.f32.mrb[13].mxu1 }
 0x22a   : > { %v1020_v55 = vadd.f32 %v1019_v56, %v1018_v17 }
 0x22b   : > { %972 = vst.msk [vmem:[%s1731_s16 + $0x38] sm:$0xff] %vm431_vm2, %v957_v57  ;;  %v987_v30 = vsel %vm431_vm2, %v957_v57, 0.0  ;;  %v1006_v0 = vmul.f32 %v957_v57, %v957_v57 }
 0x22c   : > { %v988_v32 = vadd.f32 %v987_v30, %v986_v1 }
 0x22d   : > { %v1021_v59 = vsel %vm431_vm2, %v1006_v0, 0.0 }
 0x22e   : > { %v1022_v60 = vadd.f32 %v1021_v59, %v1020_v55 }
 0x234   : > { %v961_v62 = vpop.f32.mrb[14].mxu1 }
 0x235   : > { %v962_v6 = vadd.f32 %v1724_v2, %v961_v62  ;;  %v1273_v27 = vpop.f32.mrb[15].mxu1 }
 0x237   : > { %973 = vst.msk [vmem:[%s1731_s16 + $0x40] sm:$0x3] %vm346_vm1, %v962_v6  ;;  %v989_v41 = vsel %vm346_vm1, %v962_v6, 0.0  ;;  %v1007_v4 = vmul.f32 %v962_v6, %v962_v6 }
 0x238   : > { %v990_v5 = vadd.f32 %v989_v41, %v988_v32 }
 0x239   : > { %v1023_v8 = vsel %vm346_vm1, %v1007_v4, 0.0 }
 0x23a   : > { %v991_v61 = vrot.slane %v990_v5, 4  ;;  %v1024_v21 = vadd.f32 %v1023_v8, %v1022_v60 }
 0x23c   : > { %v992_v9 = vadd.f32 %v991_v61, %v990_v5  ;;  %v1025_v37 = vrot.slane %v1024_v21, 4 }
 0x23e   : > { %v993_v33 = vrot.slane %v992_v9, 2  ;;  %v1026_v19 = vadd.f32 %v1025_v37, %v1024_v21 }
 0x240   : > { %v994_v18 = vadd.f32 %v993_v33, %v992_v9  ;;  %v1027_v12 = vrot.slane %v1026_v19, 2 }
 0x242   : > { %v995_v29 = vrot.slane %v994_v18, 1  ;;  %v1028_v2 = vadd.f32 %v1027_v12, %v1026_v19 }
 0x244   : > { %v996_v13 = vadd.f32 %v995_v29, %v994_v18  ;;  %v1029_v15 = vrot.slane %v1028_v2, 1 }
 0x246   : > { %998 = vst.msk [vmem:[%s343_s19] sm:$0x1] %vm997_vm13, %v996_v13  ;;  %v1030_v20 = vadd.f32 %v1029_v15, %v1028_v2 }
 0x248   : > { %1031 = vst.msk [vmem:[%s343_s19 + $0x1] sm:$0x1] %vm997_vm13, %v1030_v20 }
 0x249 PF: > { %s20_s30 = sadd.s32 1, %s1357_s30  }
 0x24a   : > { %p17_p4 = scmp.ge.s32.totalorder %s20_s30, 4  }
 0x24c   :  { %19 = sbr.rel (!%p17_p4) target bundleno = 1 (0x1), region = 94 }

// kernel: deep_attention_token.3
= control target key start
LH: loop header
LB: loop body
LE: loop exit
PB: predicated region body
PF: predicated region fallthrough
CT: control target
= control target key end

     0   :  { %s6241_s30 = smov 0   ;;  %s7813_s0 = inlined_call_operand.vmem [shape: f32[2,1,32], index: 0, kind: input, shape index: {}]   ;;  %s7814_s1 = inlined_call_operand.vmem [shape: f32[2,1,32], index: 1, kind: input, shape index: {}]   ;;  %s7815_s2 = inlined_call_operand.vmem [shape: f32[2,32,64], index: 2, kind: input, shape index: {}]   ;;  %s7816_s3 = inlined_call_operand.vmem [shape: f32[4,32,16], index: 3, kind: input, shape index: {}]   ;;  %s7817_s4 = inlined_call_operand.vmem [shape: f32[4,32,16], index: 4, kind: input, shape index: {}]   ;;  %s7818_s5 = inlined_call_operand.vmem [shape: f32[4,32,16], index: 5, kind: input, shape index: {}]   ;;  %s7819_s6 = inlined_call_operand.vmem [shape: f32[4,16,32], index: 6, kind: input, shape index: {}]   ;;  %s7820_s7 = inlined_call_operand.vmem [shape: f32[1,32], index: 7, kind: input, shape index: {}]   ;;  %s7821_s8 = inlined_call_operand.vmem [shape: f32[2,66,32], index: 8, kind: output, shape index: {0}]   ;;  %s7822_s9 = inlined_call_operand.vmem [shape: f32[2,2,32], index: 9, kind: output, shape index: {1}]  }
   0x1 LB: > { %s4251_s10 = sadd.s32 4294967295, %s6186_s30   ;;  %p4255_p0 = scmp.ge.s32.totalorder %s6186_s30, 1  ;;  %s6186_s30 = sphi %s6241_s30, %s20_s30  }
   0x2   : > { %p306_p1 = scmp.lt.s32.totalorder %s6186_s30, 3 }
   0x4   : > { %p307_p2 = pnand %p4255_p0, %p306_p1 }
   0x5   : > { %p352_p3 = scmp.lt.s32.totalorder (!%p307_p2), %s4251_s10, 1  ;;  %vm418_vm0 = vcmask (!%p307_p2), 253952   ;;  %v431_v4 = vld [vmem:[%s7816_s3] sm:$0xff] (!%p307_p2)  ;;  %v6188_v5 = vmov (!%p307_p2), 0.0|0.0   ;;  %v432_v6 = vld [vmem:[%s7816_s3 + $0x8] sm:$0xff] (!%p307_p2)  ;;  %v433_v11 = vld [vmem:[%s7816_s3 + $0x10] sm:$0xff] (!%p307_p2) }
   0x6   : > { %310 = sbr.rel (%p307_p2) target bundleno = 4241 (0x1091), region = 52  ;;  %5810 = vmatprep.subr.bf16.mxu0 (!%p307_p2), %v6188_v5  ;;  %5816 = vmatprep.subr.bf16.mxu1 (!%p307_p2), %v6188_v5  ;;  %v581_v7 = vld [vmem:[%s7817_s4] sm:$0xff] (!%p307_p2)  ;;  %v582_v8 = vld [vmem:[%s7817_s4 + $0x8] sm:$0xff] (!%p307_p2)  ;;  %v5811_v9 = vpack.c.bf16 (!%p307_p2), %v432_v6, %v431_v4  ;;  %v434_v12 = vld [vmem:[%s7816_s3 + $0x18] sm:$0xff] (!%p307_p2)  ;;  %vm6189_vm1 = vmmov (!%p307_p2), 0   ;;  %v6190_v19 = vmov (!%p307_p2), 0.0  }
   0x7   : > { %v5817_v10 = vpack.c.bf16 (!%p307_p2), %v582_v8, %v581_v7  ;;  %v583_v13 = vld [vmem:[%s7817_s4 + $0x10] sm:$0xff] (!%p307_p2)  ;;  %v5814_v14 = vpack.c.bf16 (!%p307_p2), %v434_v12, %v433_v11  ;;  %v584_v15 = vld [vmem:[%s7817_s4 + $0x18] sm:$0xff] (!%p307_p2)  ;;  %4914 = vmatprep.mubr.msk.f32.mxu0 (!%p307_p2), %vm6189_vm1, %v6190_v19  ;;  %4949 = vmatprep.mubr.msk.f32.mxu1 (!%p307_p2), %vm6189_vm1, %v6190_v19  ;;  %vm408_vm2 = vcmask (!%p307_p2), 261120   ;;  %v695_v22 = vld [vmem:[%s7818_s5] sm:$0xff] (!%p307_p2)  ;;  %vm809_vm3 = vcmask (!%p307_p2), 130048  }
   0x8   : > { %5812 = vmatpush3.bf16.msra.mxu0 (!%p307_p2), %v5811_v9  ;;  %v5820_v17 = vpack.c.bf16 (!%p307_p2), %v584_v15, %v583_v13  ;;  %v696_v23 = vld [vmem:[%s7818_s5 + $0x8] sm:$0xff] (!%p307_p2)  ;;  %v697_v27 = vld [vmem:[%s7818_s5 + $0x10] sm:$0xff] (!%p307_p2)  ;;  %v698_v28 = vld [vmem:[%s7818_s5 + $0x18] sm:$0xff] (!%p307_p2)  ;;  %vm974_vm5 = vcmask (!%p307_p2), 539648   ;;  %vm999_vm6 = vcmask (!%p307_p2), 533504   ;;  %vm1102_vm7 = vcmask (!%p307_p2), 1041408  }
   0x9   : > { %5818 = vmatpush3.bf16.msra.mxu1 (!%p307_p2), %v5817_v10  ;;  %5813 = vmatprep.subr.bf16.mxu0 (!%p307_p2), %v6188_v5  ;;  %v5823_v24 = vpack.c.bf16 (!%p307_p2), %v696_v23, %v695_v22  ;;  %v5826_v29 = vpack.c.bf16 (!%p307_p2), %v698_v28, %v697_v27  ;;  %vm6455_vm4 = vmpackc.low (!%p307_p2), %vm809_vm3, %vm809_vm3  ;;  %vm4088_vm8 = vcmask (!%p307_p2), 254976  }
   0xa   : > { %5819 = vmatprep.subr.bf16.mxu1 (!%p307_p2), %v6188_v5 }
   0xc   : > { %5815 = vmatpush3.bf16.msra.mxu0 (!%p307_p2), %v5814_v14 }
   0xd   : > { %s7826_s10 = smov (!%p352_p3, %s4251_s10), 1  ;;  %5821 = vmatpush3.bf16.msra.mxu1 %v5820_v17  ;;  %5822 = vmatprep.subr.bf16.mxu0 %v6188_v5 }
   0xe   : > { %s4561_s11 = sshll.u32 %s7826_s10, 5  ;;  %s354_s14 = scalar_lea.vmem %s7813_s0, %s7826_s10  ;;  %5828 = vmatprep.subr.bf16.mxu1 %v6188_v5 }
   0xf   : > { %s6259_s17 = scalar_lea.vmem %s7815_s2, %s4561_s11  ;;  %s357_s20 = scalar_lea.vmem %s7814_s1, %s7826_s10  ;;  %v417_v0 = vld [vmem:[%s354_s14] sm:$0x1] }
  0x10   : > { %v372_v1 = vld [vmem:[%s6259_s17] sm:$0xff]  ;;  %419 = vst.msk [vmem:[#allocation2 + $0x40] sm:$0x1] %vm418_vm0, %v417_v0  ;;  %v373_v3 = vld [vmem:[%s6259_s17 + $0x8] sm:$0xff]  ;;  %v374_v16 = vld [vmem:[%s6259_s17 + $0x10] sm:$0xff]  ;;  %s6006_s19 = smul.u32 72, %s7826_s10 }
  0x11   : > { %v420_v2 = vld [vmem:[%s357_s20] sm:$0x1]  ;;  %376 = vxpose.xlu0.b32.start [1/4] (short) (narrow) %v372_v1, 64  ;;  %v375_v18 = vld [vmem:[%s6259_s17 + $0x18] sm:$0xff]  ;;  %s4259_s25 = sshll.u32 %s7826_s10, 1 }
  0x12   : > { %421 = vst.msk [vmem:[#allocation2 + $0x41] sm:$0x1] %vm418_vm0, %v420_v2  ;;  %s7752_s24 = scalar_lea.vmem %s7821_s8, %s6006_s19  ;;  %s371_s28 = scalar_lea.vmem %s7822_s9, %s4259_s25 }
  0x15   : > { %377 = vxpose.xlu0.b32.cont [2/4] (short) (narrow) %v373_v3, 64 }
  0x19   : > { %378 = vxpose.xlu0.b32.cont [3/4] (short) (narrow) %v374_v16, 64  ;;  %v6405_v42 = vld [vmem:[#allocation2 + $0x40] sm:$0x3] }
  0x1d   : > { %379 = vxpose.xlu0.b32.end [4/4] (short) (narrow) %v375_v18, 64 }
  0x91   : > { %v392_v20 = vpop.trf.xlu0 }
  0x92   : > { %409 = vst.msk [vmem:[#allocation2] sm:$0xff] %vm408_vm2, %v392_v20 }
  0x95   : > { %v393_v21 = vpop.trf.xlu0 }
  0x96   : > { %410 = vst.msk [vmem:[#allocation2 + $0x8] sm:$0xff] %vm408_vm2, %v393_v21 }
  0x99   : > { %v6313_v25 = vld [vmem:[#allocation2] sm:$0xff]  ;;  %v394_v26 = vpop.trf.xlu0 }
  0x9a   : > { %411 = vst.msk [vmem:[#allocation2 + $0x10] sm:$0xff] %vm408_vm2, %v394_v26  ;;  %4915 = vmatmul.mubr.msk.f32.vlgmr.msra.gmra.mrb[0].mxu0 %vm408_vm2, %v6313_v25  ;;  %4950 = vmatmul.mubr.msk.f32.vlgmr.msra.gmra.mrb[0].mxu1 %vm408_vm2, %v6313_v25  ;;  %v4316_v26 = vld [vmem:[%s7816_s3 + $0x28] sm:$0xff] }
  0x9b   : > { %4917 = vmatprep.mubr.msk.f32.mxu0 %vm6189_vm1, %v6190_v19  ;;  %4952 = vmatprep.mubr.msk.f32.mxu1 %vm6189_vm1, %v6190_v19 }
  0x9c   : > { %5824 = vmatpush3.bf16.msra.mxu0 %v5823_v24  ;;  %v4315_v24 = vld [vmem:[%s7816_s3 + $0x20] sm:$0xff] }
  0x9d   : > { %v6330_v30 = vld [vmem:[#allocation2 + $0x8] sm:$0xff]  ;;  %v395_v31 = vpop.trf.xlu0  ;;  %5825 = vmatprep.subr.bf16.mxu0 %v6188_v5 }
  0x9e   : > { %412 = vst.msk [vmem:[#allocation2 + $0x18] sm:$0xff] %vm408_vm2, %v395_v31  ;;  %4918 = vmatmul.mubr.msk.f32.gmra.mrb[2].mxu0 %vm408_vm2, %v6330_v30  ;;  %4953 = vmatmul.mubr.msk.f32.gmra.mrb[2].mxu1 %vm408_vm2, %v6330_v30 }
  0x9f   : > { %4920 = vmatprep.mubr.msk.f32.mxu0 %vm6189_vm1, %v6190_v19  ;;  %4955 = vmatprep.mubr.msk.f32.mxu1 %vm6189_vm1, %v6190_v19 }
  0xa0   : > { %5827 = vmatpush3.bf16.msra.mxu0 %v5826_v29  ;;  %v5857_v29 = vpack.c.bf16 %v4316_v26, %v4315_v24 }
  0xa1   : > { %v6342_v32 = vld [vmem:[#allocation2 + $0x10] sm:$0xff]  ;;  %v396_v33 = vpop.trf.xlu0  ;;  %5844 = vmatprep.subr.bf16.mxu0 %v6188_v5 }
  0xa2   : > { %413 = vst.msk [vmem:[#allocation2 + $0x20] sm:$0xff] %vm408_vm2, %v396_v33  ;;  %4921 = vmatmul.mubr.msk.f32.gmra.mrb[4].mxu0 %vm408_vm2, %v6342_v32  ;;  %4956 = vmatmul.mubr.msk.f32.gmra.mrb[4].mxu1 %vm408_vm2, %v6342_v32 }
  0xa3   : > { %4923 = vmatprep.mubr.msk.f32.mxu0 %vm6189_vm1, %v6190_v19  ;;  %4958 = vmatprep.mubr.msk.f32.mxu1 %vm6189_vm1, %v6190_v19 }
  0xa5   : > { %v6354_v34 = vld [vmem:[#allocation2 + $0x18] sm:$0xff]  ;;  %v397_v35 = vpop.trf.xlu0 }
  0xa6   : > { %414 = vst.msk [vmem:[#allocation2 + $0x28] sm:$0xff] %vm408_vm2, %v397_v35  ;;  %4924 = vmatmul.mubr.msk.f32.gmra.mrb[6].mxu0 %vm408_vm2, %v6354_v34  ;;  %4959 = vmatmul.mubr.msk.f32.gmra.mrb[6].mxu1 %vm408_vm2, %v6354_v34  ;;  %v4317_v35 = vld [vmem:[%s7816_s3 + $0x30] sm:$0xff] }
  0xa7   : > { %4926 = vmatprep.mubr.msk.f32.mxu0 %vm6189_vm1, %v6190_v19  ;;  %4961 = vmatprep.mubr.msk.f32.mxu1 %vm6189_vm1, %v6190_v19 }
  0xa9   : > { %v6365_v36 = vld [vmem:[#allocation2 + $0x20] sm:$0xff]  ;;  %v398_v37 = vpop.trf.xlu0 }
  0xaa   : > { %415 = vst.msk [vmem:[#allocation2 + $0x30] sm:$0xff] %vm408_vm2, %v398_v37  ;;  %4927 = vmatmul.mubr.msk.f32.gmra.mrb[8].mxu0 %vm408_vm2, %v6365_v36  ;;  %4962 = vmatmul.mubr.msk.f32.gmra.mrb[8].mxu1 %vm408_vm2, %v6365_v36  ;;  %v4318_v37 = vld [vmem:[%s7816_s3 + $0x38] sm:$0xff] }
  0xab   : > { %4929 = vmatprep.mubr.msk.f32.mxu0 %vm6189_vm1, %v6190_v19  ;;  %4964 = vmatprep.mubr.msk.f32.mxu1 %vm6189_vm1, %v6190_v19 }
  0xad   : > { %v6376_v38 = vld [vmem:[#allocation2 + $0x28] sm:$0xff]  ;;  %v399_v39 = vpop.trf.xlu0 }
  0xae   : > { %416 = vst.msk [vmem:[#allocation2 + $0x38] sm:$0xff] %vm408_vm2, %v399_v39  ;;  %4930 = vmatmul.mubr.msk.f32.gmra.mrb[10].mxu0 %vm408_vm2, %v6376_v38  ;;  %4965 = vmatmul.mubr.msk.f32.gmra.mrb[10].mxu1 %vm408_vm2, %v6376_v38 }
  0xaf   : > { %4932 = vmatprep.mubr.msk.f32.mxu0 %vm6189_vm1, %v6190_v19  ;;  %4967 = vmatprep.mubr.msk.f32.mxu1 %vm6189_vm1, %v6190_v19 }
  0xb1   : > { %v6387_v40 = vld [vmem:[#allocation2 + $0x30] sm:$0xff] }
  0xb2   : > { %4933 = vmatmul.mubr.msk.f32.gmra.mrb[12].mxu0 %vm408_vm2, %v6387_v40  ;;  %4968 = vmatmul.mubr.msk.f32.gmra.mrb[12].mxu1 %vm408_vm2, %v6387_v40 }
  0xb3   : > { %4935 = vmatprep.mubr.msk.f32.mxu0 %vm6189_vm1, %v6190_v19  ;;  %4970 = vmatprep.mubr.msk.f32.mxu1 %vm6189_vm1, %v6190_v19 }
  0xb5   : > { %v6397_v41 = vld [vmem:[#allocation2 + $0x38] sm:$0xff] }
  0xb6   : > { %4936 = vmatmul.mubr.msk.f32.gmra.mrb[14].mxu0 %vm408_vm2, %v6397_v41  ;;  %4971 = vmatmul.mubr.msk.f32.gmra.mrb[14].mxu1 %vm408_vm2, %v6397_v41 }
  0xb7   : > { %4938 = vmatprep.mubr.msk.f32.mxu0 %vm6189_vm1, %v6190_v19  ;;  %4973 = vmatprep.mubr.msk.f32.mxu1 %vm6189_vm1, %v6190_v19 }
  0xba   : > { %4939 = vmatmul.mubr.msk.f32.gmra.mrb[16].mxu0 %vm408_vm2, %v6405_v42  ;;  %4974 = vmatmul.mubr.msk.f32.gmra.mrb[16].mxu1 %vm408_vm2, %v6405_v42 }
  0xbb   : > { %4984 = vmatprep.mubr.msk.f32.mxu0 %vm6189_vm1, %v6190_v19  ;;  %5029 = vmatprep.mubr.msk.f32.mxu1 %vm6189_vm1, %v6190_v19 }
  0xbe   : > { %4985 = vmatmul.mubr.msk.f32.vlgmr.msra.gmra.mrb[18].mxu0 %vm408_vm2, %v6313_v25 }
  0xbf   : > { %4987 = vmatprep.mubr.msk.f32.mxu0 %vm6189_vm1, %v6190_v19 }
  0xc2   : > { %4988 = vmatmul.mubr.msk.f32.gmra.mrb[20].mxu0 %vm408_vm2, %v6330_v30 }
  0xc3   : > { %4990 = vmatprep.mubr.msk.f32.mxu0 %vm6189_vm1, %v6190_v19 }
  0xc6   : > { %4991 = vmatmul.mubr.msk.f32.gmra.mrb[22].mxu0 %vm408_vm2, %v6342_v32 }
  0xc7   : > { %4993 = vmatprep.mubr.msk.f32.mxu0 %vm6189_vm1, %v6190_v19 }
  0xca   : > { %4994 = vmatmul.mubr.msk.f32.gmra.mrb[24].mxu0 %vm408_vm2, %v6354_v34 }
  0xcb   : > { %4996 = vmatprep.mubr.msk.f32.mxu0 %vm6189_vm1, %v6190_v19 }
  0xce   : > { %4997 = vmatmul.mubr.msk.f32.gmra.mrb[26].mxu0 %vm408_vm2, %v6365_v36 }
  0xcf   : > { %4999 = vmatprep.mubr.msk.f32.mxu0 %vm6189_vm1, %v6190_v19 }
  0xd2   : > { %5000 = vmatmul.mubr.msk.f32.gmra.mrb[28].mxu0 %vm408_vm2, %v6376_v38 }
  0xd3   : > { %5002 = vmatprep.mubr.msk.f32.mxu0 %vm6189_vm1, %v6190_v19 }
  0xd6   : > { %5003 = vmatmul.mubr.msk.f32.gmra.mrb[30].mxu0 %vm408_vm2, %v6387_v40 }
  0xd7   : > { %5005 = vmatprep.mubr.msk.f32.mxu0 %vm6189_vm1, %v6190_v19 }
  0xda   : > { %5006 = vmatmul.mubr.msk.f32.gmra.mrb[32].mxu0 %vm408_vm2, %v6397_v41 }
  0xdb   : > { %5008 = vmatprep.mubr.msk.f32.mxu0 %vm6189_vm1, %v6190_v19 }
  0xde   : > { %5009 = vmatmul.mubr.msk.f32.gmra.mrb[34].mxu0 %vm408_vm2, %v6405_v42 }
  0xdf   : > { %5074 = vmatprep.mubr.msk.f32.mxu0 %vm6189_vm1, %v6190_v19 }
 0x16d   : > { %v528_v43 = vpop.f32.mrb[0].mxu0  ;;  %v651_v44 = vpop.f32.mrb[0].mxu1 }
 0x16e   : > { %v4916_v45 = vpop.f32.mrb[1].mxu0  ;;  %v4951_v46 = vpop.f32.mrb[1].mxu1  ;;  %v572_v27 = vmul.f32 0.25, %v528_v43 }
 0x171   : > { %v533_v47 = vpop.f32.mrb[2].mxu0  ;;  %v656_v48 = vpop.f32.mrb[2].mxu1 }
 0x172   : > { %v5829_v50 = vpack.c.bf16 %v656_v48, %v651_v44  ;;  %v4919_v51 = vpop.f32.mrb[3].mxu0  ;;  %v4954_v52 = vpop.f32.mrb[3].mxu1  ;;  %v573_v39 = vmul.f32 0.25, %v533_v47  ;;  %v5860_v44 = vpack.c.bf16 %v4318_v37, %v4317_v35 }
 0x174   : > { %5831 = vmatpush3.bf16.xpose.msk.msra.mxu1 %vm6455_vm4, %v5829_v50 }
 0x175   : > { %v6461_v53 = vpop.f32.mrb[4].mxu0  ;;  %v661_v54 = vpop.f32.mrb[4].mxu1  ;;  %5832 = vmatprep.subr.bf16.mxu1 %v6188_v5 }
 0x176   : > { %v4922_v55 = vpop.f32.mrb[5].mxu0  ;;  %v4957_v56 = vpop.f32.mrb[5].mxu1  ;;  %v574_v46 = vmul.f32 0.25, %v6461_v53 }
 0x179   : > { %v6464_v57 = vpop.f32.mrb[6].mxu0  ;;  %v666_v58 = vpop.f32.mrb[6].mxu1 }
 0x17a   : > { %v5833_v59 = vpack.c.bf16 %v666_v58, %v661_v54  ;;  %v4925_v60 = vpop.f32.mrb[7].mxu0  ;;  %v4960_v61 = vpop.f32.mrb[7].mxu1  ;;  %v575_v47 = vmul.f32 0.25, %v6464_v57 }
 0x17c   : > { %5835 = vmatpush3.bf16.xpose.msk.msra.mxu1 %vm6455_vm4, %v5833_v59 }
 0x17d   : > { %v6468_v62 = vpop.f32.mrb[8].mxu0  ;;  %v671_v63 = vpop.f32.mrb[8].mxu1  ;;  %5836 = vmatprep.subr.bf16.mxu1 %v6188_v5 }
 0x17e   : > { %v4928_v0 = vpop.f32.mrb[9].mxu0  ;;  %v4963_v1 = vpop.f32.mrb[9].mxu1  ;;  %v576_v53 = vmul.f32 0.25, %v6468_v62 }
 0x181   : > { %v6471_v2 = vpop.f32.mrb[10].mxu0  ;;  %v676_v3 = vpop.f32.mrb[10].mxu1 }
 0x182   : > { %v5837_v4 = vpack.c.bf16 %v676_v3, %v671_v63  ;;  %v4931_v6 = vpop.f32.mrb[11].mxu0  ;;  %v4966_v7 = vpop.f32.mrb[11].mxu1  ;;  %v577_v57 = vmul.f32 0.25, %v6471_v2  ;;  %v4341_v3 = vld [vmem:[%s7818_s5 + $0x20] sm:$0xff] }
 0x183   : > { %v4343_v7 = vld [vmem:[%s7818_s5 + $0x30] sm:$0xff] }
 0x184   : > { %5839 = vmatpush3.bf16.xpose.msk.msra.mxu1 %vm6455_vm4, %v5837_v4  ;;  %v4342_v4 = vld [vmem:[%s7818_s5 + $0x28] sm:$0xff] }
 0x185   : > { %v6475_v8 = vpop.f32.mrb[12].mxu0  ;;  %v681_v9 = vpop.f32.mrb[12].mxu1  ;;  %5840 = vmatprep.subr.bf16.mxu1 %v6188_v5  ;;  %v5869_v6 = vpack.c.bf16 %v4342_v4, %v4341_v3 }
 0x186   : > { %v4934_v10 = vpop.f32.mrb[13].mxu0  ;;  %v4969_v11 = vpop.f32.mrb[13].mxu1  ;;  %v578_v61 = vmul.f32 0.25, %v6475_v8  ;;  %v4344_v8 = vld [vmem:[%s7818_s5 + $0x38] sm:$0xff] }
 0x189   : > { %v6478_v12 = vpop.f32.mrb[14].mxu0  ;;  %v686_v13 = vpop.f32.mrb[14].mxu1 }
 0x18a   : > { %v5841_v14 = vpack.c.bf16 %v686_v13, %v681_v9  ;;  %v4937_v15 = vpop.f32.mrb[15].mxu0  ;;  %v4972_v16 = vpop.f32.mrb[15].mxu1  ;;  %v579_v1 = vmul.f32 0.25, %v6478_v12  ;;  %v5872_v9 = vpack.c.bf16 %v4344_v8, %v4343_v7 }
 0x18c   : > { %5843 = vmatpush3.bf16.xpose.msk.msra.mxu1 %vm6455_vm4, %v5841_v14 }
 0x18d   : > { %v6482_v17 = vpop.f32.mrb[16].mxu0  ;;  %v691_v18 = vpop.f32.mrb[16].mxu1  ;;  %5027 = vmatprep.subr.mxu1 %v6190_v19 }
 0x18e   : > { %v4940_v20 = vpop.f32.mrb[17].mxu0  ;;  %v4975_v21 = vpop.f32.mrb[17].mxu1  ;;  %v580_v2 = vmul.f32 0.25, %v6482_v17 }
 0x191   : > { %v765_v22 = vpop.f32.mrb[18].mxu0 }
 0x192   : > { %v4986_v23 = vpop.f32.mrb[19].mxu0 }
 0x194   : > { %5028 = vmatpush3.xpose.msk.msra.mxu1 %vm809_vm3, %v691_v18 }
 0x195   : > { %v770_v28 = vpop.f32.mrb[20].mxu0  ;;  %5856 = vmatprep.subr.bf16.mxu1 %v6188_v5 }
 0x196   : > { %v5845_v31 = vpack.c.bf16 %v770_v28, %v765_v22  ;;  %v4989_v33 = vpop.f32.mrb[21].mxu0 }
 0x197   : > { %5030 = vmatmul.mubr.msk.f32.vlgmr.msra.gmra.mrb[18].mxu1 %vm809_vm3, %v572_v27 }
 0x198   : > { %5846 = vmatpush3.bf16.msra.mxu0 %v5845_v31  ;;  %5032 = vmatprep.mubr.msk.f32.mxu1 %vm6189_vm1, %v6190_v19 }
 0x199   : > { %v775_v43 = vpop.f32.mrb[22].mxu0  ;;  %5847 = vmatprep.subr.bf16.mxu0 %v6188_v5  ;;  %5858 = vmatpush3.bf16.msra.mxu1 %v5857_v29 }
 0x19a   : > { %v4992_v45 = vpop.f32.mrb[23].mxu0  ;;  %5859 = vmatprep.subr.bf16.mxu1 %v6188_v5 }
 0x19b   : > { %5033 = vmatmul.mubr.msk.f32.gmra.mrb[20].mxu1 %vm809_vm3, %v573_v39 }
 0x19c   : > { %5035 = vmatprep.mubr.msk.f32.mxu1 %vm6189_vm1, %v6190_v19 }
 0x19d   : > { %v780_v48 = vpop.f32.mrb[24].mxu0  ;;  %5861 = vmatpush3.bf16.msra.mxu1 %v5860_v44 }
 0x19e   : > { %v5848_v50 = vpack.c.bf16 %v780_v48, %v775_v43  ;;  %v4995_v51 = vpop.f32.mrb[25].mxu0  ;;  %5868 = vmatprep.subr.bf16.mxu1 %v6188_v5 }
 0x19f   : > { %5036 = vmatmul.mubr.msk.f32.gmra.mrb[22].mxu1 %vm809_vm3, %v574_v46 }
 0x1a0   : > { %5849 = vmatpush3.bf16.msra.mxu0 %v5848_v50  ;;  %5038 = vmatprep.mubr.msk.f32.mxu1 %vm6189_vm1, %v6190_v19 }
 0x1a1   : > { %v785_v52 = vpop.f32.mrb[26].mxu0  ;;  %5850 = vmatprep.subr.bf16.mxu0 %v6188_v5 }
 0x1a2   : > { %v4998_v54 = vpop.f32.mrb[27].mxu0 }
 0x1a3   : > { %5039 = vmatmul.mubr.msk.f32.gmra.mrb[24].mxu1 %vm809_vm3, %v575_v47 }
 0x1a4   : > { %5041 = vmatprep.mubr.msk.f32.mxu1 %vm6189_vm1, %v6190_v19 }
 0x1a5   : > { %v790_v55 = vpop.f32.mrb[28].mxu0 }
 0x1a6   : > { %v5851_v56 = vpack.c.bf16 %v790_v55, %v785_v52  ;;  %v5001_v58 = vpop.f32.mrb[29].mxu0 }
 0x1a7   : > { %5042 = vmatmul.mubr.msk.f32.gmra.mrb[26].mxu1 %vm809_vm3, %v576_v53 }
 0x1a8   : > { %5852 = vmatpush3.bf16.msra.mxu0 %v5851_v56  ;;  %5044 = vmatprep.mubr.msk.f32.mxu1 %vm6189_vm1, %v6190_v19 }
 0x1a9   : > { %v795_v59 = vpop.f32.mrb[30].mxu0  ;;  %5853 = vmatprep.subr.bf16.mxu0 %v6188_v5 }
 0x1aa   : > { %v5004_v60 = vpop.f32.mrb[31].mxu0 }
 0x1ab   : > { %5045 = vmatmul.mubr.msk.f32.gmra.mrb[28].mxu1 %vm809_vm3, %v577_v57 }
 0x1ac   : > { %5047 = vmatprep.mubr.msk.f32.mxu1 %vm6189_vm1, %v6190_v19 }
 0x1ad   : > { %v800_v62 = vpop.f32.mrb[32].mxu0 }
 0x1ae   : > { %v5854_v63 = vpack.c.bf16 %v800_v62, %v795_v59  ;;  %v5007_v0 = vpop.f32.mrb[33].mxu0 }
 0x1af   : > { %5048 = vmatmul.mubr.msk.f32.gmra.mrb[30].mxu1 %vm809_vm3, %v578_v61 }
 0x1b0   : > { %5855 = vmatpush3.bf16.msra.mxu0 %v5854_v63  ;;  %5050 = vmatprep.mubr.msk.f32.mxu1 %vm6189_vm1, %v6190_v19 }
 0x1b1   : > { %5072 = vmatprep.subr.mxu0 %v6190_v19 }
 0x1b3   : > { %5051 = vmatmul.mubr.msk.f32.gmra.mrb[32].mxu1 %vm809_vm3, %v579_v1 }
 0x1b4   : > { %5053 = vmatprep.mubr.msk.f32.mxu1 %vm6189_vm1, %v6190_v19 }
 0x1b7   : > { %5054 = vmatmul.mubr.msk.f32.gmra.mrb[34].mxu1 %vm809_vm3, %v580_v2 }
 0x1b8   : > { %5109 = vmatprep.mubr.msk.f32.mxu1 %vm6189_vm1, %v6190_v19 }
 0x1bb   : > { %5110 = vmatmul.mubr.msk.f32.vlgmr.msra.gmra.mrb[36].mxu1 %vm408_vm2, %v6313_v25 }
 0x1bc   : > { %5112 = vmatprep.mubr.msk.f32.mxu1 %vm6189_vm1, %v6190_v19  ;;  %5870 = vmatpush3.bf16.msra.mxu1 %v5869_v6 }
 0x1bd   : > { %5871 = vmatprep.subr.bf16.mxu1 %v6188_v5 }
 0x1bf   : > { %5113 = vmatmul.mubr.msk.f32.gmra.mrb[38].mxu1 %vm408_vm2, %v6330_v30 }
 0x1c0   : > { %5115 = vmatprep.mubr.msk.f32.mxu1 %vm6189_vm1, %v6190_v19  ;;  %5873 = vmatpush3.bf16.msra.mxu1 %v5872_v9 }
 0x1c1   : > { %5890 = vmatprep.subr.bf16.mxu1 %v6188_v5 }
 0x1c3   : > { %5116 = vmatmul.mubr.msk.f32.gmra.mrb[40].mxu1 %vm408_vm2, %v6342_v32 }
 0x1c4   : > { %5118 = vmatprep.mubr.msk.f32.mxu1 %vm6189_vm1, %v6190_v19 }
 0x1c7   : > { %5119 = vmatmul.mubr.msk.f32.gmra.mrb[42].mxu1 %vm408_vm2, %v6354_v34 }
 0x1c8   : > { %5121 = vmatprep.mubr.msk.f32.mxu1 %vm6189_vm1, %v6190_v19 }
 0x1cb   : > { %5122 = vmatmul.mubr.msk.f32.gmra.mrb[44].mxu1 %vm408_vm2, %v6365_v36 }
 0x1cc   : > { %5124 = vmatprep.mubr.msk.f32.mxu1 %vm6189_vm1, %v6190_v19 }
 0x1cf   : > { %5125 = vmatmul.mubr.msk.f32.gmra.mrb[46].mxu1 %vm408_vm2, %v6376_v38 }
 0x1d0   : > { %5127 = vmatprep.mubr.msk.f32.mxu1 %vm6189_vm1, %v6190_v19 }
 0x1d3   : > { %5128 = vmatmul.mubr.msk.f32.gmra.mrb[48].mxu1 %vm408_vm2, %v6387_v40 }
 0x1d4   : > { %5130 = vmatprep.mubr.msk.f32.mxu1 %vm6189_vm1, %v6190_v19 }
 0x1d7   : > { %5131 = vmatmul.mubr.msk.f32.gmra.mrb[50].mxu1 %vm408_vm2, %v6397_v41 }
 0x1d8   : > { %5133 = vmatprep.mubr.msk.f32.mxu1 %vm6189_vm1, %v6190_v19 }
 0x1db   : > { %5134 = vmatmul.mubr.msk.f32.gmra.mrb[52].mxu1 %vm408_vm2, %v6405_v42 }
 0x1dc   : > { %5179 = vmatprep.mubr.msk.f32.mxu1 %vm6189_vm1, %v6190_v19 }
 0x1df   : > { %5180 = vmatmul.mubr.msk.f32.vlgmr.msra.gmra.mrb[54].mxu1 %vm408_vm2, %v6313_v25 }
 0x1e0   : > { %5182 = vmatprep.mubr.msk.f32.mxu1 %vm6189_vm1, %v6190_v19 }
 0x1e3   : > { %5183 = vmatmul.mubr.msk.f32.gmra.mrb[56].mxu1 %vm408_vm2, %v6330_v30 }
 0x1e4   : > { %5185 = vmatprep.mubr.msk.f32.mxu1 %vm6189_vm1, %v6190_v19 }
 0x1e7   : > { %5186 = vmatmul.mubr.msk.f32.gmra.mrb[58].mxu1 %vm408_vm2, %v6342_v32 }
 0x1e8   : > { %5188 = vmatprep.mubr.msk.f32.mxu1 %vm6189_vm1, %v6190_v19 }
 0x1eb   : > { %5189 = vmatmul.mubr.msk.f32.gmra.mrb[60].mxu1 %vm408_vm2, %v6354_v34 }
 0x1ec   : > { %5191 = vmatprep.mubr.msk.f32.mxu1 %vm6189_vm1, %v6190_v19 }
 0x1ef   : > { %5192 = vmatmul.mubr.msk.f32.gmra.mrb[62].mxu1 %vm408_vm2, %v6365_v36 }
 0x1f0   : > { %5194 = vmatprep.mubr.msk.f32.mxu1 %vm6189_vm1, %v6190_v19 }
 0x1f3   : > { %5195 = vmatmul.mubr.msk.f32.gmra.mrb[64].mxu1 %vm408_vm2, %v6376_v38 }
 0x1f4   : > { %5197 = vmatprep.mubr.msk.f32.mxu1 %vm6189_vm1, %v6190_v19 }
 0x1f7   : > { %5198 = vmatmul.mubr.msk.f32.gmra.mrb[66].mxu1 %vm408_vm2, %v6387_v40 }
 0x1f8   : > { %5200 = vmatprep.mubr.msk.f32.mxu1 %vm6189_vm1, %v6190_v19 }
 0x1fb   : > { %5201 = vmatmul.mubr.msk.f32.gmra.mrb[68].mxu1 %vm408_vm2, %v6397_v41 }
 0x1fc   : > { %5203 = vmatprep.mubr.msk.f32.mxu1 %vm6189_vm1, %v6190_v19 }
 0x1ff   : > { %5204 = vmatmul.mubr.msk.f32.gmra.mrb[70].mxu1 %vm408_vm2, %v6405_v42 }
 0x200   : > { %5269 = vmatprep.mubr.msk.f32.mxu1 %vm6189_vm1, %v6190_v19 }
 0x26a   : > { %v6625_v10 = vpop.f32.mrb[18].mxu1 }
 0x26b   : > { %v5031_v11 = vpop.f32.mrb[19].mxu1  ;;  %v975_v12 = vsel %vm974_vm5, %v6625_v10, -inf }
 0x26c   : > { %976 = vmax.xlane.f32.xlu1 %v975_v12 }
 0x26e   : > { %v6629_v13 = vpop.f32.mrb[20].mxu1 }
 0x26f   : > { %v5034_v14 = vpop.f32.mrb[21].mxu1  ;;  %v978_v15 = vsel %vm974_vm5, %v6629_v13, -inf }
 0x270   : > { %979 = vmax.xlane.f32.xlu1 %v978_v15 }
 0x272   : > { %v6633_v16 = vpop.f32.mrb[22].mxu1 }
 0x273   : > { %v5037_v17 = vpop.f32.mrb[23].mxu1  ;;  %v981_v18 = vsel %vm974_vm5, %v6633_v16, -inf }
 0x274   : > { %982 = vmax.xlane.f32.xlu1 %v981_v18 }
 0x276   : > { %v6637_v20 = vpop.f32.mrb[24].mxu1 }
 0x277   : > { %v5040_v21 = vpop.f32.mrb[25].mxu1  ;;  %v984_v22 = vsel %vm974_vm5, %v6637_v20, -inf }
 0x278   : > { %985 = vmax.xlane.f32.xlu1 %v984_v22 }
 0x27a   : > { %v6641_v23 = vpop.f32.mrb[26].mxu1 }
 0x27b   : > { %v5043_v24 = vpop.f32.mrb[27].mxu1  ;;  %v987_v26 = vsel %vm974_vm5, %v6641_v23, -inf }
 0x27c   : > { %988 = vmax.xlane.f32.xlu0 %v987_v26 }
 0x27e   : > { %v6645_v27 = vpop.f32.mrb[28].mxu1 }
 0x27f   : > { %v5046_v28 = vpop.f32.mrb[29].mxu1  ;;  %v990_v29 = vsel %vm974_vm5, %v6645_v27, -inf }
 0x280   : > { %991 = vmax.xlane.f32.xlu1 %v990_v29 }
 0x282   : > { %v6649_v31 = vpop.f32.mrb[30].mxu1 }
 0x283   : > { %v5049_v33 = vpop.f32.mrb[31].mxu1  ;;  %v993_v35 = vsel %vm974_vm5, %v6649_v31, -inf }
 0x284   : > { %994 = vmax.xlane.f32.xlu1 %v993_v35 }
 0x286   : > { %v6653_v37 = vpop.f32.mrb[32].mxu1 }
 0x287   : > { %v5052_v39 = vpop.f32.mrb[33].mxu1  ;;  %v996_v43 = vsel %vm974_vm5, %v6653_v37, -inf }
 0x288   : > { %997 = vmax.xlane.f32.xlu1 %v996_v43 }
 0x28a   : > { %v6657_v44 = vpop.f32.mrb[34].mxu1 }
 0x28b   : > { %v5055_v45 = vpop.f32.mrb[35].mxu1  ;;  %v1000_v46 = vsel %vm999_vm6, %v6657_v44, -inf }
 0x28c   : > { %1001 = vmax.xlane.f32.xlu1 %v1000_v46 }
 0x28e   : > { %v6661_v48 = vpop.f32.mrb[36].mxu1 }
 0x28f   : > { %v5111_v50 = vpop.f32.mrb[37].mxu1 }
 0x292   : > { %v6663_v51 = vpop.f32.mrb[38].mxu1 }
 0x293   : > { %v5114_v47 = vpop.f32.mrb[39].mxu1 }
 0x296   : > { %v6665_v52 = vpop.f32.mrb[40].mxu1 }
 0x297   : > { %v5117_v54 = vpop.f32.mrb[41].mxu1 }
 0x29a   : > { %v6667_v53 = vpop.f32.mrb[42].mxu1 }
 0x29b   : > { %v5120_v55 = vpop.f32.mrb[43].mxu1 }
 0x29e   : > { %v6669_v56 = vpop.f32.mrb[44].mxu1 }
 0x29f   : > { %v5123_v58 = vpop.f32.mrb[45].mxu1 }
 0x2a2   : > { %v6671_v57 = vpop.f32.mrb[46].mxu1 }
 0x2a3   : > { %v5126_v59 = vpop.f32.mrb[47].mxu1 }
 0x2a6   : > { %v6673_v60 = vpop.f32.mrb[48].mxu1 }
 0x2a7   : > { %v5129_v61 = vpop.f32.mrb[49].mxu1 }
 0x2aa   : > { %v6675_v62 = vpop.f32.mrb[50].mxu1 }
 0x2ab   : > { %v5132_v63 = vpop.f32.mrb[51].mxu1 }
 0x2ae   : > { %v6677_v0 = vpop.f32.mrb[52].mxu1 }
 0x2af   : > { %v5135_v1 = vpop.f32.mrb[53].mxu1 }
 0x2b2   : > { %v1528_v2 = vpop.f32.mrb[54].mxu1 }
 0x2b3   : > { %v5181_v3 = vpop.f32.mrb[55].mxu1 }
 0x2b6   : > { %v1533_v4 = vpop.f32.mrb[56].mxu1 }
 0x2b7   : > { %v5891_v6 = vpack.c.bf16 %v1533_v4, %v1528_v2  ;;  %v5184_v7 = vpop.f32.mrb[57].mxu1 }
 0x2b9   : > { %5892 = vmatpush3.bf16.msra.mxu1 %v5891_v6 }
 0x2ba   : > { %v1538_v8 = vpop.f32.mrb[58].mxu1  ;;  %5893 = vmatprep.subr.bf16.mxu1 %v6188_v5 }
 0x2bb   : > { %v5187_v9 = vpop.f32.mrb[59].mxu1 }
 0x2be   : > { %v1543_v11 = vpop.f32.mrb[60].mxu1 }
 0x2bf   : > { %v5894_v12 = vpack.c.bf16 %v1543_v11, %v1538_v8  ;;  %v5190_v14 = vpop.f32.mrb[61].mxu1 }
 0x2c1   : > { %5895 = vmatpush3.bf16.msra.mxu1 %v5894_v12 }
 0x2c2   : > { %v1548_v15 = vpop.f32.mrb[62].mxu1  ;;  %5896 = vmatprep.subr.bf16.mxu1 %v6188_v5 }
 0x2c3   : > { %v5193_v17 = vpop.f32.mrb[63].mxu1 }
 0x2c6   : > { %v1553_v18 = vpop.f32.mrb[64].mxu1 }
 0x2c7   : > { %v5897_v21 = vpack.c.bf16 %v1553_v18, %v1548_v15  ;;  %v5196_v22 = vpop.f32.mrb[65].mxu1 }
 0x2c9   : > { %5898 = vmatpush3.bf16.msra.mxu1 %v5897_v21 }
 0x2ca   : > { %v1558_v24 = vpop.f32.mrb[66].mxu1  ;;  %5899 = vmatprep.subr.bf16.mxu1 %v6188_v5 }
 0x2cb   : > { %v5199_v26 = vpop.f32.mrb[67].mxu1 }
 0x2ce   : > { %v1563_v28 = vpop.f32.mrb[68].mxu1 }
 0x2cf   : > { %v5900_v29 = vpack.c.bf16 %v1563_v28, %v1558_v24  ;;  %v5202_v33 = vpop.f32.mrb[69].mxu1 }
 0x2d0   : > { %v805_v33 = vpop.f32.mrb[34].mxu0 }
 0x2d1   : > { %5901 = vmatpush3.bf16.msra.mxu1 %v5900_v29  ;;  %5073 = vmatpush3.msk.msra.mxu0 %vm1102_vm7, %v805_v33 }
 0x2d2   : > { %5267 = vmatprep.subr.mxu1 %v6190_v19  ;;  %5862 = vmatprep.subr.bf16.mxu0 %v6188_v5 }
 0x2f9   : > { %v977_v35 = vpop.xlane.xlu1 %976 }
 0x2fa   : > { %v1003_v39 = vsub.f32 %v6625_v10, %v977_v35  ;;  %v5010_v35 = vpop.f32.mrb[35].mxu0 }
 0x2fc   : > { %v1012_v43 = vmul.f32 1.442695, %v1003_v39 }
 0x2fd   : > { %v980_v45 = vpop.xlane.xlu1 %979 }
 0x2fe   : > { %6018 = vpow2.f32 %v1012_v43  ;;  %v1004_v46 = vsub.f32 %v6629_v13, %v980_v45 }
 0x300   : > { %v1014_v50 = vmul.f32 1.442695, %v1004_v46 }
 0x301   : > { %v983_v47 = vpop.xlane.xlu1 %982 }
 0x302   : > { %6020 = vpow2.f32 %v1014_v50  ;;  %v1005_v54 = vsub.f32 %v6633_v16, %v983_v47 }
 0x304   : > { %v1016_v55 = vmul.f32 1.442695, %v1005_v54  ;;  %v4328_v54 = vld [vmem:[%s7817_s4 + $0x20] sm:$0xff] }
 0x305   : > { %v986_v58 = vpop.xlane.xlu1 %985 }
 0x306   : > { %6022 = vpow2.f32 %v1016_v55  ;;  %v1006_v59 = vsub.f32 %v6637_v20, %v986_v58  ;;  %v4329_v55 = vld [vmem:[%s7817_s4 + $0x28] sm:$0xff] }
 0x308   : > { %v6687_v61 = vpop.eup %6018  ;;  %v1018_v63 = vmul.f32 1.442695, %v1006_v59  ;;  %v5863_v59 = vpack.c.bf16 %v4329_v55, %v4328_v54 }
 0x309   : > { %v989_v1 = vpop.xlane.xlu0 %988  ;;  %v1030_v10 = vsel %vm974_vm5, %v6687_v61, 0.0 }
 0x30a   : > { %6024 = vpow2.f32 %v1018_v63  ;;  %v1007_v13 = vsub.f32 %v6641_v23, %v989_v1  ;;  %1031 = vadd.xlane.f32.xlu1 %v1030_v10  ;;  %v4330_v10 = vld [vmem:[%s7817_s4 + $0x30] sm:$0xff] }
 0x30c   : > { %v6692_v2 = vpop.eup %6020  ;;  %v1020_v3 = vmul.f32 1.442695, %v1007_v13  ;;  %v4331_v13 = vld [vmem:[%s7817_s4 + $0x38] sm:$0xff] }
 0x30d   : > { %v992_v16 = vpop.xlane.xlu1 %991  ;;  %v1033_v4 = vsel %vm974_vm5, %v6692_v2, 0.0 }
 0x30e   : > { %6026 = vpow2.f32 %v1020_v3  ;;  %v1008_v20 = vsub.f32 %v6645_v27, %v992_v16  ;;  %1034 = vadd.xlane.f32.xlu1 %v1033_v4  ;;  %v5866_v16 = vpack.c.bf16 %v4331_v13, %v4330_v10 }
 0x310   : > { %v6697_v6 = vpop.eup %6022  ;;  %v1022_v7 = vmul.f32 1.442695, %v1008_v20 }
 0x311   : > { %v995_v8 = vpop.xlane.xlu1 %994  ;;  %v1036_v9 = vsel %vm974_vm5, %v6697_v6, 0.0 }
 0x312   : > { %6028 = vpow2.f32 %v1022_v7  ;;  %v1009_v23 = vsub.f32 %v6649_v31, %v995_v8  ;;  %1037 = vadd.xlane.f32.xlu1 %v1036_v9 }
 0x314   : > { %v6702_v11 = vpop.eup %6024  ;;  %v1024_v12 = vmul.f32 1.442695, %v1009_v23 }
 0x315   : > { %v998_v14 = vpop.xlane.xlu1 %997  ;;  %v1039_v15 = vsel %vm974_vm5, %v6702_v11, 0.0 }
 0x316   : > { %6030 = vpow2.f32 %v1024_v12  ;;  %v1010_v27 = vsub.f32 %v6653_v37, %v998_v14  ;;  %1040 = vadd.xlane.f32.xlu1 %v1039_v15 }
 0x318   : > { %v6707_v17 = vpop.eup %6026  ;;  %v1026_v18 = vmul.f32 1.442695, %v1010_v27 }
 0x319   : > { %v1002_v21 = vpop.xlane.xlu1 %1001  ;;  %v1042_v22 = vsel %vm974_vm5, %v6707_v17, 0.0 }
 0x31a   : > { %6032 = vpow2.f32 %v1026_v18  ;;  %v1011_v31 = vsub.f32 %v6657_v44, %v1002_v21  ;;  %1043 = vadd.xlane.f32.xlu1 %v1042_v22 }
 0x31c   : > { %v6712_v24 = vpop.eup %6028  ;;  %v1028_v26 = vmul.f32 1.442695, %v1011_v31 }
 0x31d   : > { %v1045_v28 = vsel %vm974_vm5, %v6712_v24, 0.0 }
 0x31e   : > { %6034 = vpow2.f32 %v1028_v26  ;;  %1046 = vadd.xlane.f32.xlu1 %v1045_v28 }
 0x320   : > { %v6716_v37 = vpop.eup %6030 }
 0x321   : > { %v1048_v29 = vsel %vm974_vm5, %v6716_v37, 0.0 }
 0x322   : > { %1049 = vadd.xlane.f32.xlu1 %v1048_v29 }
 0x324   : > { %v6720_v39 = vpop.eup %6032 }
 0x325   : > { %v1051_v44 = vsel %vm974_vm5, %v6720_v39, 0.0 }
 0x326   : > { %1052 = vadd.xlane.f32.xlu1 %v1051_v44 }
 0x328   : > { %v6726_v43 = vpop.eup %6034 }
 0x329   : > { %v1054_v45 = vsel %vm999_vm6, %v6726_v43, 0.0 }
 0x32a   : > { %1055 = vadd.xlane.f32.xlu1 %v1054_v45 }
 0x397   : > { %v1032_v46 = vpop.xlane.xlu1 %1031 }
 0x398   : > { %6036 = vrcp.f32 %v1032_v46 }
 0x39b   : > { %v1035_v50 = vpop.xlane.xlu1 %1034 }
 0x39c   : > { %6038 = vrcp.f32 %v1035_v50 }
 0x39f   : > { %v1038_v47 = vpop.xlane.xlu1 %1037 }
 0x3a0   : > { %6040 = vrcp.f32 %v1038_v47 }
 0x3a2   : > { %v6037_v58 = vpop.eup %6036 }
 0x3a3   : > { %v1066_v63 = vmul.f32 %v6037_v58, %v6687_v61  ;;  %v1041_v1 = vpop.xlane.xlu1 %1040 }
 0x3a4   : > { %6042 = vrcp.f32 %v1041_v1 }
 0x3a5   : > { %5075 = vmatmul.mubr.msk.f32.vlgmr.msra.gmra.mrb[36].mxu0 %vm974_vm5, %v1066_v63 }
 0x3a6   : > { %v6039_v3 = vpop.eup %6038  ;;  %5077 = vmatprep.mubr.msk.f32.mxu0 %vm6189_vm1, %v6190_v19  ;;  %5864 = vmatpush3.bf16.msra.mxu0 %v5863_v59 }
 0x3a7   : > { %v1044_v4 = vpop.xlane.xlu1 %1043  ;;  %v1067_v61 = vmul.f32 %v6039_v3, %v6692_v2  ;;  %5865 = vmatprep.subr.bf16.mxu0 %v6188_v5 }
 0x3a8   : > { %6044 = vrcp.f32 %v1044_v4 }
 0x3a9   : > { %5078 = vmatmul.mubr.msk.f32.gmra.mrb[38].mxu0 %vm974_vm5, %v1067_v61 }
 0x3aa   : > { %v6041_v20 = vpop.eup %6040  ;;  %5080 = vmatprep.mubr.msk.f32.mxu0 %vm6189_vm1, %v6190_v19  ;;  %5867 = vmatpush3.bf16.msra.mxu0 %v5866_v16 }
 0x3ab   : > { %v1047_v7 = vpop.xlane.xlu1 %1046  ;;  %v1068_v8 = vmul.f32 %v6041_v20, %v6697_v6  ;;  %5874 = vmatprep.subr.bf16.mxu0 %v6188_v5 }
 0x3ac   : > { %6046 = vrcp.f32 %v1047_v7 }
 0x3ad   : > { %5081 = vmatmul.mubr.msk.f32.gmra.mrb[40].mxu0 %vm974_vm5, %v1068_v8 }
 0x3ae   : > { %v6043_v9 = vpop.eup %6042  ;;  %5083 = vmatprep.mubr.msk.f32.mxu0 %vm6189_vm1, %v6190_v19 }
 0x3af   : > { %v1050_v2 = vpop.xlane.xlu1 %1049  ;;  %v1069_v23 = vmul.f32 %v6043_v9, %v6702_v11 }
 0x3b0   : > { %6048 = vrcp.f32 %v1050_v2 }
 0x3b1   : > { %5084 = vmatmul.mubr.msk.f32.gmra.mrb[42].mxu0 %vm974_vm5, %v1069_v23 }
 0x3b2   : > { %v6045_v12 = vpop.eup %6044  ;;  %5086 = vmatprep.mubr.msk.f32.mxu0 %vm6189_vm1, %v6190_v19 }
 0x3b3   : > { %v1053_v6 = vpop.xlane.xlu1 %1052  ;;  %v1070_v14 = vmul.f32 %v6045_v12, %v6707_v17  ;;  %v1333_v12 = vmul.f32 0.25, %v6661_v48  ;;  %v1336_v48 = vmul.f32 0.25, %v6667_v53  ;;  %v1339_v53 = vmul.f32 0.25, %v6673_v60 }
 0x3b4   : > { %6050 = vrcp.f32 %v1053_v6  ;;  %v1334_v6 = vmul.f32 0.25, %v6663_v51  ;;  %v1337_v51 = vmul.f32 0.25, %v6669_v56  ;;  %v1340_v56 = vmul.f32 0.25, %v6675_v62 }
 0x3b5   : > { %5087 = vmatmul.mubr.msk.f32.gmra.mrb[44].mxu0 %vm974_vm5, %v1070_v14  ;;  %v1335_v14 = vmul.f32 0.25, %v6665_v52  ;;  %v1338_v52 = vmul.f32 0.25, %v6671_v57 }
 0x3b6   : > { %v6047_v15 = vpop.eup %6046  ;;  %5089 = vmatprep.mubr.msk.f32.mxu0 %vm6189_vm1, %v6190_v19 }
 0x3b7   : > { %v1056_v27 = vpop.xlane.xlu1 %1055  ;;  %v1071_v11 = vmul.f32 %v6047_v15, %v6712_v24  ;;  %v1341_v15 = vmul.f32 0.25, %v6677_v0 }
 0x3b8   : > { %6052 = vrcp.f32 %v1056_v27 }
 0x3b9   : > { %5090 = vmatmul.mubr.msk.f32.gmra.mrb[46].mxu0 %vm974_vm5, %v1071_v11 }
 0x3ba   : > { %v6049_v18 = vpop.eup %6048  ;;  %5092 = vmatprep.mubr.msk.f32.mxu0 %vm6189_vm1, %v6190_v19 }
 0x3bb   : > { %v1072_v21 = vmul.f32 %v6049_v18, %v6716_v37 }
 0x3bd   : > { %5093 = vmatmul.mubr.msk.f32.gmra.mrb[48].mxu0 %vm974_vm5, %v1072_v21 }
 0x3be   : > { %v6051_v17 = vpop.eup %6050  ;;  %5095 = vmatprep.mubr.msk.f32.mxu0 %vm6189_vm1, %v6190_v19 }
 0x3bf   : > { %v1073_v22 = vmul.f32 %v6051_v17, %v6720_v39 }
 0x3c1   : > { %5096 = vmatmul.mubr.msk.f32.gmra.mrb[50].mxu0 %vm974_vm5, %v1073_v22 }
 0x3c2   : > { %v6053_v31 = vpop.eup %6052  ;;  %5098 = vmatprep.mubr.msk.f32.mxu0 %vm6189_vm1, %v6190_v19 }
 0x3c3   : > { %v1074_v24 = vmul.f32 %v6053_v31, %v6726_v43 }
 0x3c5   : > { %5099 = vmatmul.mubr.msk.f32.gmra.mrb[52].mxu0 %vm974_vm5, %v1074_v24 }
 0x3c6   : > { %5144 = vmatprep.mubr.msk.f32.mxu0 %vm6189_vm1, %v6190_v19 }
 0x3c9   : > { %5145 = vmatmul.mubr.msk.f32.vlgmr.msra.gmra.mrb[54].mxu0 %vm408_vm2, %v6313_v25 }
 0x3ca   : > { %5147 = vmatprep.mubr.msk.f32.mxu0 %vm6189_vm1, %v6190_v19 }
 0x3cd   : > { %5148 = vmatmul.mubr.msk.f32.gmra.mrb[56].mxu0 %vm408_vm2, %v6330_v30 }
 0x3ce   : > { %5150 = vmatprep.mubr.msk.f32.mxu0 %vm6189_vm1, %v6190_v19 }
 0x3d1   : > { %5151 = vmatmul.mubr.msk.f32.gmra.mrb[58].mxu0 %vm408_vm2, %v6342_v32 }
 0x3d2   : > { %5153 = vmatprep.mubr.msk.f32.mxu0 %vm6189_vm1, %v6190_v19 }
 0x3d5   : > { %5154 = vmatmul.mubr.msk.f32.gmra.mrb[60].mxu0 %vm408_vm2, %v6354_v34 }
 0x3d6   : > { %5156 = vmatprep.mubr.msk.f32.mxu0 %vm6189_vm1, %v6190_v19 }
 0x3d9   : > { %5157 = vmatmul.mubr.msk.f32.gmra.mrb[62].mxu0 %vm408_vm2, %v6365_v36 }
 0x3da   : > { %5159 = vmatprep.mubr.msk.f32.mxu0 %vm6189_vm1, %v6190_v19 }
 0x3dd   : > { %5160 = vmatmul.mubr.msk.f32.gmra.mrb[64].mxu0 %vm408_vm2, %v6376_v38 }
 0x3de   : > { %5162 = vmatprep.mubr.msk.f32.mxu0 %vm6189_vm1, %v6190_v19 }
 0x3e1   : > { %5163 = vmatmul.mubr.msk.f32.gmra.mrb[66].mxu0 %vm408_vm2, %v6387_v40 }
 0x3e2   : > { %5165 = vmatprep.mubr.msk.f32.mxu0 %vm6189_vm1, %v6190_v19 }
 0x3e5   : > { %5166 = vmatmul.mubr.msk.f32.gmra.mrb[68].mxu0 %vm408_vm2, %v6397_v41 }
 0x3e6   : > { %5168 = vmatprep.mubr.msk.f32.mxu0 %vm6189_vm1, %v6190_v19 }
 0x3e9   : > { %5169 = vmatmul.mubr.msk.f32.gmra.mrb[70].mxu0 %vm408_vm2, %v6405_v42 }
 0x3ea   : > { %5224 = vmatprep.mubr.msk.f32.mxu0 %vm6189_vm1, %v6190_v19 }
 0x478   : > { %v6816_v25 = vpop.f32.mrb[36].mxu0 }
 0x479   : > { %v5076_v30 = vpop.f32.mrb[37].mxu0 }
 0x47c   : > { %v6818_v32 = vpop.f32.mrb[38].mxu0 }
 0x47d   : > { %v5079_v34 = vpop.f32.mrb[39].mxu0 }
 0x480   : > { %v6820_v36 = vpop.f32.mrb[40].mxu0 }
 0x481   : > { %v5082_v38 = vpop.f32.mrb[41].mxu0 }
 0x484   : > { %v6822_v40 = vpop.f32.mrb[42].mxu0 }
 0x485   : > { %v5085_v41 = vpop.f32.mrb[43].mxu0 }
 0x488   : > { %v6824_v26 = vpop.f32.mrb[44].mxu0 }
 0x489   : > { %v5088_v28 = vpop.f32.mrb[45].mxu0 }
 0x48c   : > { %v6826_v37 = vpop.f32.mrb[46].mxu0 }
 0x48d   : > { %v5091_v42 = vpop.f32.mrb[47].mxu0 }
 0x490   : > { %v6828_v29 = vpop.f32.mrb[48].mxu0 }
 0x491   : > { %v5094_v33 = vpop.f32.mrb[49].mxu0 }
 0x494   : > { %v6830_v35 = vpop.f32.mrb[50].mxu0 }
 0x495   : > { %v5097_v39 = vpop.f32.mrb[51].mxu0 }
 0x498   : > { %v6832_v44 = vpop.f32.mrb[52].mxu0 }
 0x499   : > { %v5100_v43 = vpop.f32.mrb[53].mxu0 }
 0x49c   : > { %v1413_v45 = vpop.f32.mrb[54].mxu0 }
 0x49d   : > { %v5146_v46 = vpop.f32.mrb[55].mxu0 }
 0x4a0   : > { %v1418_v50 = vpop.f32.mrb[56].mxu0 }
 0x4a1   : > { %v5875_v47 = vpack.c.bf16 %v1418_v50, %v1413_v45  ;;  %v5149_v54 = vpop.f32.mrb[57].mxu0 }
 0x4a3   : > { %5877 = vmatpush3.bf16.xpose.msk.msra.mxu0 %vm6455_vm4, %v5875_v47 }
 0x4a4   : > { %v1423_v55 = vpop.f32.mrb[58].mxu0  ;;  %5878 = vmatprep.subr.bf16.mxu0 %v6188_v5 }
 0x4a5   : > { %v5152_v58 = vpop.f32.mrb[59].mxu0 }
 0x4a8   : > { %v1428_v59 = vpop.f32.mrb[60].mxu0 }
 0x4a9   : > { %v5879_v63 = vpack.c.bf16 %v1428_v59, %v1423_v55  ;;  %v5155_v1 = vpop.f32.mrb[61].mxu0 }
 0x4ab   : > { %5881 = vmatpush3.bf16.xpose.msk.msra.mxu0 %vm6455_vm4, %v5879_v63 }
 0x4ac   : > { %v1433_v10 = vpop.f32.mrb[62].mxu0  ;;  %5882 = vmatprep.subr.bf16.mxu0 %v6188_v5 }
 0x4ad   : > { %v5158_v13 = vpop.f32.mrb[63].mxu0 }
 0x4b0   : > { %v1438_v3 = vpop.f32.mrb[64].mxu0 }
 0x4b1   : > { %v5883_v16 = vpack.c.bf16 %v1438_v3, %v1433_v10  ;;  %v5161_v4 = vpop.f32.mrb[65].mxu0 }
 0x4b3   : > { %5885 = vmatpush3.bf16.xpose.msk.msra.mxu0 %vm6455_vm4, %v5883_v16 }
 0x4b4   : > { %v1443_v61 = vpop.f32.mrb[66].mxu0  ;;  %5886 = vmatprep.subr.bf16.mxu0 %v6188_v5 }
 0x4b5   : > { %v5164_v20 = vpop.f32.mrb[67].mxu0 }
 0x4b8   : > { %v1448_v7 = vpop.f32.mrb[68].mxu0 }
 0x4b9   : > { %v5887_v8 = vpack.c.bf16 %v1448_v7, %v1443_v61  ;;  %v5167_v9 = vpop.f32.mrb[69].mxu0 }
 0x4bb   : > { %5889 = vmatpush3.bf16.xpose.msk.msra.mxu0 %vm6455_vm4, %v5887_v8 }
 0x4bc   : > { %v1453_v2 = vpop.f32.mrb[70].mxu0  ;;  %5222 = vmatprep.subr.mxu0 %v6190_v19 }
 0x4bd   : > { %v5170_v23 = vpop.f32.mrb[71].mxu0 }
 0x4c3   : > { %5223 = vmatpush3.xpose.msk.msra.mxu0 %vm809_vm3, %v1453_v2 }
 0x4c4   : > { %5902 = vmatprep.subr.bf16.mxu0 %v6188_v5 }
 0x4c6   : > { %5225 = vmatmul.mubr.msk.f32.vlgmr.msra.gmra.mrb[72].mxu0 %vm809_vm3, %v1333_v12 }
 0x4c7   : > { %5227 = vmatprep.mubr.msk.f32.mxu0 %vm6189_vm1, %v6190_v19 }
 0x4ca   : > { %5228 = vmatmul.mubr.msk.f32.gmra.mrb[74].mxu0 %vm809_vm3, %v1334_v6 }
 0x4cb   : > { %5230 = vmatprep.mubr.msk.f32.mxu0 %vm6189_vm1, %v6190_v19 }
 0x4ce   : > { %5231 = vmatmul.mubr.msk.f32.gmra.mrb[76].mxu0 %vm809_vm3, %v1335_v14 }
 0x4cf   : > { %5233 = vmatprep.mubr.msk.f32.mxu0 %vm6189_vm1, %v6190_v19 }
 0x4d2   : > { %5234 = vmatmul.mubr.msk.f32.gmra.mrb[78].mxu0 %vm809_vm3, %v1336_v48 }
 0x4d3   : > { %5236 = vmatprep.mubr.msk.f32.mxu0 %vm6189_vm1, %v6190_v19 }
 0x4d6   : > { %5237 = vmatmul.mubr.msk.f32.gmra.mrb[80].mxu0 %vm809_vm3, %v1337_v51 }
 0x4d7   : > { %5239 = vmatprep.mubr.msk.f32.mxu0 %vm6189_vm1, %v6190_v19 }
 0x4da   : > { %5240 = vmatmul.mubr.msk.f32.gmra.mrb[82].mxu0 %vm809_vm3, %v1338_v52 }
 0x4db   : > { %5242 = vmatprep.mubr.msk.f32.mxu0 %vm6189_vm1, %v6190_v19 }
 0x4de   : > { %5243 = vmatmul.mubr.msk.f32.gmra.mrb[84].mxu0 %vm809_vm3, %v1339_v53 }
 0x4df   : > { %5245 = vmatprep.mubr.msk.f32.mxu0 %vm6189_vm1, %v6190_v19 }
 0x4e2   : > { %5246 = vmatmul.mubr.msk.f32.gmra.mrb[86].mxu0 %vm809_vm3, %v1340_v56 }
 0x4e3   : > { %5248 = vmatprep.mubr.msk.f32.mxu0 %vm6189_vm1, %v6190_v19 }
 0x4e6   : > { %5249 = vmatmul.mubr.msk.f32.gmra.mrb[88].mxu0 %vm809_vm3, %v1341_v15 }
 0x4e7   : > { %5300 = vmatprep.mubr.msk.f32.mxu0 %vm6189_vm1, %v6190_v19 }
 0x599   : > { %v1692_v57 = vpop.f32.mrb[72].mxu0 }
 0x59a   : > { %v5226_v60 = vpop.f32.mrb[73].mxu0  ;;  %v1736_v27 = vsel %vm974_vm5, %v1692_v57, -inf }
 0x59b   : > { %1737 = vmax.xlane.f32.xlu1 %v1736_v27 }
 0x59d   : > { %v1697_v11 = vpop.f32.mrb[74].mxu0 }
 0x59e   : > { %v5229_v18 = vpop.f32.mrb[75].mxu0  ;;  %v1739_v62 = vsel %vm974_vm5, %v1697_v11, -inf }
 0x59f   : > { %1740 = vmax.xlane.f32.xlu1 %v1739_v62 }
 0x5a1   : > { %v1702_v0 = vpop.f32.mrb[76].mxu0 }
 0x5a2   : > { %v5232_v21 = vpop.f32.mrb[77].mxu0  ;;  %v1742_v17 = vsel %vm974_vm5, %v1702_v0, -inf }
 0x5a3   : > { %1743 = vmax.xlane.f32.xlu1 %v1742_v17 }
 0x5a5   : > { %v1707_v22 = vpop.f32.mrb[78].mxu0 }
 0x5a6   : > { %v5235_v31 = vpop.f32.mrb[79].mxu0  ;;  %v1745_v24 = vsel %vm974_vm5, %v1707_v22, -inf }
 0x5a7   : > { %1746 = vmax.xlane.f32.xlu0 %v1745_v24 }
 0x5a9   : > { %v1712_v30 = vpop.f32.mrb[80].mxu0 }
 0x5aa   : > { %v5238_v34 = vpop.f32.mrb[81].mxu0  ;;  %v1748_v38 = vsel %vm974_vm5, %v1712_v30, -inf }
 0x5ab   : > { %1749 = vmax.xlane.f32.xlu1 %v1748_v38 }
 0x5ad   : > { %v1717_v41 = vpop.f32.mrb[82].mxu0 }
 0x5ae   : > { %v5241_v28 = vpop.f32.mrb[83].mxu0  ;;  %v1751_v42 = vsel %vm974_vm5, %v1717_v41, -inf }
 0x5af   : > { %1752 = vmax.xlane.f32.xlu0 %v1751_v42  ;;  %v1568_v28 = vpop.f32.mrb[70].mxu1 }
 0x5b0   : > { %v5205_v42 = vpop.f32.mrb[71].mxu1  ;;  %5268 = vmatpush3.msk.msra.mxu1 %vm1102_vm7, %v1568_v28 }
 0x5b1   : > { %v1722_v33 = vpop.f32.mrb[84].mxu0  ;;  %5905 = vmatprep.subr.bf16.mxu1 %v6188_v5 }
 0x5b2   : > { %v5244_v39 = vpop.f32.mrb[85].mxu0  ;;  %v1754_v43 = vsel %vm974_vm5, %v1722_v33, -inf }
 0x5b3   : > { %1755 = vmax.xlane.f32.xlu1 %v1754_v43 }
 0x5b5   : > { %v1727_v45 = vpop.f32.mrb[86].mxu0 }
 0x5b6   : > { %v5247_v46 = vpop.f32.mrb[87].mxu0  ;;  %v1757_v50 = vsel %vm974_vm5, %v1727_v45, -inf }
 0x5b7   : > { %1758 = vmax.xlane.f32.xlu0 %v1757_v50  ;;  %v4382_v46 = vld [vmem:[%s7819_s6 + $0x10] sm:$0xff]  ;;  %v4383_v50 = vld [vmem:[%s7819_s6 + $0x18] sm:$0xff] }
 0x5b9   : > { %v1732_v47 = vpop.f32.mrb[88].mxu0 }
 0x5ba   : > { %v5250_v54 = vpop.f32.mrb[89].mxu0  ;;  %v1760_v55 = vsel %vm999_vm6, %v1732_v47, -inf }
 0x5bb   : > { %1761 = vmax.xlane.f32.xlu1 %v1760_v55 }
 0x628   : > { %v1738_v58 = vpop.xlane.xlu1 %1737 }
 0x629   : > { %v1763_v59 = vsub.f32 %v1692_v57, %v1738_v58 }
 0x62b   : > { %v1772_v63 = vmul.f32 1.442695, %v1763_v59  ;;  %v1216_v59 = vld [vmem:[%s7819_s6] sm:$0xff] }
 0x62c   : > { %v1741_v1 = vpop.xlane.xlu1 %1740 }
 0x62d   : > { %6054 = vpow2.f32 %v1772_v63  ;;  %v1764_v10 = vsub.f32 %v1697_v11, %v1741_v1  ;;  %v1217_v63 = vld [vmem:[%s7819_s6 + $0x8] sm:$0xff] }
 0x62f   : > { %v1774_v13 = vmul.f32 1.442695, %v1764_v10  ;;  %v5906_v10 = vpack.c.bf16 %v1217_v63, %v1216_v59 }
 0x630   : > { %v1744_v3 = vpop.xlane.xlu1 %1743 }
 0x631   : > { %6056 = vpow2.f32 %v1774_v13  ;;  %v1765_v16 = vsub.f32 %v1702_v0, %v1744_v3 }
 0x633   : > { %v1776_v4 = vmul.f32 1.442695, %v1765_v16 }
 0x634   : > { %v1747_v61 = vpop.xlane.xlu0 %1746 }
 0x635   : > { %6058 = vpow2.f32 %v1776_v4  ;;  %v1766_v20 = vsub.f32 %v1707_v22, %v1747_v61 }
 0x637   : > { %v6893_v7 = vpop.eup %6054  ;;  %v1778_v8 = vmul.f32 1.442695, %v1766_v20 }
 0x638   : > { %v1750_v9 = vpop.xlane.xlu1 %1749  ;;  %v1790_v2 = vsel %vm974_vm5, %v6893_v7, 0.0 }
 0x639   : > { %6060 = vpow2.f32 %v1778_v8  ;;  %v1767_v23 = vsub.f32 %v1712_v30, %v1750_v9  ;;  %1791 = vadd.xlane.f32.xlu0 %v1790_v2 }
 0x63b   : > { %v6897_v12 = vpop.eup %6056  ;;  %v1780_v6 = vmul.f32 1.442695, %v1767_v23 }
 0x63c   : > { %v1753_v14 = vpop.xlane.xlu0 %1752  ;;  %v1793_v48 = vsel %vm974_vm5, %v6897_v12, 0.0 }
 0x63d   : > { %6062 = vpow2.f32 %v1780_v6  ;;  %v1768_v51 = vsub.f32 %v1717_v41, %v1753_v14  ;;  %1794 = vadd.xlane.f32.xlu1 %v1793_v48 }
 0x63f   : > { %v6901_v52 = vpop.eup %6058  ;;  %v1782_v53 = vmul.f32 1.442695, %v1768_v51 }
 0x640   : > { %v1756_v56 = vpop.xlane.xlu1 %1755  ;;  %v1796_v15 = vsel %vm974_vm5, %v6901_v52, 0.0 }
 0x641   : > { %6064 = vpow2.f32 %v1782_v53  ;;  %v1769_v57 = vsub.f32 %v1722_v33, %v1756_v56  ;;  %1797 = vadd.xlane.f32.xlu0 %v1796_v15 }
 0x643   : > { %v6905_v60 = vpop.eup %6060  ;;  %v1784_v27 = vmul.f32 1.442695, %v1769_v57 }
 0x644   : > { %v1759_v11 = vpop.xlane.xlu0 %1758  ;;  %v1799_v18 = vsel %vm974_vm5, %v6905_v60, 0.0 }
 0x645   : > { %6066 = vpow2.f32 %v1784_v27  ;;  %v1770_v62 = vsub.f32 %v1727_v45, %v1759_v11  ;;  %1800 = vadd.xlane.f32.xlu1 %v1799_v18  ;;  %v4415_v11 = vld [vmem:[%s7817_s4 + $0x40] sm:$0xff]  ;;  %v4416_v18 = vld [vmem:[%s7817_s4 + $0x48] sm:$0xff] }
 0x647   : > { %v6909_v0 = vpop.eup %6062  ;;  %v1786_v21 = vmul.f32 1.442695, %v1770_v62  ;;  %v5915_v62 = vpack.c.bf16 %v4416_v18, %v4415_v11 }
 0x648   : > { %v1762_v17 = vpop.xlane.xlu1 %1761  ;;  %v1802_v22 = vsel %vm974_vm5, %v6909_v0, 0.0 }
 0x649   : > { %6068 = vpow2.f32 %v1786_v21  ;;  %v1771_v31 = vsub.f32 %v1732_v47, %v1762_v17  ;;  %1803 = vadd.xlane.f32.xlu0 %v1802_v22  ;;  %v5903_v47 = vpack.c.bf16 %v4383_v50, %v4382_v46  ;;  %v4418_v21 = vld [vmem:[%s7817_s4 + $0x58] sm:$0xff]  ;;  %v4402_v22 = vld [vmem:[%s7816_s3 + $0x40] sm:$0xff] }
 0x64b   : > { %v6913_v24 = vpop.eup %6064  ;;  %v1788_v30 = vmul.f32 1.442695, %v1771_v31  ;;  %5904 = vmatpush3.bf16.msra.mxu0 %v5903_v47  ;;  %v4403_v31 = vld [vmem:[%s7816_s3 + $0x48] sm:$0xff] }
 0x64c   : > { %v1805_v34 = vsel %vm974_vm5, %v6913_v24, 0.0  ;;  %5908 = vmatprep.subr.bf16.mxu0 %v6188_v5 }
 0x64d   : > { %6070 = vpow2.f32 %v1788_v30  ;;  %1806 = vadd.xlane.f32.xlu1 %v1805_v34  ;;  %v4404_v30 = vld [vmem:[%s7816_s3 + $0x50] sm:$0xff]  ;;  %v4405_v34 = vld [vmem:[%s7816_s3 + $0x58] sm:$0xff] }
 0x64e   : > { %v5912_v28 = vpack.c.bf16 %v4405_v34, %v4404_v30 }
 0x64f   : > { %v6917_v38 = vpop.eup %6066 }
 0x650   : > { %v1808_v41 = vsel %vm974_vm5, %v6917_v38, 0.0 }
 0x651   : > { %1809 = vadd.xlane.f32.xlu0 %v1808_v41 }
 0x653   : > { %v6922_v33 = vpop.eup %6068 }
 0x654   : > { %v1811_v39 = vsel %vm974_vm5, %v6922_v33, 0.0 }
 0x655   : > { %1812 = vadd.xlane.f32.xlu1 %v1811_v39 }
 0x657   : > { %v6927_v43 = vpop.eup %6070 }
 0x658   : > { %v1814_v45 = vsel %vm999_vm6, %v6927_v43, 0.0 }
 0x659   : > { %1815 = vadd.xlane.f32.xlu0 %v1814_v45 }
 0x6c6   : > { %v1792_v54 = vpop.xlane.xlu0 %1791 }
 0x6c7   : > { %6072 = vrcp.f32 %v1792_v54 }
 0x6ca   : > { %v1795_v55 = vpop.xlane.xlu1 %1794 }
 0x6cb   : > { %6074 = vrcp.f32 %v1795_v55 }
 0x6ce   : > { %v1798_v58 = vpop.xlane.xlu0 %1797 }
 0x6cf   : > { %6076 = vrcp.f32 %v1798_v58 }
 0x6d1   : > { %v6073_v1 = vpop.eup %6072 }
 0x6d2   : > { %v1826_v13 = vmul.f32 %v6073_v1, %v6893_v7  ;;  %v1801_v3 = vpop.xlane.xlu1 %1800 }
 0x6d3   : > { %6078 = vrcp.f32 %v1801_v3 }
 0x6d4   : > { %5270 = vmatmul.mubr.msk.f32.vlgmr.msra.gmra.mrb[72].mxu1 %vm974_vm5, %v1826_v13  ;;  %v4429_v13 = vld [vmem:[%s7818_s5 + $0x48] sm:$0xff] }
 0x6d5   : > { %v6075_v16 = vpop.eup %6074  ;;  %5272 = vmatprep.mubr.msk.f32.mxu1 %vm6189_vm1, %v6190_v19  ;;  %5907 = vmatpush3.bf16.msra.mxu1 %v5906_v10  ;;  %v4428_v10 = vld [vmem:[%s7818_s5 + $0x40] sm:$0xff] }
 0x6d6   : > { %v1804_v4 = vpop.xlane.xlu0 %1803  ;;  %v1827_v61 = vmul.f32 %v6075_v16, %v6897_v12  ;;  %5914 = vmatprep.subr.bf16.mxu1 %v6188_v5 }
 0x6d7   : > { %6080 = vrcp.f32 %v1804_v4  ;;  %v5921_v4 = vpack.c.bf16 %v4429_v13, %v4428_v10 }
 0x6d8   : > { %5273 = vmatmul.mubr.msk.f32.gmra.mrb[74].mxu1 %vm974_vm5, %v1827_v61  ;;  %v4430_v61 = vld [vmem:[%s7818_s5 + $0x50] sm:$0xff] }
 0x6d9   : > { %v6077_v20 = vpop.eup %6076  ;;  %5275 = vmatprep.mubr.msk.f32.mxu1 %vm6189_vm1, %v6190_v19 }
 0x6da   : > { %v1807_v7 = vpop.xlane.xlu1 %1806  ;;  %v1828_v8 = vmul.f32 %v6077_v20, %v6901_v52  ;;  %v4431_v20 = vld [vmem:[%s7818_s5 + $0x58] sm:$0xff] }
 0x6db   : > { %6082 = vrcp.f32 %v1807_v7 }
 0x6dc   : > { %5276 = vmatmul.mubr.msk.f32.gmra.mrb[76].mxu1 %vm974_vm5, %v1828_v8 }
 0x6dd   : > { %v6079_v9 = vpop.eup %6078  ;;  %5278 = vmatprep.mubr.msk.f32.mxu1 %vm6189_vm1, %v6190_v19 }
 0x6de   : > { %v1810_v2 = vpop.xlane.xlu0 %1809  ;;  %v1829_v23 = vmul.f32 %v6079_v9, %v6905_v60  ;;  %v5924_v9 = vpack.c.bf16 %v4431_v20, %v4430_v61 }
 0x6df   : > { %6084 = vrcp.f32 %v1810_v2 }
 0x6e0   : > { %5279 = vmatmul.mubr.msk.f32.gmra.mrb[78].mxu1 %vm974_vm5, %v1829_v23 }
 0x6e1   : > { %v6081_v12 = vpop.eup %6080  ;;  %5281 = vmatprep.mubr.msk.f32.mxu1 %vm6189_vm1, %v6190_v19 }
 0x6e2   : > { %v1813_v6 = vpop.xlane.xlu1 %1812  ;;  %v1830_v14 = vmul.f32 %v6081_v12, %v6909_v0  ;;  %v4417_v0 = vld [vmem:[%s7817_s4 + $0x50] sm:$0xff] }
 0x6e3   : > { %6086 = vrcp.f32 %v1813_v6  ;;  %v5918_v17 = vpack.c.bf16 %v4418_v21, %v4417_v0 }
 0x6e4   : > { %5282 = vmatmul.mubr.msk.f32.gmra.mrb[80].mxu1 %vm974_vm5, %v1830_v14 }
 0x6e5   : > { %v6083_v48 = vpop.eup %6082  ;;  %5284 = vmatprep.mubr.msk.f32.mxu1 %vm6189_vm1, %v6190_v19 }
 0x6e6   : > { %v1816_v51 = vpop.xlane.xlu0 %1815  ;;  %v1831_v52 = vmul.f32 %v6083_v48, %v6913_v24  ;;  %v5909_v24 = vpack.c.bf16 %v4403_v31, %v4402_v22 }
 0x6e7   : > { %6088 = vrcp.f32 %v1816_v51 }
 0x6e8   : > { %5285 = vmatmul.mubr.msk.f32.gmra.mrb[82].mxu1 %vm974_vm5, %v1831_v52 }
 0x6e9   : > { %v6085_v53 = vpop.eup %6084  ;;  %5287 = vmatprep.mubr.msk.f32.mxu1 %vm6189_vm1, %v6190_v19 }
 0x6ea   : > { %v1832_v56 = vmul.f32 %v6085_v53, %v6917_v38 }
 0x6ec   : > { %5288 = vmatmul.mubr.msk.f32.gmra.mrb[84].mxu1 %vm974_vm5, %v1832_v56 }
 0x6ed   : > { %v6087_v15 = vpop.eup %6086  ;;  %5290 = vmatprep.mubr.msk.f32.mxu1 %vm6189_vm1, %v6190_v19 }
 0x6ee   : > { %v1833_v57 = vmul.f32 %v6087_v15, %v6922_v33 }
 0x6f0   : > { %5291 = vmatmul.mubr.msk.f32.gmra.mrb[86].mxu1 %vm974_vm5, %v1833_v57 }
 0x6f1   : > { %v6089_v60 = vpop.eup %6088  ;;  %5293 = vmatprep.mubr.msk.f32.mxu1 %vm6189_vm1, %v6190_v19 }
 0x6f2   : > { %v1834_v27 = vmul.f32 %v6089_v60, %v6927_v43 }
 0x6f4   : > { %5294 = vmatmul.mubr.msk.f32.gmra.mrb[88].mxu1 %vm974_vm5, %v1834_v27 }
 0x6f5   : > { %5331 = vmatprep.mubr.msk.f32.mxu1 %vm6189_vm1, %v6190_v19 }
 0x6f8   : > { %5332 = vmatmul.mubr.msk.f32.vlgmr.msra.gmra.mrb[90].mxu1 %vm809_vm3, %v6816_v25  ;;  %v7031_v25 = vld [vmem:[#allocation2] sm:$0xff] }
 0x6f9   : > { %5334 = vmatprep.mubr.msk.f32.mxu1 %vm6189_vm1, %v6190_v19  ;;  %5916 = vmatpush3.bf16.msra.mxu1 %v5915_v62 }
 0x6fa   : > { %5917 = vmatprep.subr.bf16.mxu1 %v6188_v5 }
 0x6fc   : > { %5335 = vmatmul.mubr.msk.f32.gmra.mrb[92].mxu1 %vm809_vm3, %v6818_v32  ;;  %v7037_v32 = vld [vmem:[#allocation2 + $0x8] sm:$0xff] }
 0x6fd   : > { %5337 = vmatprep.mubr.msk.f32.mxu1 %vm6189_vm1, %v6190_v19  ;;  %5919 = vmatpush3.bf16.msra.mxu1 %v5918_v17 }
 0x6fe   : > { %5926 = vmatprep.subr.bf16.mxu1 %v6188_v5 }
 0x700   : > { %5338 = vmatmul.mubr.msk.f32.gmra.mrb[94].mxu1 %vm809_vm3, %v6820_v36  ;;  %v7043_v36 = vld [vmem:[#allocation2 + $0x10] sm:$0xff] }
 0x701   : > { %5340 = vmatprep.mubr.msk.f32.mxu1 %vm6189_vm1, %v6190_v19 }
 0x704   : > { %5341 = vmatmul.mubr.msk.f32.gmra.mrb[96].mxu1 %vm809_vm3, %v6822_v40  ;;  %v7049_v40 = vld [vmem:[#allocation2 + $0x18] sm:$0xff] }
 0x705   : > { %5343 = vmatprep.mubr.msk.f32.mxu1 %vm6189_vm1, %v6190_v19 }
 0x708   : > { %5344 = vmatmul.mubr.msk.f32.gmra.mrb[98].mxu1 %vm809_vm3, %v6824_v26  ;;  %v7055_v26 = vld [vmem:[#allocation2 + $0x20] sm:$0xff] }
 0x709   : > { %5346 = vmatprep.mubr.msk.f32.mxu1 %vm6189_vm1, %v6190_v19 }
 0x70c   : > { %5347 = vmatmul.mubr.msk.f32.gmra.mrb[100].mxu1 %vm809_vm3, %v6826_v37  ;;  %v7061_v37 = vld [vmem:[#allocation2 + $0x28] sm:$0xff] }
 0x70d   : > { %5349 = vmatprep.mubr.msk.f32.mxu1 %vm6189_vm1, %v6190_v19 }
 0x710   : > { %5350 = vmatmul.mubr.msk.f32.gmra.mrb[102].mxu1 %vm809_vm3, %v6828_v29  ;;  %v7067_v29 = vld [vmem:[#allocation2 + $0x30] sm:$0xff] }
 0x711   : > { %5352 = vmatprep.mubr.msk.f32.mxu1 %vm6189_vm1, %v6190_v19 }
 0x714   : > { %5353 = vmatmul.mubr.msk.f32.gmra.mrb[104].mxu1 %vm809_vm3, %v6830_v35  ;;  %v7073_v35 = vld [vmem:[#allocation2 + $0x38] sm:$0xff] }
 0x715   : > { %5355 = vmatprep.mubr.msk.f32.mxu1 %vm6189_vm1, %v6190_v19 }
 0x718   : > { %5356 = vmatmul.mubr.msk.f32.gmra.mrb[106].mxu1 %vm809_vm3, %v6832_v44  ;;  %v7079_v44 = vld [vmem:[#allocation2 + $0x40] sm:$0x3] }
 0x719   : > { %5401 = vmatprep.mubr.msk.f32.mxu1 %vm6189_vm1, %v6190_v19 }
 0x71c   : > { %5402 = vmatmul.mubr.msk.f32.vlgmr.msra.gmra.mrb[108].mxu1 %vm408_vm2, %v7031_v25 }
 0x71d   : > { %5404 = vmatprep.mubr.msk.f32.mxu1 %vm6189_vm1, %v6190_v19 }
 0x720   : > { %5405 = vmatmul.mubr.msk.f32.gmra.mrb[110].mxu1 %vm408_vm2, %v7037_v32 }
 0x721   : > { %5407 = vmatprep.mubr.msk.f32.mxu1 %vm6189_vm1, %v6190_v19 }
 0x724   : > { %5408 = vmatmul.mubr.msk.f32.gmra.mrb[112].mxu1 %vm408_vm2, %v7043_v36 }
 0x725   : > { %5410 = vmatprep.mubr.msk.f32.mxu1 %vm6189_vm1, %v6190_v19 }
 0x728   : > { %5411 = vmatmul.mubr.msk.f32.gmra.mrb[114].mxu1 %vm408_vm2, %v7049_v40 }
 0x729   : > { %5413 = vmatprep.mubr.msk.f32.mxu1 %vm6189_vm1, %v6190_v19 }
 0x72c   : > { %5414 = vmatmul.mubr.msk.f32.gmra.mrb[116].mxu1 %vm408_vm2, %v7055_v26 }
 0x72d   : > { %5416 = vmatprep.mubr.msk.f32.mxu1 %vm6189_vm1, %v6190_v19 }
 0x730   : > { %5417 = vmatmul.mubr.msk.f32.gmra.mrb[118].mxu1 %vm408_vm2, %v7061_v37 }
 0x731   : > { %5419 = vmatprep.mubr.msk.f32.mxu1 %vm6189_vm1, %v6190_v19 }
 0x734   : > { %5420 = vmatmul.mubr.msk.f32.gmra.mrb[120].mxu1 %vm408_vm2, %v7067_v29 }
 0x735   : > { %5422 = vmatprep.mubr.msk.f32.mxu1 %vm6189_vm1, %v6190_v19 }
 0x738   : > { %5423 = vmatmul.mubr.msk.f32.gmra.mrb[122].mxu1 %vm408_vm2, %v7073_v35 }
 0x739   : > { %5425 = vmatprep.mubr.msk.f32.mxu1 %vm6189_vm1, %v6190_v19 }
 0x73c   : > { %5426 = vmatmul.mubr.msk.f32.gmra.mrb[124].mxu1 %vm408_vm2, %v7079_v44 }
 0x73d   : > { %5481 = vmatprep.mubr.msk.f32.mxu1 %vm6189_vm1, %v6190_v19 }
 0x7a7   : > { %v1931_v38 = vpop.f32.mrb[72].mxu1 }
 0x7a8   : > { %v5271_v41 = vpop.f32.mrb[73].mxu1  ;;  %5301 = vmatmul.mubr.msk.f32.vlgmr.msra.gmra.mrb[90].mxu0 %vm809_vm3, %v1931_v38 }
 0x7a9   : > { %5303 = vmatprep.mubr.msk.f32.mxu0 %vm6189_vm1, %v6190_v19  ;;  %5910 = vmatpush3.bf16.msra.mxu0 %v5909_v24 }
 0x7aa   : > { %5911 = vmatprep.subr.bf16.mxu0 %v6188_v5 }
 0x7ab   : > { %v1936_v42 = vpop.f32.mrb[74].mxu1 }
 0x7ac   : > { %v5274_v33 = vpop.f32.mrb[75].mxu1  ;;  %5304 = vmatmul.mubr.msk.f32.gmra.mrb[92].mxu0 %vm809_vm3, %v1936_v42 }
 0x7ad   : > { %5306 = vmatprep.mubr.msk.f32.mxu0 %vm6189_vm1, %v6190_v19  ;;  %5913 = vmatpush3.bf16.msra.mxu0 %v5912_v28 }
 0x7ae   : > { %5920 = vmatprep.subr.bf16.mxu0 %v6188_v5 }
 0x7af   : > { %v1941_v39 = vpop.f32.mrb[76].mxu1 }
 0x7b0   : > { %v5277_v43 = vpop.f32.mrb[77].mxu1  ;;  %5307 = vmatmul.mubr.msk.f32.gmra.mrb[94].mxu0 %vm809_vm3, %v1941_v39 }
 0x7b1   : > { %5309 = vmatprep.mubr.msk.f32.mxu0 %vm6189_vm1, %v6190_v19 }
 0x7b3   : > { %v1946_v45 = vpop.f32.mrb[78].mxu1 }
 0x7b4   : > { %v5280_v46 = vpop.f32.mrb[79].mxu1  ;;  %5310 = vmatmul.mubr.msk.f32.gmra.mrb[96].mxu0 %vm809_vm3, %v1946_v45 }
 0x7b5   : > { %5312 = vmatprep.mubr.msk.f32.mxu0 %vm6189_vm1, %v6190_v19 }
 0x7b7   : > { %v1951_v50 = vpop.f32.mrb[80].mxu1 }
 0x7b8   : > { %v5283_v47 = vpop.f32.mrb[81].mxu1  ;;  %5313 = vmatmul.mubr.msk.f32.gmra.mrb[98].mxu0 %vm809_vm3, %v1951_v50 }
 0x7b9   : > { %5315 = vmatprep.mubr.msk.f32.mxu0 %vm6189_vm1, %v6190_v19 }
 0x7bb   : > { %v1956_v54 = vpop.f32.mrb[82].mxu1 }
 0x7bc   : > { %v5286_v55 = vpop.f32.mrb[83].mxu1  ;;  %5316 = vmatmul.mubr.msk.f32.gmra.mrb[100].mxu0 %vm809_vm3, %v1956_v54 }
 0x7bd   : > { %5318 = vmatprep.mubr.msk.f32.mxu0 %vm6189_vm1, %v6190_v19 }
 0x7bf   : > { %v1961_v58 = vpop.f32.mrb[84].mxu1 }
 0x7c0   : > { %v5289_v59 = vpop.f32.mrb[85].mxu1  ;;  %5319 = vmatmul.mubr.msk.f32.gmra.mrb[102].mxu0 %vm809_vm3, %v1961_v58 }
 0x7c1   : > { %5321 = vmatprep.mubr.msk.f32.mxu0 %vm6189_vm1, %v6190_v19 }
 0x7c3   : > { %v1966_v63 = vpop.f32.mrb[86].mxu1 }
 0x7c4   : > { %v5292_v1 = vpop.f32.mrb[87].mxu1  ;;  %5322 = vmatmul.mubr.msk.f32.gmra.mrb[104].mxu0 %vm809_vm3, %v1966_v63 }
 0x7c5   : > { %5324 = vmatprep.mubr.msk.f32.mxu0 %vm6189_vm1, %v6190_v19 }
 0x7c7   : > { %v1971_v3 = vpop.f32.mrb[88].mxu1 }
 0x7c8   : > { %v5295_v16 = vpop.f32.mrb[89].mxu1  ;;  %5325 = vmatmul.mubr.msk.f32.gmra.mrb[106].mxu0 %vm809_vm3, %v1971_v3 }
 0x7c9   : > { %5366 = vmatprep.mubr.msk.f32.mxu0 %vm6189_vm1, %v6190_v19 }
 0x7cb   : > { %v7138_v7 = vpop.f32.mrb[90].mxu1 }
 0x7cc   : > { %v5333_v8 = vpop.f32.mrb[91].mxu1  ;;  %5367 = vmatmul.mubr.msk.f32.vlgmr.msra.gmra.mrb[108].mxu0 %vm408_vm2, %v7031_v25 }
 0x7cd   : > { %5369 = vmatprep.mubr.msk.f32.mxu0 %vm6189_vm1, %v6190_v19  ;;  %5922 = vmatpush3.bf16.msra.mxu0 %v5921_v4 }
 0x7ce   : > { %5923 = vmatprep.subr.bf16.mxu0 %v6188_v5 }
 0x7cf   : > { %v7145_v2 = vpop.f32.mrb[92].mxu1 }
 0x7d0   : > { %v5336_v23 = vpop.f32.mrb[93].mxu1  ;;  %5370 = vmatmul.mubr.msk.f32.gmra.mrb[110].mxu0 %vm408_vm2, %v7037_v32 }
 0x7d1   : > { %5372 = vmatprep.mubr.msk.f32.mxu0 %vm6189_vm1, %v6190_v19  ;;  %5925 = vmatpush3.bf16.msra.mxu0 %v5924_v9 }
 0x7d2   : > { %5942 = vmatprep.subr.bf16.mxu0 %v6188_v5 }
 0x7d3   : > { %v7152_v12 = vpop.f32.mrb[94].mxu1 }
 0x7d4   : > { %v5339_v6 = vpop.f32.mrb[95].mxu1  ;;  %5373 = vmatmul.mubr.msk.f32.gmra.mrb[112].mxu0 %vm408_vm2, %v7043_v36 }
 0x7d5   : > { %5375 = vmatprep.mubr.msk.f32.mxu0 %vm6189_vm1, %v6190_v19 }
 0x7d7   : > { %v7158_v14 = vpop.f32.mrb[96].mxu1 }
 0x7d8   : > { %v5342_v48 = vpop.f32.mrb[97].mxu1  ;;  %5376 = vmatmul.mubr.msk.f32.gmra.mrb[114].mxu0 %vm408_vm2, %v7049_v40 }
 0x7d9   : > { %5378 = vmatprep.mubr.msk.f32.mxu0 %vm6189_vm1, %v6190_v19 }
 0x7db   : > { %v7164_v51 = vpop.f32.mrb[98].mxu1 }
 0x7dc   : > { %v5345_v52 = vpop.f32.mrb[99].mxu1  ;;  %5379 = vmatmul.mubr.msk.f32.gmra.mrb[116].mxu0 %vm408_vm2, %v7055_v26 }
 0x7dd   : > { %5381 = vmatprep.mubr.msk.f32.mxu0 %vm6189_vm1, %v6190_v19 }
 0x7df   : > { %v7170_v53 = vpop.f32.mrb[100].mxu1 }
 0x7e0   : > { %v5348_v56 = vpop.f32.mrb[101].mxu1  ;;  %5382 = vmatmul.mubr.msk.f32.gmra.mrb[118].mxu0 %vm408_vm2, %v7061_v37 }
 0x7e1   : > { %5384 = vmatprep.mubr.msk.f32.mxu0 %vm6189_vm1, %v6190_v19 }
 0x7e3   : > { %v7176_v15 = vpop.f32.mrb[102].mxu1 }
 0x7e4   : > { %v5351_v57 = vpop.f32.mrb[103].mxu1  ;;  %5385 = vmatmul.mubr.msk.f32.gmra.mrb[120].mxu0 %vm408_vm2, %v7067_v29 }
 0x7e5   : > { %5387 = vmatprep.mubr.msk.f32.mxu0 %vm6189_vm1, %v6190_v19 }
 0x7e7   : > { %v7182_v60 = vpop.f32.mrb[104].mxu1 }
 0x7e8   : > { %v5354_v27 = vpop.f32.mrb[105].mxu1  ;;  %5388 = vmatmul.mubr.msk.f32.gmra.mrb[122].mxu0 %vm408_vm2, %v7073_v35 }
 0x7e9   : > { %5390 = vmatprep.mubr.msk.f32.mxu0 %vm6189_vm1, %v6190_v19 }
 0x7eb   : > { %v7188_v11 = vpop.f32.mrb[106].mxu1 }
 0x7ec   : > { %v5357_v18 = vpop.f32.mrb[107].mxu1  ;;  %5391 = vmatmul.mubr.msk.f32.gmra.mrb[124].mxu0 %vm408_vm2, %v7079_v44 }
 0x7ed   : > { %5436 = vmatprep.mubr.msk.f32.mxu0 %vm6189_vm1, %v6190_v19 }
 0x7ef   : > { %v2447_v62 = vpop.f32.mrb[108].mxu1 }
 0x7f0   : > { %v5403_v0 = vpop.f32.mrb[109].mxu1  ;;  %5437 = vmatmul.mubr.msk.f32.vlgmr.msra.gmra.mrb[126].mxu0 %vm408_vm2, %v7031_v25 }
 0x7f1   : > { %5439 = vmatprep.mubr.msk.f32.mxu0 %vm6189_vm1, %v6190_v19 }
 0x7f3   : > { %v2452_v21 = vpop.f32.mrb[110].mxu1 }
 0x7f4   : > { %v5927_v17 = vpack.c.bf16 %v2452_v21, %v2447_v62  ;;  %v5406_v22 = vpop.f32.mrb[111].mxu1  ;;  %5440 = vmatmul.mubr.msk.f32.gmra.mrb[128].mxu0 %vm408_vm2, %v7037_v32 }
 0x7f5   : > { %5442 = vmatprep.mubr.msk.f32.mxu0 %vm6189_vm1, %v6190_v19 }
 0x7f6   : > { %5929 = vmatpush3.bf16.xpose.msk.msra.mxu1 %vm6455_vm4, %v5927_v17 }
 0x7f7   : > { %v2457_v31 = vpop.f32.mrb[112].mxu1  ;;  %5930 = vmatprep.subr.bf16.mxu1 %v6188_v5 }
 0x7f8   : > { %v5409_v24 = vpop.f32.mrb[113].mxu1  ;;  %5443 = vmatmul.mubr.msk.f32.gmra.mrb[130].mxu0 %vm408_vm2, %v7043_v36 }
 0x7f9   : > { %5445 = vmatprep.mubr.msk.f32.mxu0 %vm6189_vm1, %v6190_v19 }
 0x7fb   : > { %v2462_v30 = vpop.f32.mrb[114].mxu1 }
 0x7fc   : > { %v5931_v34 = vpack.c.bf16 %v2462_v30, %v2457_v31  ;;  %v5412_v38 = vpop.f32.mrb[115].mxu1  ;;  %5446 = vmatmul.mubr.msk.f32.gmra.mrb[132].mxu0 %vm408_vm2, %v7049_v40 }
 0x7fd   : > { %5448 = vmatprep.mubr.msk.f32.mxu0 %vm6189_vm1, %v6190_v19 }
 0x7fe   : > { %5933 = vmatpush3.bf16.xpose.msk.msra.mxu1 %vm6455_vm4, %v5931_v34 }
 0x7ff   : > { %v2467_v41 = vpop.f32.mrb[116].mxu1  ;;  %5934 = vmatprep.subr.bf16.mxu1 %v6188_v5 }
 0x800   : > { %v5415_v28 = vpop.f32.mrb[117].mxu1  ;;  %5449 = vmatmul.mubr.msk.f32.gmra.mrb[134].mxu0 %vm408_vm2, %v7055_v26 }
 0x801   : > { %5451 = vmatprep.mubr.msk.f32.mxu0 %vm6189_vm1, %v6190_v19 }
 0x803   : > { %v2472_v42 = vpop.f32.mrb[118].mxu1 }
 0x804   : > { %v5935_v33 = vpack.c.bf16 %v2472_v42, %v2467_v41  ;;  %v5418_v39 = vpop.f32.mrb[119].mxu1  ;;  %5452 = vmatmul.mubr.msk.f32.gmra.mrb[136].mxu0 %vm408_vm2, %v7061_v37 }
 0x805   : > { %5454 = vmatprep.mubr.msk.f32.mxu0 %vm6189_vm1, %v6190_v19 }
 0x806   : > { %5937 = vmatpush3.bf16.xpose.msk.msra.mxu1 %vm6455_vm4, %v5935_v33 }
 0x807   : > { %v2477_v43 = vpop.f32.mrb[120].mxu1  ;;  %5938 = vmatprep.subr.bf16.mxu1 %v6188_v5 }
 0x808   : > { %v5421_v45 = vpop.f32.mrb[121].mxu1  ;;  %5455 = vmatmul.mubr.msk.f32.gmra.mrb[138].mxu0 %vm408_vm2, %v7067_v29 }
 0x809   : > { %5457 = vmatprep.mubr.msk.f32.mxu0 %vm6189_vm1, %v6190_v19 }
 0x80b   : > { %v2482_v46 = vpop.f32.mrb[122].mxu1 }
 0x80c   : > { %v5939_v50 = vpack.c.bf16 %v2482_v46, %v2477_v43  ;;  %v5424_v47 = vpop.f32.mrb[123].mxu1  ;;  %5458 = vmatmul.mubr.msk.f32.gmra.mrb[140].mxu0 %vm408_vm2, %v7073_v35 }
 0x80d   : > { %5460 = vmatprep.mubr.msk.f32.mxu0 %vm6189_vm1, %v6190_v19 }
 0x80e   : > { %5941 = vmatpush3.bf16.xpose.msk.msra.mxu1 %vm6455_vm4, %v5939_v50 }
 0x80f   : > { %5479 = vmatprep.subr.mxu1 %v6190_v19  ;;  %v2487_v54 = vpop.f32.mrb[124].mxu1 }
 0x810   : > { %5461 = vmatmul.mubr.msk.f32.gmra.mrb[142].mxu0 %vm408_vm2, %v7079_v44  ;;  %v5427_v55 = vpop.f32.mrb[125].mxu1 }
 0x811   : > { %5526 = vmatprep.mubr.msk.f32.mxu0 %vm6189_vm1, %v6190_v19 }
 0x816   : > { %5480 = vmatpush3.xpose.msk.msra.mxu1 %vm809_vm3, %v2487_v54 }
 0x817   : > { %5954 = vmatprep.subr.bf16.mxu1 %v6188_v5 }
 0x87b   : > { %v2071_v58 = vpop.f32.mrb[90].mxu0 }
 0x87c   : > { %v7245_v59 = vadd.f32 %v7138_v7, %v2071_v58  ;;  %v5302_v63 = vpop.f32.mrb[91].mxu0 }
 0x87f   : > { %v2076_v1 = vpop.f32.mrb[92].mxu0 }
 0x880   : > { %v7248_v10 = vadd.f32 %v7145_v2, %v2076_v1  ;;  %v5305_v13 = vpop.f32.mrb[93].mxu0 }
 0x883   : > { %v2081_v3 = vpop.f32.mrb[94].mxu0 }
 0x884   : > { %v7251_v16 = vadd.f32 %v7152_v12, %v2081_v3  ;;  %v5308_v4 = vpop.f32.mrb[95].mxu0 }
 0x887   : > { %v2086_v61 = vpop.f32.mrb[96].mxu0 }
 0x888   : > { %v7254_v20 = vadd.f32 %v7158_v14, %v2086_v61  ;;  %v5311_v8 = vpop.f32.mrb[97].mxu0 }
 0x88b   : > { %v2091_v9 = vpop.f32.mrb[98].mxu0 }
 0x88c   : > { %v7257_v7 = vadd.f32 %v7164_v51, %v2091_v9  ;;  %v5314_v23 = vpop.f32.mrb[99].mxu0 }
 0x88f   : > { %v2096_v6 = vpop.f32.mrb[100].mxu0 }
 0x890   : > { %v7260_v2 = vadd.f32 %v7170_v53, %v2096_v6  ;;  %v5317_v48 = vpop.f32.mrb[101].mxu0 }
 0x893   : > { %v2101_v52 = vpop.f32.mrb[102].mxu0 }
 0x894   : > { %v7263_v12 = vadd.f32 %v7176_v15, %v2101_v52  ;;  %v5320_v56 = vpop.f32.mrb[103].mxu0 }
 0x897   : > { %v2106_v57 = vpop.f32.mrb[104].mxu0 }
 0x898   : > { %v7266_v14 = vadd.f32 %v7182_v60, %v2106_v57  ;;  %v5323_v27 = vpop.f32.mrb[105].mxu0 }
 0x89b   : > { %v2111_v18 = vpop.f32.mrb[106].mxu0 }
 0x89c   : > { %v7269_v51 = vadd.f32 %v7188_v11, %v2111_v18  ;;  %v5326_v62 = vpop.f32.mrb[107].mxu0 }
 0x89f   : > { %v2323_v0 = vpop.f32.mrb[108].mxu0 }
 0x8a0   : > { %v2367_v21 = vmul.f32 0.25, %v2323_v0  ;;  %v5368_v53 = vpop.f32.mrb[109].mxu0 }
 0x8a2   : > { %5482 = vmatmul.mubr.msk.f32.vlgmr.msra.gmra.mrb[126].mxu1 %vm809_vm3, %v2367_v21 }
 0x8a3   : > { %v2328_v17 = vpop.f32.mrb[110].mxu0  ;;  %5484 = vmatprep.mubr.msk.f32.mxu1 %vm6189_vm1, %v6190_v19 }
 0x8a4   : > { %v2368_v15 = vmul.f32 0.25, %v2328_v17  ;;  %v5371_v22 = vpop.f32.mrb[111].mxu0 }
 0x8a6   : > { %5485 = vmatmul.mubr.msk.f32.gmra.mrb[128].mxu1 %vm809_vm3, %v2368_v15 }
 0x8a7   : > { %v2333_v60 = vpop.f32.mrb[112].mxu0  ;;  %5487 = vmatprep.mubr.msk.f32.mxu1 %vm6189_vm1, %v6190_v19 }
 0x8a8   : > { %v2369_v11 = vmul.f32 0.25, %v2333_v60  ;;  %v5374_v31 = vpop.f32.mrb[113].mxu0 }
 0x8aa   : > { %5488 = vmatmul.mubr.msk.f32.gmra.mrb[130].mxu1 %vm809_vm3, %v2369_v11 }
 0x8ab   : > { %v2338_v24 = vpop.f32.mrb[114].mxu0  ;;  %5490 = vmatprep.mubr.msk.f32.mxu1 %vm6189_vm1, %v6190_v19 }
 0x8ac   : > { %v2370_v30 = vmul.f32 0.25, %v2338_v24  ;;  %v5377_v34 = vpop.f32.mrb[115].mxu0 }
 0x8ae   : > { %5491 = vmatmul.mubr.msk.f32.gmra.mrb[132].mxu1 %vm809_vm3, %v2370_v30 }
 0x8af   : > { %v2343_v38 = vpop.f32.mrb[116].mxu0  ;;  %5493 = vmatprep.mubr.msk.f32.mxu1 %vm6189_vm1, %v6190_v19 }
 0x8b0   : > { %v2371_v41 = vmul.f32 0.25, %v2343_v38  ;;  %v5380_v28 = vpop.f32.mrb[117].mxu0 }
 0x8b2   : > { %5494 = vmatmul.mubr.msk.f32.gmra.mrb[134].mxu1 %vm809_vm3, %v2371_v41 }
 0x8b3   : > { %v2348_v42 = vpop.f32.mrb[118].mxu0  ;;  %5496 = vmatprep.mubr.msk.f32.mxu1 %vm6189_vm1, %v6190_v19 }
 0x8b4   : > { %v2372_v33 = vmul.f32 0.25, %v2348_v42  ;;  %v5383_v39 = vpop.f32.mrb[119].mxu0 }
 0x8b6   : > { %5497 = vmatmul.mubr.msk.f32.gmra.mrb[136].mxu1 %vm809_vm3, %v2372_v33 }
 0x8b7   : > { %v2353_v43 = vpop.f32.mrb[120].mxu0  ;;  %5499 = vmatprep.mubr.msk.f32.mxu1 %vm6189_vm1, %v6190_v19 }
 0x8b8   : > { %v2373_v45 = vmul.f32 0.25, %v2353_v43  ;;  %v5386_v46 = vpop.f32.mrb[121].mxu0 }
 0x8ba   : > { %5500 = vmatmul.mubr.msk.f32.gmra.mrb[138].mxu1 %vm809_vm3, %v2373_v45 }
 0x8bb   : > { %v2358_v50 = vpop.f32.mrb[122].mxu0  ;;  %5502 = vmatprep.mubr.msk.f32.mxu1 %vm6189_vm1, %v6190_v19 }
 0x8bc   : > { %v2374_v47 = vmul.f32 0.25, %v2358_v50  ;;  %v5389_v54 = vpop.f32.mrb[123].mxu0 }
 0x8be   : > { %5503 = vmatmul.mubr.msk.f32.gmra.mrb[140].mxu1 %vm809_vm3, %v2374_v47 }
 0x8bf   : > { %v2363_v55 = vpop.f32.mrb[124].mxu0  ;;  %5505 = vmatprep.mubr.msk.f32.mxu1 %vm6189_vm1, %v6190_v19 }
 0x8c0   : > { %v2375_v58 = vmul.f32 0.25, %v2363_v55  ;;  %v5392_v63 = vpop.f32.mrb[125].mxu0 }
 0x8c2   : > { %5506 = vmatmul.mubr.msk.f32.gmra.mrb[142].mxu1 %vm809_vm3, %v2375_v58 }
 0x8c3   : > { %v2562_v1 = vpop.f32.mrb[126].mxu0  ;;  %5557 = vmatprep.mubr.msk.f32.mxu1 %vm6189_vm1, %v6190_v19 }
 0x8c4   : > { %v5438_v13 = vpop.f32.mrb[127].mxu0 }
 0x8c7   : > { %v2567_v3 = vpop.f32.mrb[128].mxu0 }
 0x8c8   : > { %v5943_v4 = vpack.c.bf16 %v2567_v3, %v2562_v1  ;;  %v5441_v61 = vpop.f32.mrb[129].mxu0 }
 0x8ca   : > { %5944 = vmatpush3.bf16.msra.mxu0 %v5943_v4 }
 0x8cb   : > { %v2572_v8 = vpop.f32.mrb[130].mxu0  ;;  %5945 = vmatprep.subr.bf16.mxu0 %v6188_v5 }
 0x8cc   : > { %v5444_v9 = vpop.f32.mrb[131].mxu0 }
 0x8cf   : > { %v2577_v23 = vpop.f32.mrb[132].mxu0 }
 0x8d0   : > { %v5946_v6 = vpack.c.bf16 %v2577_v23, %v2572_v8  ;;  %v5447_v48 = vpop.f32.mrb[133].mxu0 }
 0x8d2   : > { %5947 = vmatpush3.bf16.msra.mxu0 %v5946_v6 }
 0x8d3   : > { %v2582_v52 = vpop.f32.mrb[134].mxu0  ;;  %5948 = vmatprep.subr.bf16.mxu0 %v6188_v5 }
 0x8d4   : > { %v5450_v56 = vpop.f32.mrb[135].mxu0 }
 0x8d7   : > { %v2587_v57 = vpop.f32.mrb[136].mxu0 }
 0x8d8   : > { %v5949_v27 = vpack.c.bf16 %v2587_v57, %v2582_v52  ;;  %v5453_v18 = vpop.f32.mrb[137].mxu0 }
 0x8da   : > { %5950 = vmatpush3.bf16.msra.mxu0 %v5949_v27 }
 0x8db   : > { %v2592_v62 = vpop.f32.mrb[138].mxu0  ;;  %5951 = vmatprep.subr.bf16.mxu0 %v6188_v5 }
 0x8dc   : > { %v5456_v0 = vpop.f32.mrb[139].mxu0 }
 0x8df   : > { %v2597_v21 = vpop.f32.mrb[140].mxu0 }
 0x8e0   : > { %v5952_v53 = vpack.c.bf16 %v2597_v21, %v2592_v62  ;;  %v5459_v17 = vpop.f32.mrb[141].mxu0 }
 0x8e2   : > { %5953 = vmatpush3.bf16.msra.mxu0 %v5952_v53 }
 0x8e3   : > { %5524 = vmatprep.subr.mxu0 %v6190_v19 }
 0x975   : > { %v2726_v15 = vpop.f32.mrb[126].mxu1 }
 0x976   : > { %v5483_v22 = vpop.f32.mrb[127].mxu1  ;;  %v2770_v60 = vsel %vm974_vm5, %v2726_v15, -inf }
 0x977   : > { %2771 = vmax.xlane.f32.xlu1 %v2770_v60 }
 0x979   : > { %v2731_v11 = vpop.f32.mrb[128].mxu1 }
 0x97a   : > { %v5486_v31 = vpop.f32.mrb[129].mxu1  ;;  %v2773_v24 = vsel %vm974_vm5, %v2731_v11, -inf }
 0x97b   : > { %2774 = vmax.xlane.f32.xlu0 %v2773_v24 }
 0x97d   : > { %v2736_v30 = vpop.f32.mrb[130].mxu1 }
 0x97e   : > { %v5489_v34 = vpop.f32.mrb[131].mxu1  ;;  %v2776_v38 = vsel %vm974_vm5, %v2736_v30, -inf }
 0x97f   : > { %2777 = vmax.xlane.f32.xlu1 %v2776_v38 }
 0x981   : > { %v2741_v41 = vpop.f32.mrb[132].mxu1 }
 0x982   : > { %v5492_v28 = vpop.f32.mrb[133].mxu1  ;;  %v2779_v42 = vsel %vm974_vm5, %v2741_v41, -inf }
 0x983   : > { %2780 = vmax.xlane.f32.xlu0 %v2779_v42 }
 0x985   : > { %v2746_v33 = vpop.f32.mrb[134].mxu1 }
 0x986   : > { %v5495_v39 = vpop.f32.mrb[135].mxu1  ;;  %v2782_v43 = vsel %vm974_vm5, %v2746_v33, -inf }
 0x987   : > { %2783 = vmax.xlane.f32.xlu1 %v2782_v43 }
 0x989   : > { %v2751_v45 = vpop.f32.mrb[136].mxu1 }
 0x98a   : > { %v5498_v46 = vpop.f32.mrb[137].mxu1  ;;  %v2785_v50 = vsel %vm974_vm5, %v2751_v45, -inf }
 0x98b   : > { %2786 = vmax.xlane.f32.xlu0 %v2785_v50 }
 0x98d   : > { %v2756_v47 = vpop.f32.mrb[138].mxu1 }
 0x98e   : > { %v5501_v54 = vpop.f32.mrb[139].mxu1  ;;  %v2788_v55 = vsel %vm974_vm5, %v2756_v47, -inf }
 0x98f   : > { %2789 = vmax.xlane.f32.xlu1 %v2788_v55 }
 0x991   : > { %v2761_v58 = vpop.f32.mrb[140].mxu1 }
 0x992   : > { %v5504_v63 = vpop.f32.mrb[141].mxu1  ;;  %v2791_v1 = vsel %vm974_vm5, %v2761_v58, -inf }
 0x993   : > { %2792 = vmax.xlane.f32.xlu0 %v2791_v1 }
 0x995   : > { %v2766_v13 = vpop.f32.mrb[142].mxu1 }
 0x996   : > { %v5507_v3 = vpop.f32.mrb[143].mxu1  ;;  %v2794_v4 = vsel %vm999_vm6, %v2766_v13, -inf }
 0x997   : > { %2795 = vmax.xlane.f32.xlu1 %v2794_v4  ;;  %v2602_v4 = vpop.f32.mrb[142].mxu0 }
 0x998   : > { %5525 = vmatpush3.msk.msra.mxu0 %vm1102_vm7, %v2602_v4  ;;  %v4507_v4 = vld [vmem:[%s7818_s5 + $0x68] sm:$0xff] }
 0x999   : > { %5957 = vmatprep.subr.bf16.mxu0 %v6188_v5 }
 0xa04   : > { %v2772_v61 = vpop.xlane.xlu1 %2771 }
 0xa05   : > { %v2797_v8 = vsub.f32 %v2726_v15, %v2772_v61  ;;  %v5462_v61 = vpop.f32.mrb[143].mxu0 }
 0xa07   : > { %v2806_v9 = vmul.f32 1.442695, %v2797_v8 }
 0xa08   : > { %v2775_v23 = vpop.xlane.xlu0 %2774 }
 0xa09   : > { %6090 = vpow2.f32 %v2806_v9  ;;  %v2798_v6 = vsub.f32 %v2731_v11, %v2775_v23 }
 0xa0b   : > { %v2808_v48 = vmul.f32 1.442695, %v2798_v6  ;;  %v4469_v6 = vld [vmem:[%s7819_s6 + $0x20] sm:$0xff] }
 0xa0c   : > { %v2778_v52 = vpop.xlane.xlu1 %2777 }
 0xa0d   : > { %6092 = vpow2.f32 %v2808_v48  ;;  %v2799_v56 = vsub.f32 %v2736_v30, %v2778_v52  ;;  %v4470_v48 = vld [vmem:[%s7819_s6 + $0x28] sm:$0xff] }
 0xa0e   : > { %v5955_v52 = vpack.c.bf16 %v4470_v48, %v4469_v6 }
 0xa0f   : > { %v2810_v57 = vmul.f32 1.442695, %v2799_v56 }
 0xa10   : > { %v2781_v27 = vpop.xlane.xlu0 %2780  ;;  %5956 = vmatpush3.bf16.msra.mxu1 %v5955_v52 }
 0xa11   : > { %6094 = vpow2.f32 %v2810_v57  ;;  %v2800_v18 = vsub.f32 %v2741_v41, %v2781_v27  ;;  %5963 = vmatprep.subr.bf16.mxu1 %v6188_v5 }
 0xa13   : > { %v7311_v62 = vpop.eup %6090  ;;  %v2812_v0 = vmul.f32 1.442695, %v2800_v18  ;;  %v4480_v18 = vld [vmem:[%s7816_s3 + $0x60] sm:$0xff] }
 0xa14   : > { %v2784_v21 = vpop.xlane.xlu1 %2783  ;;  %v2824_v53 = vsel %vm974_vm5, %v7311_v62, 0.0 }
 0xa15   : > { %6096 = vpow2.f32 %v2812_v0  ;;  %v2801_v17 = vsub.f32 %v2746_v33, %v2784_v21  ;;  %2825 = vadd.xlane.f32.xlu0 %v2824_v53  ;;  %v4481_v0 = vld [vmem:[%s7816_s3 + $0x68] sm:$0xff] }
 0xa16   : > { %v5958_v53 = vpack.c.bf16 %v4481_v0, %v4480_v18 }
 0xa17   : > { %v7315_v15 = vpop.eup %6092  ;;  %v2814_v22 = vmul.f32 1.442695, %v2801_v17 }
 0xa18   : > { %v2787_v60 = vpop.xlane.xlu0 %2786  ;;  %v2827_v11 = vsel %vm974_vm5, %v7315_v15, 0.0 }
 0xa19   : > { %6098 = vpow2.f32 %v2814_v22  ;;  %v2802_v31 = vsub.f32 %v2751_v45, %v2787_v60  ;;  %2828 = vadd.xlane.f32.xlu1 %v2827_v11  ;;  %v4482_v60 = vld [vmem:[%s7816_s3 + $0x70] sm:$0xff]  ;;  %v4483_v11 = vld [vmem:[%s7816_s3 + $0x78] sm:$0xff] }
 0xa1b   : > { %v7319_v24 = vpop.eup %6094  ;;  %v2816_v30 = vmul.f32 1.442695, %v2802_v31 }
 0xa1c   : > { %v2790_v34 = vpop.xlane.xlu1 %2789  ;;  %v2830_v38 = vsel %vm974_vm5, %v7319_v24, 0.0 }
 0xa1d   : > { %6100 = vpow2.f32 %v2816_v30  ;;  %v2803_v41 = vsub.f32 %v2756_v47, %v2790_v34  ;;  %2831 = vadd.xlane.f32.xlu0 %v2830_v38  ;;  %v5961_v30 = vpack.c.bf16 %v4483_v11, %v4482_v60 }
 0xa1f   : > { %v7323_v28 = vpop.eup %6096  ;;  %v2818_v42 = vmul.f32 1.442695, %v2803_v41 }
 0xa20   : > { %v2793_v33 = vpop.xlane.xlu0 %2792  ;;  %v2833_v39 = vsel %vm974_vm5, %v7323_v28, 0.0 }
 0xa21   : > { %6102 = vpow2.f32 %v2818_v42  ;;  %v2804_v43 = vsub.f32 %v2761_v58, %v2793_v33  ;;  %2834 = vadd.xlane.f32.xlu1 %v2833_v39 }
 0xa23   : > { %v7327_v45 = vpop.eup %6098  ;;  %v2820_v46 = vmul.f32 1.442695, %v2804_v43 }
 0xa24   : > { %v2796_v50 = vpop.xlane.xlu1 %2795  ;;  %v2836_v54 = vsel %vm974_vm5, %v7327_v45, 0.0 }
 0xa25   : > { %6104 = vpow2.f32 %v2820_v46  ;;  %v2805_v47 = vsub.f32 %v2766_v13, %v2796_v50  ;;  %2837 = vadd.xlane.f32.xlu0 %v2836_v54 }
 0xa27   : > { %v7331_v55 = vpop.eup %6100  ;;  %v2822_v63 = vmul.f32 1.442695, %v2805_v47 }
 0xa28   : > { %v2839_v1 = vsel %vm974_vm5, %v7331_v55, 0.0 }
 0xa29   : > { %6106 = vpow2.f32 %v2822_v63  ;;  %2840 = vadd.xlane.f32.xlu1 %v2839_v1 }
 0xa2b   : > { %v7335_v58 = vpop.eup %6102 }
 0xa2c   : > { %v2842_v3 = vsel %vm974_vm5, %v7335_v58, 0.0 }
 0xa2d   : > { %2843 = vadd.xlane.f32.xlu0 %v2842_v3 }
 0xa2f   : > { %v7340_v13 = vpop.eup %6104 }
 0xa30   : > { %v2845_v8 = vsel %vm974_vm5, %v7340_v13, 0.0 }
 0xa31   : > { %2846 = vadd.xlane.f32.xlu1 %v2845_v8  ;;  %v4509_v8 = vld [vmem:[%s7818_s5 + $0x78] sm:$0xff] }
 0xa33   : > { %v7345_v9 = vpop.eup %6106 }
 0xa34   : > { %v2848_v23 = vsel %vm999_vm6, %v7345_v9, 0.0 }
 0xa35   : > { %2849 = vadd.xlane.f32.xlu0 %v2848_v23 }
 0xaa2   : > { %v2826_v56 = vpop.xlane.xlu0 %2825 }
 0xaa3   : > { %6108 = vrcp.f32 %v2826_v56 }
 0xaa6   : > { %v2829_v57 = vpop.xlane.xlu1 %2828 }
 0xaa7   : > { %6110 = vrcp.f32 %v2829_v57 }
 0xaaa   : > { %v2832_v27 = vpop.xlane.xlu0 %2831 }
 0xaab   : > { %6112 = vrcp.f32 %v2832_v27 }
 0xaad   : > { %v6109_v21 = vpop.eup %6108 }
 0xaae   : > { %v2860_v17 = vmul.f32 %v6109_v21, %v7311_v62  ;;  %v2835_v22 = vpop.xlane.xlu1 %2834 }
 0xaaf   : > { %6114 = vrcp.f32 %v2835_v22 }
 0xab0   : > { %5527 = vmatmul.mubr.msk.f32.vlgmr.msra.gmra.mrb[144].mxu0 %vm974_vm5, %v2860_v17 }
 0xab1   : > { %v6111_v31 = vpop.eup %6110  ;;  %5529 = vmatprep.mubr.msk.f32.mxu0 %vm6189_vm1, %v6190_v19  ;;  %5959 = vmatpush3.bf16.msra.mxu0 %v5958_v53 }
 0xab2   : > { %v2838_v34 = vpop.xlane.xlu0 %2837  ;;  %v2861_v62 = vmul.f32 %v6111_v31, %v7315_v15  ;;  %5960 = vmatprep.subr.bf16.mxu0 %v6188_v5 }
 0xab3   : > { %6116 = vrcp.f32 %v2838_v34  ;;  %v6171_v34 = vld [vmem:[#allocation2] sm:$0xff] }
 0xab4   : > { %5530 = vmatmul.mubr.msk.f32.gmra.mrb[146].mxu0 %vm974_vm5, %v2861_v62 }
 0xab5   : > { %v6113_v38 = vpop.eup %6112  ;;  %5532 = vmatprep.mubr.msk.f32.mxu0 %vm6189_vm1, %v6190_v19  ;;  %5962 = vmatpush3.bf16.msra.mxu0 %v5961_v30 }
 0xab6   : > { %v2841_v41 = vpop.xlane.xlu1 %2840  ;;  %v2862_v42 = vmul.f32 %v6113_v38, %v7319_v24  ;;  %5969 = vmatprep.subr.bf16.mxu0 %v6188_v5 }
 0xab7   : > { %6118 = vrcp.f32 %v2841_v41  ;;  %v6172_v41 = vld [vmem:[#allocation2 + $0x8] sm:$0xff] }
 0xab8   : > { %5533 = vmatmul.mubr.msk.f32.gmra.mrb[148].mxu0 %vm974_vm5, %v2862_v42 }
 0xab9   : > { %v6115_v33 = vpop.eup %6114  ;;  %5535 = vmatprep.mubr.msk.f32.mxu0 %vm6189_vm1, %v6190_v19 }
 0xaba   : > { %v2844_v15 = vpop.xlane.xlu0 %2843  ;;  %v2863_v39 = vmul.f32 %v6115_v33, %v7323_v28 }
 0xabb   : > { %6120 = vrcp.f32 %v2844_v15  ;;  %v6173_v15 = vld [vmem:[#allocation2 + $0x10] sm:$0xff] }
 0xabc   : > { %5536 = vmatmul.mubr.msk.f32.gmra.mrb[150].mxu0 %vm974_vm5, %v2863_v39 }
 0xabd   : > { %v6117_v43 = vpop.eup %6116  ;;  %5538 = vmatprep.mubr.msk.f32.mxu0 %vm6189_vm1, %v6190_v19 }
 0xabe   : > { %v2847_v24 = vpop.xlane.xlu1 %2846  ;;  %v2864_v46 = vmul.f32 %v6117_v43, %v7327_v45 }
 0xabf   : > { %6122 = vrcp.f32 %v2847_v24  ;;  %v6174_v24 = vld [vmem:[#allocation2 + $0x18] sm:$0xff] }
 0xac0   : > { %5539 = vmatmul.mubr.msk.f32.gmra.mrb[152].mxu0 %vm974_vm5, %v2864_v46 }
 0xac1   : > { %v6119_v50 = vpop.eup %6118  ;;  %5541 = vmatprep.mubr.msk.f32.mxu0 %vm6189_vm1, %v6190_v19 }
 0xac2   : > { %v2850_v54 = vpop.xlane.xlu0 %2849  ;;  %v2865_v28 = vmul.f32 %v6119_v50, %v7331_v55 }
 0xac3   : > { %6124 = vrcp.f32 %v2850_v54  ;;  %v6175_v54 = vld [vmem:[#allocation2 + $0x20] sm:$0xff] }
 0xac4   : > { %5542 = vmatmul.mubr.msk.f32.gmra.mrb[154].mxu0 %vm974_vm5, %v2865_v28 }
 0xac5   : > { %v6121_v47 = vpop.eup %6120  ;;  %5544 = vmatprep.mubr.msk.f32.mxu0 %vm6189_vm1, %v6190_v19 }
 0xac6   : > { %v2866_v63 = vmul.f32 %v6121_v47, %v7335_v58  ;;  %v4506_v58 = vld [vmem:[%s7818_s5 + $0x60] sm:$0xff] }
 0xac7   : > { %v5970_v61 = vpack.c.bf16 %v4507_v4, %v4506_v58  ;;  %v6178_v4 = vld [vmem:[#allocation2 + $0x38] sm:$0xff] }
 0xac8   : > { %5545 = vmatmul.mubr.msk.f32.gmra.mrb[156].mxu0 %vm974_vm5, %v2866_v63  ;;  %v6176_v63 = vld [vmem:[#allocation2 + $0x28] sm:$0xff] }
 0xac9   : > { %v6123_v45 = vpop.eup %6122  ;;  %5547 = vmatprep.mubr.msk.f32.mxu0 %vm6189_vm1, %v6190_v19 }
 0xaca   : > { %v2867_v1 = vmul.f32 %v6123_v45, %v7340_v13  ;;  %v4508_v13 = vld [vmem:[%s7818_s5 + $0x70] sm:$0xff] }
 0xacc   : > { %5548 = vmatmul.mubr.msk.f32.gmra.mrb[158].mxu0 %vm974_vm5, %v2867_v1 }
 0xacd   : > { %v6125_v55 = vpop.eup %6124  ;;  %5550 = vmatprep.mubr.msk.f32.mxu0 %vm6189_vm1, %v6190_v19 }
 0xace   : > { %v2868_v3 = vmul.f32 %v6125_v55, %v7345_v9  ;;  %v5973_v9 = vpack.c.bf16 %v4509_v8, %v4508_v13  ;;  %v6177_v55 = vld [vmem:[#allocation2 + $0x30] sm:$0xff]  ;;  %v6179_v8 = vld [vmem:[#allocation2 + $0x40] sm:$0x3] }
 0xad0   : > { %5551 = vmatmul.mubr.msk.f32.gmra.mrb[160].mxu0 %vm974_vm5, %v2868_v3 }
 0xad1   : > { %5592 = vmatprep.mubr.msk.f32.mxu0 %vm6189_vm1, %v6190_v19 }
 0xad4   : > { %5593 = vmatmul.mubr.msk.f32.vlgmr.msra.gmra.mrb[162].mxu0 %vm408_vm2, %v7031_v25 }
 0xad5   : > { %5595 = vmatprep.mubr.msk.f32.mxu0 %vm6189_vm1, %v6190_v19  ;;  %5971 = vmatpush3.bf16.msra.mxu0 %v5970_v61 }
 0xad6   : > { %5972 = vmatprep.subr.bf16.mxu0 %v6188_v5 }
 0xad8   : > { %5596 = vmatmul.mubr.msk.f32.gmra.mrb[164].mxu0 %vm408_vm2, %v7037_v32 }
 0xad9   : > { %5598 = vmatprep.mubr.msk.f32.mxu0 %vm6189_vm1, %v6190_v19  ;;  %5974 = vmatpush3.bf16.msra.mxu0 %v5973_v9 }
 0xada   : > { %5991 = vmatprep.subr.bf16.mxu0 %v6188_v5 }
 0xadc   : > { %5599 = vmatmul.mubr.msk.f32.gmra.mrb[166].mxu0 %vm408_vm2, %v7043_v36 }
 0xadd   : > { %5601 = vmatprep.mubr.msk.f32.mxu0 %vm6189_vm1, %v6190_v19 }
 0xae0   : > { %5602 = vmatmul.mubr.msk.f32.gmra.mrb[168].mxu0 %vm408_vm2, %v7049_v40 }
 0xae1   : > { %5604 = vmatprep.mubr.msk.f32.mxu0 %vm6189_vm1, %v6190_v19 }
 0xae4   : > { %5605 = vmatmul.mubr.msk.f32.gmra.mrb[170].mxu0 %vm408_vm2, %v7055_v26 }
 0xae5   : > { %5607 = vmatprep.mubr.msk.f32.mxu0 %vm6189_vm1, %v6190_v19 }
 0xae8   : > { %5608 = vmatmul.mubr.msk.f32.gmra.mrb[172].mxu0 %vm408_vm2, %v7061_v37 }
 0xae9   : > { %5610 = vmatprep.mubr.msk.f32.mxu0 %vm6189_vm1, %v6190_v19 }
 0xaec   : > { %5611 = vmatmul.mubr.msk.f32.gmra.mrb[174].mxu0 %vm408_vm2, %v7067_v29 }
 0xaed   : > { %5613 = vmatprep.mubr.msk.f32.mxu0 %vm6189_vm1, %v6190_v19 }
 0xaf0   : > { %5614 = vmatmul.mubr.msk.f32.gmra.mrb[176].mxu0 %vm408_vm2, %v7073_v35 }
 0xaf1   : > { %5616 = vmatprep.mubr.msk.f32.mxu0 %vm6189_vm1, %v6190_v19 }
 0xaf4   : > { %5617 = vmatmul.mubr.msk.f32.gmra.mrb[178].mxu0 %vm408_vm2, %v7079_v44 }
 0xaf5   : > { %5662 = vmatprep.mubr.msk.f32.mxu0 %vm6189_vm1, %v6190_v19 }
 0xaf8   : > { %5663 = vmatmul.mubr.msk.f32.vlgmr.msra.gmra.mrb[180].mxu0 %vm408_vm2, %v7031_v25  ;;  %v4493_v25 = vld [vmem:[%s7817_s4 + $0x60] sm:$0xff] }
 0xaf9   : > { %5665 = vmatprep.mubr.msk.f32.mxu0 %vm6189_vm1, %v6190_v19 }
 0xafc   : > { %5666 = vmatmul.mubr.msk.f32.gmra.mrb[182].mxu0 %vm408_vm2, %v7037_v32  ;;  %v4494_v32 = vld [vmem:[%s7817_s4 + $0x68] sm:$0xff] }
 0xafd   : > { %5668 = vmatprep.mubr.msk.f32.mxu0 %vm6189_vm1, %v6190_v19 }
 0xb00   : > { %5669 = vmatmul.mubr.msk.f32.gmra.mrb[184].mxu0 %vm408_vm2, %v7043_v36  ;;  %v5964_v36 = vpack.c.bf16 %v4494_v32, %v4493_v25 }
 0xb01   : > { %5671 = vmatprep.mubr.msk.f32.mxu0 %vm6189_vm1, %v6190_v19 }
 0xb04   : > { %5672 = vmatmul.mubr.msk.f32.gmra.mrb[186].mxu0 %vm408_vm2, %v7049_v40  ;;  %v4495_v40 = vld [vmem:[%s7817_s4 + $0x70] sm:$0xff] }
 0xb05   : > { %5674 = vmatprep.mubr.msk.f32.mxu0 %vm6189_vm1, %v6190_v19 }
 0xb08   : > { %5675 = vmatmul.mubr.msk.f32.gmra.mrb[188].mxu0 %vm408_vm2, %v7055_v26  ;;  %v4496_v26 = vld [vmem:[%s7817_s4 + $0x78] sm:$0xff] }
 0xb09   : > { %5677 = vmatprep.mubr.msk.f32.mxu0 %vm6189_vm1, %v6190_v19 }
 0xb0c   : > { %5678 = vmatmul.mubr.msk.f32.gmra.mrb[190].mxu0 %vm408_vm2, %v7061_v37 }
 0xb0d   : > { %5680 = vmatprep.mubr.msk.f32.mxu0 %vm6189_vm1, %v6190_v19 }
 0xb10   : > { %5681 = vmatmul.mubr.msk.f32.gmra.mrb[192].mxu0 %vm408_vm2, %v7067_v29 }
 0xb11   : > { %5683 = vmatprep.mubr.msk.f32.mxu0 %vm6189_vm1, %v6190_v19 }
 0xb14   : > { %5684 = vmatmul.mubr.msk.f32.gmra.mrb[194].mxu0 %vm408_vm2, %v7073_v35  ;;  %v5967_v35 = vpack.c.bf16 %v4496_v26, %v4495_v40 }
 0xb15   : > { %5686 = vmatprep.mubr.msk.f32.mxu0 %vm6189_vm1, %v6190_v19 }
 0xb18   : > { %5687 = vmatmul.mubr.msk.f32.gmra.mrb[196].mxu0 %vm408_vm2, %v7079_v44 }
 0xb19   : > { %5752 = vmatprep.mubr.msk.f32.mxu0 %vm6189_vm1, %v6190_v19 }
 0xb83   : > { %v2965_v37 = vpop.f32.mrb[144].mxu0 }
 0xb84   : > { %v5528_v29 = vpop.f32.mrb[145].mxu0  ;;  %5558 = vmatmul.mubr.msk.f32.vlgmr.msra.gmra.mrb[144].mxu1 %vm809_vm3, %v2965_v37 }
 0xb85   : > { %5560 = vmatprep.mubr.msk.f32.mxu1 %vm6189_vm1, %v6190_v19  ;;  %5965 = vmatpush3.bf16.msra.mxu1 %v5964_v36 }
 0xb86   : > { %5966 = vmatprep.subr.bf16.mxu1 %v6188_v5 }
 0xb87   : > { %v2970_v44 = vpop.f32.mrb[146].mxu0 }
 0xb88   : > { %v5531_v23 = vpop.f32.mrb[147].mxu0  ;;  %5561 = vmatmul.mubr.msk.f32.gmra.mrb[146].mxu1 %vm809_vm3, %v2970_v44 }
 0xb89   : > { %5563 = vmatprep.mubr.msk.f32.mxu1 %vm6189_vm1, %v6190_v19  ;;  %5968 = vmatpush3.bf16.msra.mxu1 %v5967_v35 }
 0xb8a   : > { %5975 = vmatprep.subr.bf16.mxu1 %v6188_v5 }
 0xb8b   : > { %v2975_v6 = vpop.f32.mrb[148].mxu0 }
 0xb8c   : > { %v5534_v48 = vpop.f32.mrb[149].mxu0  ;;  %5564 = vmatmul.mubr.msk.f32.gmra.mrb[148].mxu1 %vm809_vm3, %v2975_v6 }
 0xb8d   : > { %5566 = vmatprep.mubr.msk.f32.mxu1 %vm6189_vm1, %v6190_v19 }
 0xb8f   : > { %v2980_v52 = vpop.f32.mrb[150].mxu0 }
 0xb90   : > { %v5537_v56 = vpop.f32.mrb[151].mxu0  ;;  %5567 = vmatmul.mubr.msk.f32.gmra.mrb[150].mxu1 %vm809_vm3, %v2980_v52 }
 0xb91   : > { %5569 = vmatprep.mubr.msk.f32.mxu1 %vm6189_vm1, %v6190_v19 }
 0xb93   : > { %v2985_v57 = vpop.f32.mrb[152].mxu0 }
 0xb94   : > { %v5540_v27 = vpop.f32.mrb[153].mxu0  ;;  %5570 = vmatmul.mubr.msk.f32.gmra.mrb[152].mxu1 %vm809_vm3, %v2985_v57 }
 0xb95   : > { %5572 = vmatprep.mubr.msk.f32.mxu1 %vm6189_vm1, %v6190_v19 }
 0xb97   : > { %v2990_v18 = vpop.f32.mrb[154].mxu0 }
 0xb98   : > { %v5543_v0 = vpop.f32.mrb[155].mxu0  ;;  %5573 = vmatmul.mubr.msk.f32.gmra.mrb[154].mxu1 %vm809_vm3, %v2990_v18 }
 0xb99   : > { %5575 = vmatprep.mubr.msk.f32.mxu1 %vm6189_vm1, %v6190_v19 }
 0xb9b   : > { %v2995_v21 = vpop.f32.mrb[156].mxu0 }
 0xb9c   : > { %v5546_v53 = vpop.f32.mrb[157].mxu0  ;;  %5576 = vmatmul.mubr.msk.f32.gmra.mrb[156].mxu1 %vm809_vm3, %v2995_v21 }
 0xb9d   : > { %5578 = vmatprep.mubr.msk.f32.mxu1 %vm6189_vm1, %v6190_v19 }
 0xb9f   : > { %v3000_v17 = vpop.f32.mrb[158].mxu0 }
 0xba0   : > { %v5549_v22 = vpop.f32.mrb[159].mxu0  ;;  %5579 = vmatmul.mubr.msk.f32.gmra.mrb[158].mxu1 %vm809_vm3, %v3000_v17 }
 0xba1   : > { %5581 = vmatprep.mubr.msk.f32.mxu1 %vm6189_vm1, %v6190_v19 }
 0xba3   : > { %v3005_v60 = vpop.f32.mrb[160].mxu0 }
 0xba4   : > { %v5552_v11 = vpop.f32.mrb[161].mxu0  ;;  %5582 = vmatmul.mubr.msk.f32.gmra.mrb[160].mxu1 %vm809_vm3, %v3005_v60 }
 0xba5   : > { %5627 = vmatprep.mubr.msk.f32.mxu1 %vm6189_vm1, %v6190_v19 }
 0xba7   : > { %v7533_v31 = vpop.f32.mrb[162].mxu0 }
 0xba8   : > { %v5594_v30 = vpop.f32.mrb[163].mxu0  ;;  %5628 = vmatmul.mubr.msk.f32.vlgmr.msra.gmra.mrb[162].mxu1 %vm408_vm2, %v6171_v34 }
 0xba9   : > { %5630 = vmatprep.mubr.msk.f32.mxu1 %vm6189_vm1, %v6190_v19 }
 0xbab   : > { %v7538_v62 = vpop.f32.mrb[164].mxu0 }
 0xbac   : > { %v5597_v38 = vpop.f32.mrb[165].mxu0  ;;  %5631 = vmatmul.mubr.msk.f32.gmra.mrb[164].mxu1 %vm408_vm2, %v6172_v41 }
 0xbad   : > { %5633 = vmatprep.mubr.msk.f32.mxu1 %vm6189_vm1, %v6190_v19 }
 0xbaf   : > { %v7543_v42 = vpop.f32.mrb[166].mxu0 }
 0xbb0   : > { %v5600_v33 = vpop.f32.mrb[167].mxu0  ;;  %5634 = vmatmul.mubr.msk.f32.gmra.mrb[166].mxu1 %vm408_vm2, %v6173_v15  ;;  %v3275_v49 = vmul.f32 0.25, %v7543_v42 }
 0xbb1   : > { %5636 = vmatprep.mubr.msk.f32.mxu1 %vm6189_vm1, %v6190_v19 }
 0xbb3   : > { %v7548_v39 = vpop.f32.mrb[168].mxu0 }
 0xbb4   : > { %v5603_v43 = vpop.f32.mrb[169].mxu0  ;;  %5637 = vmatmul.mubr.msk.f32.gmra.mrb[168].mxu1 %vm408_vm2, %v6174_v24 }
 0xbb5   : > { %5639 = vmatprep.mubr.msk.f32.mxu1 %vm6189_vm1, %v6190_v19 }
 0xbb7   : > { %v7553_v46 = vpop.f32.mrb[170].mxu0 }
 0xbb8   : > { %v5606_v50 = vpop.f32.mrb[171].mxu0  ;;  %5640 = vmatmul.mubr.msk.f32.gmra.mrb[170].mxu1 %vm408_vm2, %v6175_v54 }
 0xbb9   : > { %5642 = vmatprep.mubr.msk.f32.mxu1 %vm6189_vm1, %v6190_v19 }
 0xbbb   : > { %v7558_v28 = vpop.f32.mrb[172].mxu0 }
 0xbbc   : > { %v5609_v47 = vpop.f32.mrb[173].mxu0  ;;  %5643 = vmatmul.mubr.msk.f32.gmra.mrb[172].mxu1 %vm408_vm2, %v6176_v63 }
 0xbbd   : > { %5645 = vmatprep.mubr.msk.f32.mxu1 %vm6189_vm1, %v6190_v19 }
 0xbbf   : > { %v7563_v45 = vpop.f32.mrb[174].mxu0 }
 0xbc0   : > { %v5612_v1 = vpop.f32.mrb[175].mxu0  ;;  %5646 = vmatmul.mubr.msk.f32.gmra.mrb[174].mxu1 %vm408_vm2, %v6177_v55  ;;  %v3279_v42 = vmul.f32 0.25, %v7563_v45 }
 0xbc1   : > { %5648 = vmatprep.mubr.msk.f32.mxu1 %vm6189_vm1, %v6190_v19 }
 0xbc3   : > { %v7568_v3 = vpop.f32.mrb[176].mxu0 }
 0xbc4   : > { %v5615_v58 = vpop.f32.mrb[177].mxu0  ;;  %5649 = vmatmul.mubr.msk.f32.gmra.mrb[176].mxu1 %vm408_vm2, %v6178_v4 }
 0xbc5   : > { %5651 = vmatprep.mubr.msk.f32.mxu1 %vm6189_vm1, %v6190_v19 }
 0xbc7   : > { %v7573_v61 = vpop.f32.mrb[178].mxu0 }
 0xbc8   : > { %v5618_v13 = vpop.f32.mrb[179].mxu0  ;;  %5652 = vmatmul.mubr.msk.f32.gmra.mrb[178].mxu1 %vm408_vm2, %v6179_v8 }
 0xbc9   : > { %5707 = vmatprep.mubr.msk.f32.mxu1 %vm6189_vm1, %v6190_v19 }
 0xbcb   : > { %v3468_v9 = vpop.f32.mrb[180].mxu0 }
 0xbcc   : > { %v5664_v25 = vpop.f32.mrb[181].mxu0 }
 0xbcf   : > { %v3473_v32 = vpop.f32.mrb[182].mxu0 }
 0xbd0   : > { %v5992_v36 = vpack.c.bf16 %v3473_v32, %v3468_v9  ;;  %v5667_v40 = vpop.f32.mrb[183].mxu0 }
 0xbd2   : > { %5993 = vmatpush3.bf16.msra.mxu0 %v5992_v36 }
 0xbd3   : > { %v3478_v26 = vpop.f32.mrb[184].mxu0  ;;  %5994 = vmatprep.subr.bf16.mxu0 %v6188_v5 }
 0xbd4   : > { %v5670_v37 = vpop.f32.mrb[185].mxu0 }
 0xbd7   : > { %v3483_v29 = vpop.f32.mrb[186].mxu0 }
 0xbd8   : > { %v5995_v35 = vpack.c.bf16 %v3483_v29, %v3478_v26  ;;  %v5673_v44 = vpop.f32.mrb[187].mxu0 }
 0xbda   : > { %5996 = vmatpush3.bf16.msra.mxu0 %v5995_v35 }
 0xbdb   : > { %v3488_v23 = vpop.f32.mrb[188].mxu0  ;;  %5997 = vmatprep.subr.bf16.mxu0 %v6188_v5 }
 0xbdc   : > { %v5676_v6 = vpop.f32.mrb[189].mxu0 }
 0xbdf   : > { %v3493_v48 = vpop.f32.mrb[190].mxu0 }
 0xbe0   : > { %v5998_v52 = vpack.c.bf16 %v3493_v48, %v3488_v23  ;;  %v5679_v56 = vpop.f32.mrb[191].mxu0 }
 0xbe2   : > { %5999 = vmatpush3.bf16.msra.mxu0 %v5998_v52 }
 0xbe3   : > { %v3498_v57 = vpop.f32.mrb[192].mxu0  ;;  %6000 = vmatprep.subr.bf16.mxu0 %v6188_v5 }
 0xbe4   : > { %v5682_v27 = vpop.f32.mrb[193].mxu0 }
 0xbe7   : > { %v3503_v18 = vpop.f32.mrb[194].mxu0 }
 0xbe8   : > { %v6001_v0 = vpack.c.bf16 %v3503_v18, %v3498_v57  ;;  %v5685_v21 = vpop.f32.mrb[195].mxu0  ;;  %v3273_v18 = vmul.f32 0.25, %v7533_v31  ;;  %v3277_v31 = vmul.f32 0.25, %v7553_v46  ;;  %v3281_v46 = vmul.f32 0.25, %v7573_v61 }
 0xbea   : > { %6002 = vmatpush3.bf16.msra.mxu0 %v6001_v0  ;;  %v3274_v0 = vmul.f32 0.25, %v7538_v62  ;;  %v3278_v62 = vmul.f32 0.25, %v7558_v28 }
 0xbeb   : > { %5750 = vmatprep.subr.mxu0 %v6190_v19 }
 0xc57   : > { %v3105_v53 = vpop.f32.mrb[144].mxu1 }
 0xc58   : > { %v7583_v17 = vadd.f32 %v3105_v53, %v7245_v59  ;;  %v5559_v22 = vpop.f32.mrb[145].mxu1 }
 0xc5b   : > { %v3110_v60 = vpop.f32.mrb[146].mxu1 }
 0xc5c   : > { %v7586_v11 = vadd.f32 %v3110_v60, %v7248_v10  ;;  %v5562_v30 = vpop.f32.mrb[147].mxu1 }
 0xc5f   : > { %v3115_v34 = vpop.f32.mrb[148].mxu1 }
 0xc60   : > { %v7589_v38 = vadd.f32 %v3115_v34, %v7251_v16  ;;  %v5565_v41 = vpop.f32.mrb[149].mxu1 }
 0xc63   : > { %v3120_v33 = vpop.f32.mrb[150].mxu1 }
 0xc64   : > { %v7592_v15 = vadd.f32 %v3120_v33, %v7254_v20  ;;  %v5568_v43 = vpop.f32.mrb[151].mxu1 }
 0xc67   : > { %v3125_v24 = vpop.f32.mrb[152].mxu1 }
 0xc68   : > { %v7595_v59 = vadd.f32 %v3125_v24, %v7257_v7  ;;  %v5571_v50 = vpop.f32.mrb[153].mxu1 }
 0xc6b   : > { %v3130_v54 = vpop.f32.mrb[154].mxu1 }
 0xc6c   : > { %v7598_v10 = vadd.f32 %v3130_v54, %v7260_v2  ;;  %v5574_v47 = vpop.f32.mrb[155].mxu1 }
 0xc6f   : > { %v3135_v63 = vpop.f32.mrb[156].mxu1 }
 0xc70   : > { %v7601_v16 = vadd.f32 %v3135_v63, %v7263_v12  ;;  %v5577_v1 = vpop.f32.mrb[157].mxu1 }
 0xc73   : > { %v3140_v55 = vpop.f32.mrb[158].mxu1 }
 0xc74   : > { %v7604_v20 = vadd.f32 %v3140_v55, %v7266_v14  ;;  %v5580_v58 = vpop.f32.mrb[159].mxu1 }
 0xc77   : > { %v3145_v4 = vpop.f32.mrb[160].mxu1 }
 0xc78   : > { %v7607_v7 = vadd.f32 %v3145_v4, %v7269_v51  ;;  %v5583_v13 = vpop.f32.mrb[161].mxu1 }
 0xc7b   : > { %v3353_v8 = vpop.f32.mrb[162].mxu1 }
 0xc7c   : > { %v5629_v9 = vpop.f32.mrb[163].mxu1 }
 0xc7f   : > { %v3358_v2 = vpop.f32.mrb[164].mxu1 }
 0xc80   : > { %v5976_v25 = vpack.c.bf16 %v3358_v2, %v3353_v8  ;;  %v5632_v32 = vpop.f32.mrb[165].mxu1 }
 0xc82   : > { %5978 = vmatpush3.bf16.xpose.msk.msra.mxu1 %vm6455_vm4, %v5976_v25 }
 0xc83   : > { %v3363_v12 = vpop.f32.mrb[166].mxu1  ;;  %5979 = vmatprep.subr.bf16.mxu1 %v6188_v5 }
 0xc84   : > { %v5635_v36 = vpop.f32.mrb[167].mxu1 }
 0xc87   : > { %v3368_v14 = vpop.f32.mrb[168].mxu1 }
 0xc88   : > { %v5980_v40 = vpack.c.bf16 %v3368_v14, %v3363_v12  ;;  %v5638_v26 = vpop.f32.mrb[169].mxu1 }
 0xc8a   : > { %5982 = vmatpush3.bf16.xpose.msk.msra.mxu1 %vm6455_vm4, %v5980_v40 }
 0xc8b   : > { %v3373_v51 = vpop.f32.mrb[170].mxu1  ;;  %5983 = vmatprep.subr.bf16.mxu1 %v6188_v5 }
 0xc8c   : > { %v5641_v37 = vpop.f32.mrb[171].mxu1 }
 0xc8f   : > { %v3378_v29 = vpop.f32.mrb[172].mxu1 }
 0xc90   : > { %v5984_v35 = vpack.c.bf16 %v3378_v29, %v3373_v51  ;;  %v5644_v44 = vpop.f32.mrb[173].mxu1 }
 0xc92   : > { %5986 = vmatpush3.bf16.xpose.msk.msra.mxu1 %vm6455_vm4, %v5984_v35 }
 0xc93   : > { %v3383_v23 = vpop.f32.mrb[174].mxu1  ;;  %5987 = vmatprep.subr.bf16.mxu1 %v6188_v5 }
 0xc94   : > { %v5647_v6 = vpop.f32.mrb[175].mxu1 }
 0xc97   : > { %v3388_v48 = vpop.f32.mrb[176].mxu1 }
 0xc98   : > { %v5988_v52 = vpack.c.bf16 %v3388_v48, %v3383_v23  ;;  %v5650_v56 = vpop.f32.mrb[177].mxu1 }
 0xc9a   : > { %5990 = vmatpush3.bf16.xpose.msk.msra.mxu1 %vm6455_vm4, %v5988_v52 }
 0xc9b   : > { %v3393_v57 = vpop.f32.mrb[178].mxu1  ;;  %5705 = vmatprep.subr.mxu1 %v6190_v19 }
 0xc9c   : > { %v5653_v27 = vpop.f32.mrb[179].mxu1 }
 0xca2   : > { %5706 = vmatpush3.xpose.msk.msra.mxu1 %vm809_vm3, %v3393_v57 }
 0xca3   : > { %6003 = vmatprep.subr.bf16.mxu1 %v6188_v5  ;;  %v3276_v5 = vmul.f32 0.25, %v7548_v39  ;;  %v3280_v39 = vmul.f32 0.25, %v7568_v3 }
 0xca5   : > { %5708 = vmatmul.mubr.msk.f32.vlgmr.msra.gmra.mrb[180].mxu1 %vm809_vm3, %v3273_v18 }
 0xca6   : > { %5710 = vmatprep.mubr.msk.f32.mxu1 %vm6189_vm1, %v6190_v19 }
 0xca9   : > { %5711 = vmatmul.mubr.msk.f32.gmra.mrb[182].mxu1 %vm809_vm3, %v3274_v0 }
 0xcaa   : > { %5713 = vmatprep.mubr.msk.f32.mxu1 %vm6189_vm1, %v6190_v19 }
 0xcad   : > { %5714 = vmatmul.mubr.msk.f32.gmra.mrb[184].mxu1 %vm809_vm3, %v3275_v49 }
 0xcae   : > { %5716 = vmatprep.mubr.msk.f32.mxu1 %vm6189_vm1, %v6190_v19 }
 0xcb1   : > { %5717 = vmatmul.mubr.msk.f32.gmra.mrb[186].mxu1 %vm809_vm3, %v3276_v5 }
 0xcb2   : > { %5719 = vmatprep.mubr.msk.f32.mxu1 %vm6189_vm1, %v6190_v19 }
 0xcb5   : > { %5720 = vmatmul.mubr.msk.f32.gmra.mrb[188].mxu1 %vm809_vm3, %v3277_v31 }
 0xcb6   : > { %5722 = vmatprep.mubr.msk.f32.mxu1 %vm6189_vm1, %v6190_v19 }
 0xcb9   : > { %5723 = vmatmul.mubr.msk.f32.gmra.mrb[190].mxu1 %vm809_vm3, %v3278_v62 }
 0xcba   : > { %5725 = vmatprep.mubr.msk.f32.mxu1 %vm6189_vm1, %v6190_v19 }
 0xcbd   : > { %5726 = vmatmul.mubr.msk.f32.gmra.mrb[192].mxu1 %vm809_vm3, %v3279_v42 }
 0xcbe   : > { %5728 = vmatprep.mubr.msk.f32.mxu1 %vm6189_vm1, %v6190_v19 }
 0xcc1   : > { %5729 = vmatmul.mubr.msk.f32.gmra.mrb[194].mxu1 %vm809_vm3, %v3280_v39 }
 0xcc2   : > { %5731 = vmatprep.mubr.msk.f32.mxu1 %vm6189_vm1, %v6190_v19 }
 0xcc5   : > { %5732 = vmatmul.mubr.msk.f32.gmra.mrb[196].mxu1 %vm809_vm3, %v3281_v46 }
 0xcc6   : > { %5783 = vmatprep.mubr.msk.f32.mxu1 %vm6189_vm1, %v6190_v19 }
 0xd78   : > { %v3632_v28 = vpop.f32.mrb[180].mxu1 }
 0xd79   : > { %v5709_v45 = vpop.f32.mrb[181].mxu1  ;;  %v3676_v21 = vsel %vm974_vm5, %v3632_v28, -inf }
 0xd7a   : > { %3677 = vmax.xlane.f32.xlu1 %v3676_v21 }
 0xd7c   : > { %v3637_v53 = vpop.f32.mrb[182].mxu1 }
 0xd7d   : > { %v5712_v22 = vpop.f32.mrb[183].mxu1  ;;  %v3679_v3 = vsel %vm974_vm5, %v3637_v53, -inf }
 0xd7e   : > { %3680 = vmax.xlane.f32.xlu0 %v3679_v3 }
 0xd80   : > { %v3642_v61 = vpop.f32.mrb[184].mxu1 }
 0xd81   : > { %v5715_v60 = vpop.f32.mrb[185].mxu1  ;;  %v3682_v30 = vsel %vm974_vm5, %v3642_v61, -inf }
 0xd82   : > { %3683 = vmax.xlane.f32.xlu1 %v3682_v30 }
 0xd84   : > { %v3647_v34 = vpop.f32.mrb[186].mxu1 }
 0xd85   : > { %v5718_v41 = vpop.f32.mrb[187].mxu1  ;;  %v3685_v33 = vsel %vm974_vm5, %v3647_v34, -inf }
 0xd86   : > { %3686 = vmax.xlane.f32.xlu0 %v3685_v33 }
 0xd88   : > { %v3652_v43 = vpop.f32.mrb[188].mxu1 }
 0xd89   : > { %v5721_v24 = vpop.f32.mrb[189].mxu1  ;;  %v3688_v50 = vsel %vm974_vm5, %v3652_v43, -inf }
 0xd8a   : > { %3689 = vmax.xlane.f32.xlu1 %v3688_v50  ;;  %v3508_v50 = vpop.f32.mrb[196].mxu0 }
 0xd8b   : > { %5751 = vmatpush3.msk.msra.mxu0 %vm1102_vm7, %v3508_v50 }
 0xd8c   : > { %v3657_v54 = vpop.f32.mrb[190].mxu1 }
 0xd8d   : > { %v5724_v47 = vpop.f32.mrb[191].mxu1  ;;  %v3691_v63 = vsel %vm974_vm5, %v3657_v54, -inf }
 0xd8e   : > { %3692 = vmax.xlane.f32.xlu0 %v3691_v63 }
 0xd90   : > { %v3662_v1 = vpop.f32.mrb[192].mxu1 }
 0xd91   : > { %v5727_v55 = vpop.f32.mrb[193].mxu1  ;;  %v3694_v58 = vsel %vm974_vm5, %v3662_v1, -inf }
 0xd92   : > { %3695 = vmax.xlane.f32.xlu1 %v3694_v58  ;;  %v4547_v58 = vld [vmem:[%s7819_s6 + $0x30] sm:$0xff] }
 0xd94   : > { %v3667_v4 = vpop.f32.mrb[194].mxu1 }
 0xd95   : > { %v5730_v13 = vpop.f32.mrb[195].mxu1  ;;  %v3697_v8 = vsel %vm974_vm5, %v3667_v4, -inf }
 0xd96   : > { %3698 = vmax.xlane.f32.xlu0 %v3697_v8 }
 0xd98   : > { %v3672_v9 = vpop.f32.mrb[196].mxu1 }
 0xd99   : > { %v3700_v2 = vsel %vm999_vm6, %v3672_v9, -inf  ;;  %v5733_v25 = vpop.f32.mrb[197].mxu1 }
 0xd9a   : > { %3701 = vmax.xlane.f32.xlu1 %v3700_v2 }
 0xe07   : > { %v3678_v32 = vpop.xlane.xlu1 %3677 }
 0xe08   : > { %v3703_v12 = vsub.f32 %v3632_v28, %v3678_v32 }
 0xe0a   : > { %v3712_v36 = vmul.f32 1.442695, %v3703_v12 }
 0xe0b   : > { %v3681_v14 = vpop.xlane.xlu0 %3680 }
 0xe0c   : > { %6126 = vpow2.f32 %v3712_v36  ;;  %v3704_v40 = vsub.f32 %v3637_v53, %v3681_v14 }
 0xe0e   : > { %v3714_v26 = vmul.f32 1.442695, %v3704_v40 }
 0xe0f   : > { %v3684_v51 = vpop.xlane.xlu1 %3683 }
 0xe10   : > { %6128 = vpow2.f32 %v3714_v26  ;;  %v3705_v37 = vsub.f32 %v3642_v61, %v3684_v51 }
 0xe12   : > { %v3716_v29 = vmul.f32 1.442695, %v3705_v37 }
 0xe13   : > { %v3687_v35 = vpop.xlane.xlu0 %3686 }
 0xe14   : > { %6130 = vpow2.f32 %v3716_v29  ;;  %v3706_v44 = vsub.f32 %v3647_v34, %v3687_v35 }
 0xe16   : > { %v7668_v23 = vpop.eup %6126  ;;  %v3718_v6 = vmul.f32 1.442695, %v3706_v44 }
 0xe17   : > { %v3690_v48 = vpop.xlane.xlu1 %3689  ;;  %v3730_v52 = vsel %vm974_vm5, %v7668_v23, 0.0 }
 0xe18   : > { %6132 = vpow2.f32 %v3718_v6  ;;  %v3707_v56 = vsub.f32 %v3652_v43, %v3690_v48  ;;  %3731 = vadd.xlane.f32.xlu0 %v3730_v52 }
 0xe1a   : > { %v7672_v57 = vpop.eup %6128  ;;  %v3720_v27 = vmul.f32 1.442695, %v3707_v56 }
 0xe1b   : > { %v3693_v18 = vpop.xlane.xlu0 %3692  ;;  %v3733_v0 = vsel %vm974_vm5, %v7672_v57, 0.0 }
 0xe1c   : > { %6134 = vpow2.f32 %v3720_v27  ;;  %v3708_v49 = vsub.f32 %v3657_v54, %v3693_v18  ;;  %3734 = vadd.xlane.f32.xlu1 %v3733_v0  ;;  %v5688_v54 = vpop.f32.mrb[197].mxu0 }
 0xe1d   : > { %v7746_v54 = vld [vmem:[%s7820_s7] ss:$0 sm:$0xff] }
 0xe1e   : > { %v6131_v5 = vpop.eup %6130  ;;  %v3722_v31 = vmul.f32 1.442695, %v3708_v49 }
 0xe1f   : > { %v3696_v62 = vpop.xlane.xlu1 %3695  ;;  %v3736_v42 = vsel %vm974_vm5, %v6131_v5, 0.0 }
 0xe20   : > { %6136 = vpow2.f32 %v3722_v31  ;;  %v3709_v39 = vsub.f32 %v3662_v1, %v3696_v62  ;;  %3737 = vadd.xlane.f32.xlu0 %v3736_v42 }
 0xe22   : > { %v6133_v46 = vpop.eup %6132  ;;  %v3724_v28 = vmul.f32 1.442695, %v3709_v39 }
 0xe23   : > { %v3699_v45 = vpop.xlane.xlu0 %3698  ;;  %v3739_v21 = vsel %vm974_vm5, %v6133_v46, 0.0 }
 0xe24   : > { %6138 = vpow2.f32 %v3724_v28  ;;  %v3710_v53 = vsub.f32 %v3667_v4, %v3699_v45  ;;  %3740 = vadd.xlane.f32.xlu1 %v3739_v21  ;;  %v4548_v4 = vld [vmem:[%s7819_s6 + $0x38] sm:$0xff] }
 0xe25   : > { %v6004_v13 = vpack.c.bf16 %v4548_v4, %v4547_v58 }
 0xe26   : > { %v6135_v22 = vpop.eup %6134  ;;  %v3726_v3 = vmul.f32 1.442695, %v3710_v53 }
 0xe27   : > { %v3702_v61 = vpop.xlane.xlu1 %3701  ;;  %v3742_v60 = vsel %vm974_vm5, %v6135_v22, 0.0  ;;  %6005 = vmatpush3.bf16.msra.mxu1 %v6004_v13 }
 0xe28   : > { %6140 = vpow2.f32 %v3726_v3  ;;  %v3711_v30 = vsub.f32 %v3672_v9, %v3702_v61  ;;  %3743 = vadd.xlane.f32.xlu0 %v3742_v60 }
 0xe2a   : > { %v6137_v34 = vpop.eup %6136  ;;  %v3728_v41 = vmul.f32 1.442695, %v3711_v30 }
 0xe2b   : > { %v3745_v33 = vsel %vm974_vm5, %v6137_v34, 0.0 }
 0xe2c   : > { %6142 = vpow2.f32 %v3728_v41  ;;  %3746 = vadd.xlane.f32.xlu1 %v3745_v33 }
 0xe2e   : > { %v6139_v43 = vpop.eup %6138 }
 0xe2f   : > { %v3748_v24 = vsel %vm974_vm5, %v6139_v43, 0.0 }
 0xe30   : > { %3749 = vadd.xlane.f32.xlu0 %v3748_v24 }
 0xe32   : > { %v6141_v47 = vpop.eup %6140 }
 0xe33   : > { %v3751_v63 = vsel %vm974_vm5, %v6141_v47, 0.0 }
 0xe34   : > { %3752 = vadd.xlane.f32.xlu1 %v3751_v63 }
 0xe36   : > { %v6143_v1 = vpop.eup %6142 }
 0xe37   : > { %v3754_v55 = vsel %vm999_vm6, %v6143_v1, 0.0 }
 0xe38   : > { %3755 = vadd.xlane.f32.xlu0 %v3754_v55 }
 0xea5   : > { %v3732_v8 = vpop.xlane.xlu0 %3731 }
 0xea6   : > { %6144 = vrcp.f32 %v3732_v8 }
 0xea9   : > { %v3735_v9 = vpop.xlane.xlu1 %3734 }
 0xeaa   : > { %6146 = vrcp.f32 %v3735_v9 }
 0xead   : > { %v3738_v2 = vpop.xlane.xlu0 %3737 }
 0xeae   : > { %6148 = vrcp.f32 %v3738_v2 }
 0xeb0   : > { %v6145_v25 = vpop.eup %6144 }
 0xeb1   : > { %v3766_v32 = vmul.f32 %v6145_v25, %v7668_v23  ;;  %v3741_v12 = vpop.xlane.xlu1 %3740 }
 0xeb2   : > { %6150 = vrcp.f32 %v3741_v12 }
 0xeb3   : > { %5753 = vmatmul.mubr.msk.f32.vlgmr.msra.gmra.mrb[198].mxu0 %vm974_vm5, %v3766_v32 }
 0xeb4   : > { %v6147_v36 = vpop.eup %6146  ;;  %5755 = vmatprep.mubr.msk.f32.mxu0 %vm6189_vm1, %v6190_v19 }
 0xeb5   : > { %v3744_v14 = vpop.xlane.xlu0 %3743  ;;  %v3767_v40 = vmul.f32 %v6147_v36, %v7672_v57 }
 0xeb6   : > { %6152 = vrcp.f32 %v3744_v14 }
 0xeb7   : > { %5756 = vmatmul.mubr.msk.f32.gmra.mrb[200].mxu0 %vm974_vm5, %v3767_v40 }
 0xeb8   : > { %v6149_v26 = vpop.eup %6148  ;;  %5758 = vmatprep.mubr.msk.f32.mxu0 %vm6189_vm1, %v6190_v19 }
 0xeb9   : > { %v3747_v51 = vpop.xlane.xlu1 %3746  ;;  %v3768_v37 = vmul.f32 %v6149_v26, %v6131_v5 }
 0xeba   : > { %6154 = vrcp.f32 %v3747_v51 }
 0xebb   : > { %5759 = vmatmul.mubr.msk.f32.gmra.mrb[202].mxu0 %vm974_vm5, %v3768_v37 }
 0xebc   : > { %v6151_v29 = vpop.eup %6150  ;;  %5761 = vmatprep.mubr.msk.f32.mxu0 %vm6189_vm1, %v6190_v19 }
 0xebd   : > { %v3750_v35 = vpop.xlane.xlu0 %3749  ;;  %v3769_v44 = vmul.f32 %v6151_v29, %v6133_v46 }
 0xebe   : > { %6156 = vrcp.f32 %v3750_v35 }
 0xebf   : > { %5762 = vmatmul.mubr.msk.f32.gmra.mrb[204].mxu0 %vm974_vm5, %v3769_v44 }
 0xec0   : > { %v6153_v23 = vpop.eup %6152  ;;  %5764 = vmatprep.mubr.msk.f32.mxu0 %vm6189_vm1, %v6190_v19 }
 0xec1   : > { %v3753_v6 = vpop.xlane.xlu1 %3752  ;;  %v3770_v48 = vmul.f32 %v6153_v23, %v6135_v22 }
 0xec2   : > { %6158 = vrcp.f32 %v3753_v6 }
 0xec3   : > { %5765 = vmatmul.mubr.msk.f32.gmra.mrb[206].mxu0 %vm974_vm5, %v3770_v48 }
 0xec4   : > { %v6155_v52 = vpop.eup %6154  ;;  %5767 = vmatprep.mubr.msk.f32.mxu0 %vm6189_vm1, %v6190_v19 }
 0xec5   : > { %v3756_v56 = vpop.xlane.xlu0 %3755  ;;  %v3771_v57 = vmul.f32 %v6155_v52, %v6137_v34 }
 0xec6   : > { %6160 = vrcp.f32 %v3756_v56 }
 0xec7   : > { %5768 = vmatmul.mubr.msk.f32.gmra.mrb[208].mxu0 %vm974_vm5, %v3771_v57 }
 0xec8   : > { %v6157_v27 = vpop.eup %6156  ;;  %5770 = vmatprep.mubr.msk.f32.mxu0 %vm6189_vm1, %v6190_v19 }
 0xec9   : > { %v3772_v18 = vmul.f32 %v6157_v27, %v6139_v43 }
 0xecb   : > { %5771 = vmatmul.mubr.msk.f32.gmra.mrb[210].mxu0 %vm974_vm5, %v3772_v18 }
 0xecc   : > { %v6159_v0 = vpop.eup %6158  ;;  %5773 = vmatprep.mubr.msk.f32.mxu0 %vm6189_vm1, %v6190_v19 }
 0xecd   : > { %v3773_v49 = vmul.f32 %v6159_v0, %v6141_v47 }
 0xecf   : > { %5774 = vmatmul.mubr.msk.f32.gmra.mrb[212].mxu0 %vm974_vm5, %v3773_v49 }
 0xed0   : > { %v6161_v5 = vpop.eup %6160  ;;  %5776 = vmatprep.mubr.msk.f32.mxu0 %vm6189_vm1, %v6190_v19 }
 0xed1   : > { %v3774_v31 = vmul.f32 %v6161_v5, %v6143_v1 }
 0xed3   : > { %5777 = vmatmul.mubr.msk.f32.gmra.mrb[214].mxu0 %vm974_vm5, %v3774_v31 }
 0xf86   : > { %v3871_v62 = vpop.f32.mrb[198].mxu0 }
 0xf87   : > { %v5754_v42 = vpop.f32.mrb[199].mxu0  ;;  %5784 = vmatmul.mubr.msk.f32.vlgmr.msra.gmra.mrb[198].mxu1 %vm809_vm3, %v3871_v62 }
 0xf88   : > { %5786 = vmatprep.mubr.msk.f32.mxu1 %vm6189_vm1, %v6190_v19 }
 0xf8a   : > { %v3876_v39 = vpop.f32.mrb[200].mxu0 }
 0xf8b   : > { %v5757_v46 = vpop.f32.mrb[201].mxu0  ;;  %5787 = vmatmul.mubr.msk.f32.gmra.mrb[200].mxu1 %vm809_vm3, %v3876_v39 }
 0xf8c   : > { %5789 = vmatprep.mubr.msk.f32.mxu1 %vm6189_vm1, %v6190_v19 }
 0xf8e   : > { %v3881_v28 = vpop.f32.mrb[202].mxu0 }
 0xf8f   : > { %v5760_v45 = vpop.f32.mrb[203].mxu0  ;;  %5790 = vmatmul.mubr.msk.f32.gmra.mrb[202].mxu1 %vm809_vm3, %v3881_v28 }
 0xf90   : > { %5792 = vmatprep.mubr.msk.f32.mxu1 %vm6189_vm1, %v6190_v19 }
 0xf92   : > { %v3886_v21 = vpop.f32.mrb[204].mxu0 }
 0xf93   : > { %v5763_v53 = vpop.f32.mrb[205].mxu0  ;;  %5793 = vmatmul.mubr.msk.f32.gmra.mrb[204].mxu1 %vm809_vm3, %v3886_v21 }
 0xf94   : > { %5795 = vmatprep.mubr.msk.f32.mxu1 %vm6189_vm1, %v6190_v19 }
 0xf96   : > { %v3891_v22 = vpop.f32.mrb[206].mxu0 }
 0xf97   : > { %v5766_v3 = vpop.f32.mrb[207].mxu0  ;;  %5796 = vmatmul.mubr.msk.f32.gmra.mrb[206].mxu1 %vm809_vm3, %v3891_v22 }
 0xf98   : > { %5798 = vmatprep.mubr.msk.f32.mxu1 %vm6189_vm1, %v6190_v19 }
 0xf9a   : > { %v3896_v61 = vpop.f32.mrb[208].mxu0 }
 0xf9b   : > { %v5769_v60 = vpop.f32.mrb[209].mxu0  ;;  %5799 = vmatmul.mubr.msk.f32.gmra.mrb[208].mxu1 %vm809_vm3, %v3896_v61 }
 0xf9c   : > { %5801 = vmatprep.mubr.msk.f32.mxu1 %vm6189_vm1, %v6190_v19 }
 0xf9e   : > { %v3901_v30 = vpop.f32.mrb[210].mxu0 }
 0xf9f   : > { %v5772_v34 = vpop.f32.mrb[211].mxu0  ;;  %5802 = vmatmul.mubr.msk.f32.gmra.mrb[210].mxu1 %vm809_vm3, %v3901_v30 }
 0xfa0   : > { %5804 = vmatprep.mubr.msk.f32.mxu1 %vm6189_vm1, %v6190_v19 }
 0xfa2   : > { %v3906_v41 = vpop.f32.mrb[212].mxu0 }
 0xfa3   : > { %v5775_v33 = vpop.f32.mrb[213].mxu0  ;;  %5805 = vmatmul.mubr.msk.f32.gmra.mrb[212].mxu1 %vm809_vm3, %v3906_v41 }
 0xfa4   : > { %5807 = vmatprep.mubr.msk.f32.mxu1 %vm6189_vm1, %v6190_v19 }
 0xfa6   : > { %v3911_v43 = vpop.f32.mrb[214].mxu0 }
 0xfa7   : > { %v5778_v24 = vpop.f32.mrb[215].mxu0  ;;  %5808 = vmatmul.mubr.msk.f32.gmra.mrb[214].mxu1 %vm809_vm3, %v3911_v43 }
0x105a   : > { %v4011_v50 = vpop.f32.mrb[198].mxu1 }
0x105b   : > { %v4055_v47 = vadd.f32 %v4011_v50, %v7583_v17  ;;  %v5785_v63 = vpop.f32.mrb[199].mxu1 }
0x105d   : > { %v4071_v19 = vadd.f32 %v7746_v54, %v4055_v47 }
0x105e   : > { %v4016_v1 = vpop.f32.mrb[200].mxu1 }
0x105f   : > { %4080 = vst.msk [vmem:[%s7752_s24] sm:$0xff] %vm408_vm2, %v4071_v19  ;;  %v4056_v55 = vadd.f32 %v4016_v1, %v7586_v11  ;;  %v5788_v58 = vpop.f32.mrb[201].mxu1  ;;  %v4114_v4 = vmul.f32 %v4071_v19, %v4071_v19  ;;  %v4090_v8 = vsel %vm408_vm2, %v4071_v19, 0.0 }
0x1061   : > { %v4072_v17 = vadd.f32 %v7746_v54, %v4056_v55  ;;  %v4123_v11 = vsel %vm408_vm2, %v4114_v4, 0.0 }
0x1062   : > { %v4021_v13 = vpop.f32.mrb[202].mxu1 }
0x1063   : > { %4081 = vst.msk [vmem:[%s7752_s24 + $0x8] sm:$0xff] %vm408_vm2, %v4072_v17  ;;  %v4091_v9 = vsel %vm408_vm2, %v4072_v17, 0.0  ;;  %v4115_v2 = vmul.f32 %v4072_v17, %v4072_v17  ;;  %v4057_v25 = vadd.f32 %v4021_v13, %v7589_v38  ;;  %v5791_v32 = vpop.f32.mrb[203].mxu1 }
0x1064   : > { %v4092_v12 = vadd.f32 %v4091_v9, %v4090_v8 }
0x1065   : > { %v4124_v36 = vsel %vm408_vm2, %v4115_v2, 0.0  ;;  %v4073_v14 = vadd.f32 %v7746_v54, %v4057_v25 }
0x1066   : > { %v4125_v40 = vadd.f32 %v4124_v36, %v4123_v11  ;;  %v4026_v26 = vpop.f32.mrb[204].mxu1 }
0x1067   : > { %4082 = vst.msk [vmem:[%s7752_s24 + $0x10] sm:$0xff] %vm408_vm2, %v4073_v14  ;;  %v4093_v51 = vsel %vm408_vm2, %v4073_v14, 0.0  ;;  %v4116_v37 = vmul.f32 %v4073_v14, %v4073_v14  ;;  %v4058_v29 = vadd.f32 %v4026_v26, %v7592_v15  ;;  %v5794_v35 = vpop.f32.mrb[205].mxu1 }
0x1068   : > { %v4094_v38 = vadd.f32 %v4093_v51, %v4092_v12 }
0x1069   : > { %v4126_v44 = vsel %vm408_vm2, %v4116_v37, 0.0  ;;  %v4074_v23 = vadd.f32 %v7746_v54, %v4058_v29 }
0x106a   : > { %v4127_v6 = vadd.f32 %v4126_v44, %v4125_v40  ;;  %v4031_v48 = vpop.f32.mrb[206].mxu1 }
0x106b   : > { %4083 = vst.msk [vmem:[%s7752_s24 + $0x18] sm:$0xff] %vm408_vm2, %v4074_v23  ;;  %v4095_v52 = vsel %vm408_vm2, %v4074_v23, 0.0  ;;  %v4117_v56 = vmul.f32 %v4074_v23, %v4074_v23  ;;  %v4059_v57 = vadd.f32 %v4031_v48, %v7595_v59  ;;  %v5797_v27 = vpop.f32.mrb[207].mxu1 }
0x106c   : > { %v4096_v18 = vadd.f32 %v4095_v52, %v4094_v38 }
0x106d   : > { %v4128_v15 = vsel %vm408_vm2, %v4117_v56, 0.0  ;;  %v4075_v0 = vadd.f32 %v7746_v54, %v4059_v57 }
0x106e   : > { %v4129_v49 = vadd.f32 %v4128_v15, %v4127_v6  ;;  %v4036_v5 = vpop.f32.mrb[208].mxu1 }
0x106f   : > { %4084 = vst.msk [vmem:[%s7752_s24 + $0x20] sm:$0xff] %vm408_vm2, %v4075_v0  ;;  %v4097_v31 = vsel %vm408_vm2, %v4075_v0, 0.0  ;;  %v4118_v62 = vmul.f32 %v4075_v0, %v4075_v0  ;;  %v4060_v42 = vadd.f32 %v4036_v5, %v7598_v10  ;;  %v5800_v39 = vpop.f32.mrb[209].mxu1 }
0x1070   : > { %v4098_v46 = vadd.f32 %v4097_v31, %v4096_v18 }
0x1071   : > { %v4130_v59 = vsel %vm408_vm2, %v4118_v62, 0.0  ;;  %v4076_v28 = vadd.f32 %v7746_v54, %v4060_v42 }
0x1072   : > { %v4131_v45 = vadd.f32 %v4130_v59, %v4129_v49  ;;  %v4041_v21 = vpop.f32.mrb[210].mxu1 }
0x1073   : > { %4085 = vst.msk [vmem:[%s7752_s24 + $0x28] sm:$0xff] %vm408_vm2, %v4076_v28  ;;  %v4099_v53 = vsel %vm408_vm2, %v4076_v28, 0.0  ;;  %v4119_v22 = vmul.f32 %v4076_v28, %v4076_v28  ;;  %v4061_v3 = vadd.f32 %v4041_v21, %v7601_v16  ;;  %v5803_v61 = vpop.f32.mrb[211].mxu1 }
0x1074   : > { %v4100_v60 = vadd.f32 %v4099_v53, %v4098_v46 }
0x1075   : > { %v4132_v10 = vsel %vm408_vm2, %v4119_v22, 0.0  ;;  %v4077_v30 = vadd.f32 %v7746_v54, %v4061_v3 }
0x1076   : > { %v4133_v34 = vadd.f32 %v4132_v10, %v4131_v45  ;;  %v4046_v41 = vpop.f32.mrb[212].mxu1 }
0x1077   : > { %4086 = vst.msk [vmem:[%s7752_s24 + $0x30] sm:$0xff] %vm408_vm2, %v4077_v30  ;;  %v4101_v33 = vsel %vm408_vm2, %v4077_v30, 0.0  ;;  %v4120_v43 = vmul.f32 %v4077_v30, %v4077_v30  ;;  %v4062_v24 = vadd.f32 %v4046_v41, %v7604_v20  ;;  %v5806_v50 = vpop.f32.mrb[213].mxu1 }
0x1078   : > { %v4102_v47 = vadd.f32 %v4101_v33, %v4100_v60 }
0x1079   : > { %v4134_v16 = vsel %vm408_vm2, %v4120_v43, 0.0  ;;  %v4078_v63 = vadd.f32 %v7746_v54, %v4062_v24 }
0x107a   : > { %v4135_v19 = vadd.f32 %v4134_v16, %v4133_v34  ;;  %v4051_v1 = vpop.f32.mrb[214].mxu1 }
0x107b   : > { %4087 = vst.msk [vmem:[%s7752_s24 + $0x38] sm:$0xff] %vm408_vm2, %v4078_v63  ;;  %v4103_v55 = vsel %vm408_vm2, %v4078_v63, 0.0  ;;  %v4121_v58 = vmul.f32 %v4078_v63, %v4078_v63  ;;  %v4063_v4 = vadd.f32 %v4051_v1, %v7607_v7  ;;  %v5809_v17 = vpop.f32.mrb[215].mxu1 }
0x107c   : > { %v4104_v13 = vadd.f32 %v4103_v55, %v4102_v47 }
0x107d   : > { %v4136_v20 = vsel %vm408_vm2, %v4121_v58, 0.0  ;;  %v4079_v8 = vadd.f32 %v7746_v54, %v4063_v4 }
0x107e   : > { %v4137_v9 = vadd.f32 %v4136_v20, %v4135_v19 }
0x107f   : > { %4089 = vst.msk [vmem:[%s7752_s24 + $0x40] sm:$0x3] %vm4088_vm8, %v4079_v8  ;;  %v4105_v2 = vsel %vm4088_vm8, %v4079_v8, 0.0  ;;  %v4122_v25 = vmul.f32 %v4079_v8, %v4079_v8 }
0x1080   : > { %v4106_v32 = vadd.f32 %v4105_v2, %v4104_v13 }
0x1081   : > { %v4138_v12 = vsel %vm4088_vm8, %v4122_v25, 0.0 }
0x1082   : > { %v4107_v11 = vrot.slane %v4106_v32, 4  ;;  %v4139_v36 = vadd.f32 %v4138_v12, %v4137_v9 }
0x1084   : > { %v4108_v14 = vadd.f32 %v4107_v11, %v4106_v32  ;;  %v4140_v40 = vrot.slane %v4139_v36, 4 }
0x1086   : > { %v4109_v26 = vrot.slane %v4108_v14, 2  ;;  %v4141_v7 = vadd.f32 %v4140_v40, %v4139_v36 }
0x1088   : > { %v4110_v51 = vadd.f32 %v4109_v26, %v4108_v14  ;;  %v4142_v37 = vrot.slane %v4141_v7, 2 }
0x108a   : > { %v4111_v29 = vrot.slane %v4110_v51, 1  ;;  %v4143_v35 = vadd.f32 %v4142_v37, %v4141_v7 }
0x108c   : > { %v4112_v54 = vadd.f32 %v4111_v29, %v4110_v51  ;;  %v4144_v38 = vrot.slane %v4143_v35, 1 }
0x108e   : > { %4113 = vst.msk [vmem:[%s371_s28] sm:$0x1] %vm418_vm0, %v4112_v54  ;;  %v4145_v44 = vadd.f32 %v4144_v38, %v4143_v35 }
0x1090   : > { %4146 = vst.msk [vmem:[%s371_s28 + $0x1] sm:$0x1] %vm418_vm0, %v4145_v44 }
0x1091 PF: > { %s20_s30 = sadd.s32 1, %s6186_s30  }
0x1092   : > { %p17_p4 = scmp.ge.s32.totalorder %s20_s30, 4  }
0x1094   :  { %19 = sbr.rel (!%p17_p4) target bundleno = 1 (0x1), region = 112 }

</bundles_post_ra>
